<compile_context>
chip_gen: v7x
topology: tpu7x:2x2x1
jax: 0.10.0
libtpu: 0.0.40
codegen_flags: <defaults>
</compile_context>

<pallas_src>
import functools

import jax
import jax.numpy as jnp
from jax.experimental import pallas as pl
from jax.experimental.pallas import tpu as pltpu


# ----------------------------------------------------------------------------
# Fused kernel (one batch element per grid step)
# ----------------------------------------------------------------------------
def conv_block2_kernel(x_ref, w1_ref, w2_ref, b2_ref, o_ref, xp_ref, p_ref,
                       *, H, W, Cin, Cout):
    """x_ref : (1, H, W, Cin)     input block (NHWC, one batch element)
       w1_ref: (9*Cin, Cin)       conv1 weights, rows ordered (kh, kw, cin)
       w2_ref: (Cout, 9*Cin)      conv2 weights, cols ordered (kh, kw, cin)
       b2_ref: (Cout, 1)          conv2 bias
       o_ref : (1, Cout, H*W)     channel-major, lane-dense output block
       xp_ref: (H+2, W+2, Cin)    VMEM scratch: reflection-padded activation
       p_ref : (H*W, 9*Cin)       VMEM scratch: im2col patch matrix
    """

    def reflect_pad(t):
        # Write t (H, W, Cin) into xp_ref with ReflectionPad2d(1) semantics.
        xp_ref[1:H + 1, 1:W + 1, :] = t
        xp_ref[0:1, 1:W + 1, :] = t[1:2, :, :]                    # top    <- row 1
        xp_ref[H + 1:H + 2, 1:W + 1, :] = t[H - 2:H - 1, :, :]    # bottom <- row H-2
        xp_ref[:, 0:1, :] = xp_ref[:, 2:3, :]                     # left   <- col 2
        xp_ref[:, W + 1:W + 2, :] = xp_ref[:, W - 1:W, :]         # right  <- col W-1

    def build_patches():
        # im2col: p_ref[h*W + w, (kh*3 + kw)*Cin + c] = xp[h+kh, w+kw, c]
        for kh in range(3):
            for kw in range(3):
                j = kh * 3 + kw
                piece = xp_ref[kh:kh + H, kw:kw + W, :]           # (H, W, Cin)
                p_ref[:, j * Cin:(j + 1) * Cin] = piece.reshape(H * W, Cin)
        return p_ref[...]                                          # (H*W, 9*Cin)

    x = x_ref[0]                                                   # (H, W, Cin)

    # --- conv1 (bias omitted: it cancels with the InstanceNorm mean) -------
    reflect_pad(x)
    p1 = build_patches()
    y1 = jnp.dot(p1, w1_ref[...], preferred_element_type=jnp.float32)  # (H*W, Cin)

    # --- InstanceNorm2d (no affine, biased var, eps=1e-5) + ReLU ------------
    mean = jnp.mean(y1, axis=0, keepdims=True)
    var = jnp.mean((y1 - mean) ** 2, axis=0, keepdims=True)
    y1 = jnp.maximum((y1 - mean) * jax.lax.rsqrt(var + 1e-5), 0.0)

    # --- conv2 in transposed orientation -> (Cout, H*W) lane-dense output --
    reflect_pad(y1.reshape(H, W, Cin))
    p2 = build_patches()
    y2 = jax.lax.dot_general(w2_ref[...], p2, (((1,), (1,)), ((), ())),
                             preferred_element_type=jnp.float32)   # (Cout, H*W)
    o_ref[0] = y2 + b2_ref[...]


# ----------------------------------------------------------------------------
# Wrapper
# ----------------------------------------------------------------------------
def conv_block2(x_nchw, params):
    """Forward pass equivalent to the PyTorch ConvBlock2 (NCHW in/out)."""
    B, Cin, H, W = x_nchw.shape
    Cout = params["w2"].shape[-1]

    # NCHW -> NHWC for channel-minor patch construction (single XLA relayout
    # of the input; the output needs no transpose: kernel emits channel-major).
    x = jnp.transpose(x_nchw, (0, 2, 3, 1))

    # Tiny one-time weight prep: HWIO -> matmul-ready matrices whose
    # (kh, kw, cin) ordering matches the im2col patch columns.
    w1_km = params["w1"].reshape(9 * Cin, Cin)                          # (9Cin, Cin)
    w2_cm = jnp.transpose(params["w2"], (3, 0, 1, 2)).reshape(Cout, 9 * Cin)
    b2 = params["b2"].reshape(Cout, 1)

    out = pl.pallas_call(
        functools.partial(conv_block2_kernel, H=H, W=W, Cin=Cin, Cout=Cout),
        out_shape=jax.ShapeDtypeStruct((B, Cout, H * W), jnp.float32),
        grid=(B,),
        in_specs=[
            pl.BlockSpec((1, H, W, Cin), lambda b: (b, 0, 0, 0)),
            pl.BlockSpec((9 * Cin, Cin), lambda b: (0, 0)),
            pl.BlockSpec((Cout, 9 * Cin), lambda b: (0, 0)),
            pl.BlockSpec((Cout, 1), lambda b: (0, 0)),
        ],
        out_specs=pl.BlockSpec((1, Cout, H * W), lambda b: (b, 0, 0)),
        scratch_shapes=[
            pltpu.VMEM((H + 2, W + 2, Cin), jnp.float32),   # padded activation
            pltpu.VMEM((H * W, 9 * Cin), jnp.float32),      # im2col patches
        ],
        compiler_params=pltpu.CompilerParams(
            dimension_semantics=("parallel",)),
    )(x, w1_km, w2_cm, b2)

    # (B, Cout, H*W) -> (B, Cout, H, W): contiguous, free reshape.
    return out.reshape(B, Cout, H, W)


# ----------------------------------------------------------------------------
# Pure-JAX reference (keeps the conv1 bias to confirm it cancels exactly)
# ----------------------------------------------------------------------------
def conv_block2_ref(x_nchw, params):
    x = jnp.transpose(x_nchw, (0, 2, 3, 1))
    dn = ("NHWC", "HWIO", "NHWC")
    xp = jnp.pad(x, ((0, 0), (1, 1), (1, 1), (0, 0)), mode="reflect")
    y = jax.lax.conv_general_dilated(xp, params["w1"], (1, 1), "VALID",
                                     dimension_numbers=dn) + params["b1"]
    mean = jnp.mean(y, axis=(1, 2), keepdims=True)
    var = jnp.mean((y - mean) ** 2, axis=(1, 2), keepdims=True)
    y = jnp.maximum((y - mean) * jax.lax.rsqrt(var + 1e-5), 0.0)
    yp = jnp.pad(y, ((0, 0), (1, 1), (1, 1), (0, 0)), mode="reflect")
    y2 = jax.lax.conv_general_dilated(yp, params["w2"], (1, 1), "VALID",
                                      dimension_numbers=dn) + params["b2"]
    return jnp.transpose(y2, (0, 3, 1, 2))


# ----------------------------------------------------------------------------
# Deterministic init (PyTorch Conv2d default: U(-k, k), k = 1/sqrt(fan_in))
# ----------------------------------------------------------------------------
def init_params(key, cin, cout):
    k1, k2, k3, k4 = jax.random.split(key, 4)
    bound = 1.0 / jnp.sqrt(cin * 9)
    return {
        "w1": jax.random.uniform(k1, (3, 3, cin, cin), jnp.float32, -bound, bound),
        "b1": jax.random.uniform(k2, (cin,), jnp.float32, -bound, bound),
        "w2": jax.random.uniform(k3, (3, 3, cin, cout), jnp.float32, -bound, bound),
        "b2": jax.random.uniform(k4, (cout,), jnp.float32, -bound, bound),
    }


if __name__ == "__main__":
    B, Cin, Cout, H, W = 2, 4, 8, 16, 16
    key = jax.random.PRNGKey(0)
    kx, kp = jax.random.split(key)
    x = jax.random.normal(kx, (B, Cin, H, W), jnp.float32)   # NCHW like PyTorch
    params = init_params(kp, Cin, Cout)

    out = jax.block_until_ready(jax.jit(conv_block2)(x, params))
    ref = jax.block_until_ready(conv_block2_ref(x, params))

    assert out.shape == (B, Cout, H, W), out.shape
    assert jnp.allclose(out, ref, atol=1e-3, rtol=1e-3), "mismatch vs reference"

    print("KERNEL_OK")
</pallas_src>

<mosaic_0001>
module attributes {stable_mosaic.version = 11 : i64} {
  func.func @conv_block2_kernel(%arg0: i32, %arg1: memref<1x16x16x4xf32, #tpu.memory_space<vmem>>, %arg2: memref<36x4xf32, #tpu.memory_space<vmem>>, %arg3: memref<8x36xf32, #tpu.memory_space<vmem>>, %arg4: memref<8x1xf32, #tpu.memory_space<vmem>>, %arg5: memref<1x8x256xf32, #tpu.memory_space<vmem>>, %arg6: memref<18x18x4xf32, #tpu.memory_space<vmem>>, %arg7: memref<256x36xf32, #tpu.memory_space<vmem>>) attributes {dimension_semantics = [#tpu.dimension_semantics<parallel>], iteration_bounds = array<i64: 2>, scalar_prefetch = 0 : i64, scratch_operands = 2 : i64, tpu.core_type = #tpu.core_type<tc>, window_params = [{transform_indices = @transform_0, window_bounds = array<i64: 1, 16, 16, 4>}, {pipeline_mode = #tpu.pipeline_mode<synchronous>, transform_indices = @transform_1, window_bounds = array<i64: 36, 4>}, {pipeline_mode = #tpu.pipeline_mode<synchronous>, transform_indices = @transform_2, window_bounds = array<i64: 8, 36>}, {pipeline_mode = #tpu.pipeline_mode<synchronous>, transform_indices = @transform_3, window_bounds = array<i64: 8, 1>}, {transform_indices = @transform_4, window_bounds = array<i64: 1, 8, 256>}]} {
    %c0 = arith.constant 0 : index
    %c0_0 = arith.constant 0 : index
    %c0_1 = arith.constant 0 : index
    %c0_2 = arith.constant 0 : index
    %0 = vector.load %arg1[%c0, %c0_0, %c0_1, %c0_2] : memref<1x16x16x4xf32, #tpu.memory_space<vmem>>, vector<1x16x16x4xf32>
    %1 = vector.shape_cast %0 : vector<1x16x16x4xf32> to vector<16x16x4xf32>
    %c1 = arith.constant 1 : index
    %c1_3 = arith.constant 1 : index
    %c0_4 = arith.constant 0 : index
    %2 = vector.load %arg6[%c1, %c1_3, %c0_4] : memref<18x18x4xf32, #tpu.memory_space<vmem>>, vector<16x16x4xf32>
    tpu.vector_store %arg6[%c1, %c1_3, %c0_4], %1 {strides = array<i32>} : memref<18x18x4xf32, #tpu.memory_space<vmem>>, vector<16x16x4xf32>,
    %3 = vector.extract_strided_slice %1 {offsets = [1, 0, 0], sizes = [1, 16, 4], strides = [1, 1, 1]} : vector<16x16x4xf32> to vector<1x16x4xf32>
    %c0_5 = arith.constant 0 : index
    %c1_6 = arith.constant 1 : index
    %c0_7 = arith.constant 0 : index
    %4 = vector.load %arg6[%c0_5, %c1_6, %c0_7] : memref<18x18x4xf32, #tpu.memory_space<vmem>>, vector<1x16x4xf32>
    tpu.vector_store %arg6[%c0_5, %c1_6, %c0_7], %3 {strides = array<i32>} : memref<18x18x4xf32, #tpu.memory_space<vmem>>, vector<1x16x4xf32>,
    %5 = vector.extract_strided_slice %1 {offsets = [14, 0, 0], sizes = [1, 16, 4], strides = [1, 1, 1]} : vector<16x16x4xf32> to vector<1x16x4xf32>
    %c17 = arith.constant 17 : index
    %c1_8 = arith.constant 1 : index
    %c0_9 = arith.constant 0 : index
    %6 = vector.load %arg6[%c17, %c1_8, %c0_9] : memref<18x18x4xf32, #tpu.memory_space<vmem>>, vector<1x16x4xf32>
    tpu.vector_store %arg6[%c17, %c1_8, %c0_9], %5 {strides = array<i32>} : memref<18x18x4xf32, #tpu.memory_space<vmem>>, vector<1x16x4xf32>,
    %c0_10 = arith.constant 0 : index
    %c2 = arith.constant 2 : index
    %c0_11 = arith.constant 0 : index
    %7 = vector.load %arg6[%c0_10, %c2, %c0_11] : memref<18x18x4xf32, #tpu.memory_space<vmem>>, vector<18x1x4xf32>
    %c0_12 = arith.constant 0 : index
    %c0_13 = arith.constant 0 : index
    %c0_14 = arith.constant 0 : index
    %8 = vector.load %arg6[%c0_12, %c0_13, %c0_14] : memref<18x18x4xf32, #tpu.memory_space<vmem>>, vector<18x1x4xf32>
    tpu.vector_store %arg6[%c0_12, %c0_13, %c0_14], %7 {strides = array<i32>} : memref<18x18x4xf32, #tpu.memory_space<vmem>>, vector<18x1x4xf32>,
    %c0_15 = arith.constant 0 : index
    %c15 = arith.constant 15 : index
    %c0_16 = arith.constant 0 : index
    %9 = vector.load %arg6[%c0_15, %c15, %c0_16] : memref<18x18x4xf32, #tpu.memory_space<vmem>>, vector<18x1x4xf32>
    %c0_17 = arith.constant 0 : index
    %c17_18 = arith.constant 17 : index
    %c0_19 = arith.constant 0 : index
    %10 = vector.load %arg6[%c0_17, %c17_18, %c0_19] : memref<18x18x4xf32, #tpu.memory_space<vmem>>, vector<18x1x4xf32>
    tpu.vector_store %arg6[%c0_17, %c17_18, %c0_19], %9 {strides = array<i32>} : memref<18x18x4xf32, #tpu.memory_space<vmem>>, vector<18x1x4xf32>,
    %c0_20 = arith.constant 0 : index
    %c0_21 = arith.constant 0 : index
    %c0_22 = arith.constant 0 : index
    %11 = vector.load %arg6[%c0_20, %c0_21, %c0_22] : memref<18x18x4xf32, #tpu.memory_space<vmem>>, vector<16x16x4xf32>
    %12 = vector.shape_cast %11 : vector<16x16x4xf32> to vector<256x4xf32>
    %c0_23 = arith.constant 0 : index
    %c0_24 = arith.constant 0 : index
    %13 = vector.load %arg7[%c0_23, %c0_24] : memref<256x36xf32, #tpu.memory_space<vmem>>, vector<256x4xf32>
    tpu.vector_store %arg7[%c0_23, %c0_24], %12 {strides = array<i32>} : memref<256x36xf32, #tpu.memory_space<vmem>>, vector<256x4xf32>,
    %c0_25 = arith.constant 0 : index
    %c1_26 = arith.constant 1 : index
    %c0_27 = arith.constant 0 : index
    %14 = vector.load %arg6[%c0_25, %c1_26, %c0_27] : memref<18x18x4xf32, #tpu.memory_space<vmem>>, vector<16x16x4xf32>
    %15 = vector.shape_cast %14 : vector<16x16x4xf32> to vector<256x4xf32>
    %c0_28 = arith.constant 0 : index
    %c4 = arith.constant 4 : index
    %16 = vector.load %arg7[%c0_28, %c4] : memref<256x36xf32, #tpu.memory_space<vmem>>, vector<256x4xf32>
    tpu.vector_store %arg7[%c0_28, %c4], %15 {strides = array<i32>} : memref<256x36xf32, #tpu.memory_space<vmem>>, vector<256x4xf32>,
    %c0_29 = arith.constant 0 : index
    %c2_30 = arith.constant 2 : index
    %c0_31 = arith.constant 0 : index
    %17 = vector.load %arg6[%c0_29, %c2_30, %c0_31] : memref<18x18x4xf32, #tpu.memory_space<vmem>>, vector<16x16x4xf32>
    %18 = vector.shape_cast %17 : vector<16x16x4xf32> to vector<256x4xf32>
    %c0_32 = arith.constant 0 : index
    %c8 = arith.constant 8 : index
    %19 = vector.load %arg7[%c0_32, %c8] : memref<256x36xf32, #tpu.memory_space<vmem>>, vector<256x4xf32>
    tpu.vector_store %arg7[%c0_32, %c8], %18 {strides = array<i32>} : memref<256x36xf32, #tpu.memory_space<vmem>>, vector<256x4xf32>,
    %c1_33 = arith.constant 1 : index
    %c0_34 = arith.constant 0 : index
    %c0_35 = arith.constant 0 : index
    %20 = vector.load %arg6[%c1_33, %c0_34, %c0_35] : memref<18x18x4xf32, #tpu.memory_space<vmem>>, vector<16x16x4xf32>
    %21 = vector.shape_cast %20 : vector<16x16x4xf32> to vector<256x4xf32>
    %c0_36 = arith.constant 0 : index
    %c12 = arith.constant 12 : index
    %22 = vector.load %arg7[%c0_36, %c12] : memref<256x36xf32, #tpu.memory_space<vmem>>, vector<256x4xf32>
    tpu.vector_store %arg7[%c0_36, %c12], %21 {strides = array<i32>} : memref<256x36xf32, #tpu.memory_space<vmem>>, vector<256x4xf32>,
    %c1_37 = arith.constant 1 : index
    %c1_38 = arith.constant 1 : index
    %c0_39 = arith.constant 0 : index
    %23 = vector.load %arg6[%c1_37, %c1_38, %c0_39] : memref<18x18x4xf32, #tpu.memory_space<vmem>>, vector<16x16x4xf32>
    %24 = vector.shape_cast %23 : vector<16x16x4xf32> to vector<256x4xf32>
    %c0_40 = arith.constant 0 : index
    %c16 = arith.constant 16 : index
    %25 = vector.load %arg7[%c0_40, %c16] : memref<256x36xf32, #tpu.memory_space<vmem>>, vector<256x4xf32>
    tpu.vector_store %arg7[%c0_40, %c16], %24 {strides = array<i32>} : memref<256x36xf32, #tpu.memory_space<vmem>>, vector<256x4xf32>,
    %c1_41 = arith.constant 1 : index
    %c2_42 = arith.constant 2 : index
    %c0_43 = arith.constant 0 : index
    %26 = vector.load %arg6[%c1_41, %c2_42, %c0_43] : memref<18x18x4xf32, #tpu.memory_space<vmem>>, vector<16x16x4xf32>
    %27 = vector.shape_cast %26 : vector<16x16x4xf32> to vector<256x4xf32>
    %c0_44 = arith.constant 0 : index
    %c20 = arith.constant 20 : index
    %28 = vector.load %arg7[%c0_44, %c20] : memref<256x36xf32, #tpu.memory_space<vmem>>, vector<256x4xf32>
    tpu.vector_store %arg7[%c0_44, %c20], %27 {strides = array<i32>} : memref<256x36xf32, #tpu.memory_space<vmem>>, vector<256x4xf32>,
    %c2_45 = arith.constant 2 : index
    %c0_46 = arith.constant 0 : index
    %c0_47 = arith.constant 0 : index
    %29 = vector.load %arg6[%c2_45, %c0_46, %c0_47] : memref<18x18x4xf32, #tpu.memory_space<vmem>>, vector<16x16x4xf32>
    %30 = vector.shape_cast %29 : vector<16x16x4xf32> to vector<256x4xf32>
    %c0_48 = arith.constant 0 : index
    %c24 = arith.constant 24 : index
    %31 = vector.load %arg7[%c0_48, %c24] : memref<256x36xf32, #tpu.memory_space<vmem>>, vector<256x4xf32>
    tpu.vector_store %arg7[%c0_48, %c24], %30 {strides = array<i32>} : memref<256x36xf32, #tpu.memory_space<vmem>>, vector<256x4xf32>,
    %c2_49 = arith.constant 2 : index
    %c1_50 = arith.constant 1 : index
    %c0_51 = arith.constant 0 : index
    %32 = vector.load %arg6[%c2_49, %c1_50, %c0_51] : memref<18x18x4xf32, #tpu.memory_space<vmem>>, vector<16x16x4xf32>
    %33 = vector.shape_cast %32 : vector<16x16x4xf32> to vector<256x4xf32>
    %c0_52 = arith.constant 0 : index
    %c28 = arith.constant 28 : index
    %34 = vector.load %arg7[%c0_52, %c28] : memref<256x36xf32, #tpu.memory_space<vmem>>, vector<256x4xf32>
    tpu.vector_store %arg7[%c0_52, %c28], %33 {strides = array<i32>} : memref<256x36xf32, #tpu.memory_space<vmem>>, vector<256x4xf32>,
    %c2_53 = arith.constant 2 : index
    %c2_54 = arith.constant 2 : index
    %c0_55 = arith.constant 0 : index
    %35 = vector.load %arg6[%c2_53, %c2_54, %c0_55] : memref<18x18x4xf32, #tpu.memory_space<vmem>>, vector<16x16x4xf32>
    %36 = vector.shape_cast %35 : vector<16x16x4xf32> to vector<256x4xf32>
    %c0_56 = arith.constant 0 : index
    %c32 = arith.constant 32 : index
    %37 = vector.load %arg7[%c0_56, %c32] : memref<256x36xf32, #tpu.memory_space<vmem>>, vector<256x4xf32>
    tpu.vector_store %arg7[%c0_56, %c32], %36 {strides = array<i32>} : memref<256x36xf32, #tpu.memory_space<vmem>>, vector<256x4xf32>,
    %c0_57 = arith.constant 0 : index
    %c0_58 = arith.constant 0 : index
    %38 = vector.load %arg7[%c0_57, %c0_58] : memref<256x36xf32, #tpu.memory_space<vmem>>, vector<256x36xf32>
    %c0_59 = arith.constant 0 : index
    %c0_60 = arith.constant 0 : index
    %39 = vector.load %arg2[%c0_59, %c0_60] : memref<36x4xf32, #tpu.memory_space<vmem>>, vector<36x4xf32>
    %cst = arith.constant dense<0.000000e+00> : vector<256x4xf32>
    %40 = tpu.matmul %38, %39, %cst {dimension_numbers = #tpu.dot_dimension_numbers<[1], [0], [0], [1], [0, 0, 1, 1], [], []>} : vector<256x36xf32>, vector<36x4xf32>, vector<256x4xf32> -> vector<256x4xf32>
    %cst_61 = arith.constant dense<0.000000e+00> : vector<4xf32>
    %41 = vector.multi_reduction <add>, %40, %cst_61 [0] : vector<256x4xf32> to vector<4xf32>
    %42 = vector.shape_cast %41 : vector<4xf32> to vector<1x4xf32>
    %cst_62 = arith.constant 2.560000e+02 : f32
    %43 = vector.broadcast %cst_62 : f32 to vector<1x4xf32>
    %44 = arith.divf %42, %43 : vector<1x4xf32>
    %45 = vector.broadcast %44 : vector<1x4xf32> to vector<256x4xf32>
    %46 = arith.subf %40, %45 : vector<256x4xf32>
    %47 = arith.mulf %46, %46 : vector<256x4xf32>
    %cst_63 = arith.constant dense<0.000000e+00> : vector<4xf32>
    %48 = vector.multi_reduction <add>, %47, %cst_63 [0] : vector<256x4xf32> to vector<4xf32>
    %49 = vector.shape_cast %48 : vector<4xf32> to vector<1x4xf32>
    %cst_64 = arith.constant 2.560000e+02 : f32
    %50 = vector.broadcast %cst_64 : f32 to vector<1x4xf32>
    %51 = arith.divf %49, %50 : vector<1x4xf32>
    %52 = vector.broadcast %44 : vector<1x4xf32> to vector<256x4xf32>
    %53 = arith.subf %40, %52 : vector<256x4xf32>
    %cst_65 = arith.constant 9.99999974E-6 : f32
    %54 = vector.broadcast %cst_65 : f32 to vector<1x4xf32>
    %55 = arith.addf %51, %54 : vector<1x4xf32>
    %56 = math.rsqrt %55 : vector<1x4xf32>
    %57 = vector.broadcast %56 : vector<1x4xf32> to vector<256x4xf32>
    %58 = arith.mulf %53, %57 : vector<256x4xf32>
    %cst_66 = arith.constant 0.000000e+00 : f32
    %59 = vector.broadcast %cst_66 : f32 to vector<256x4xf32>
    %60 = arith.maximumf %58, %59 : vector<256x4xf32>
    %61 = vector.shape_cast %60 : vector<256x4xf32> to vector<16x16x4xf32>
    %c1_67 = arith.constant 1 : index
    %c1_68 = arith.constant 1 : index
    %c0_69 = arith.constant 0 : index
    %62 = vector.load %arg6[%c1_67, %c1_68, %c0_69] : memref<18x18x4xf32, #tpu.memory_space<vmem>>, vector<16x16x4xf32>
    tpu.vector_store %arg6[%c1_67, %c1_68, %c0_69], %61 {strides = array<i32>} : memref<18x18x4xf32, #tpu.memory_space<vmem>>, vector<16x16x4xf32>,
    %63 = vector.extract_strided_slice %61 {offsets = [1, 0, 0], sizes = [1, 16, 4], strides = [1, 1, 1]} : vector<16x16x4xf32> to vector<1x16x4xf32>
    %c0_70 = arith.constant 0 : index
    %c1_71 = arith.constant 1 : index
    %c0_72 = arith.constant 0 : index
    %64 = vector.load %arg6[%c0_70, %c1_71, %c0_72] : memref<18x18x4xf32, #tpu.memory_space<vmem>>, vector<1x16x4xf32>
    tpu.vector_store %arg6[%c0_70, %c1_71, %c0_72], %63 {strides = array<i32>} : memref<18x18x4xf32, #tpu.memory_space<vmem>>, vector<1x16x4xf32>,
    %65 = vector.extract_strided_slice %61 {offsets = [14, 0, 0], sizes = [1, 16, 4], strides = [1, 1, 1]} : vector<16x16x4xf32> to vector<1x16x4xf32>
    %c17_73 = arith.constant 17 : index
    %c1_74 = arith.constant 1 : index
    %c0_75 = arith.constant 0 : index
    %66 = vector.load %arg6[%c17_73, %c1_74, %c0_75] : memref<18x18x4xf32, #tpu.memory_space<vmem>>, vector<1x16x4xf32>
    tpu.vector_store %arg6[%c17_73, %c1_74, %c0_75], %65 {strides = array<i32>} : memref<18x18x4xf32, #tpu.memory_space<vmem>>, vector<1x16x4xf32>,
    %c0_76 = arith.constant 0 : index
    %c2_77 = arith.constant 2 : index
    %c0_78 = arith.constant 0 : index
    %67 = vector.load %arg6[%c0_76, %c2_77, %c0_78] : memref<18x18x4xf32, #tpu.memory_space<vmem>>, vector<18x1x4xf32>
    %c0_79 = arith.constant 0 : index
    %c0_80 = arith.constant 0 : index
    %c0_81 = arith.constant 0 : index
    %68 = vector.load %arg6[%c0_79, %c0_80, %c0_81] : memref<18x18x4xf32, #tpu.memory_space<vmem>>, vector<18x1x4xf32>
    tpu.vector_store %arg6[%c0_79, %c0_80, %c0_81], %67 {strides = array<i32>} : memref<18x18x4xf32, #tpu.memory_space<vmem>>, vector<18x1x4xf32>,
    %c0_82 = arith.constant 0 : index
    %c15_83 = arith.constant 15 : index
    %c0_84 = arith.constant 0 : index
    %69 = vector.load %arg6[%c0_82, %c15_83, %c0_84] : memref<18x18x4xf32, #tpu.memory_space<vmem>>, vector<18x1x4xf32>
    %c0_85 = arith.constant 0 : index
    %c17_86 = arith.constant 17 : index
    %c0_87 = arith.constant 0 : index
    %70 = vector.load %arg6[%c0_85, %c17_86, %c0_87] : memref<18x18x4xf32, #tpu.memory_space<vmem>>, vector<18x1x4xf32>
    tpu.vector_store %arg6[%c0_85, %c17_86, %c0_87], %69 {strides = array<i32>} : memref<18x18x4xf32, #tpu.memory_space<vmem>>, vector<18x1x4xf32>,
    %c0_88 = arith.constant 0 : index
    %c0_89 = arith.constant 0 : index
    %c0_90 = arith.constant 0 : index
    %71 = vector.load %arg6[%c0_88, %c0_89, %c0_90] : memref<18x18x4xf32, #tpu.memory_space<vmem>>, vector<16x16x4xf32>
    %72 = vector.shape_cast %71 : vector<16x16x4xf32> to vector<256x4xf32>
    %c0_91 = arith.constant 0 : index
    %c0_92 = arith.constant 0 : index
    %73 = vector.load %arg7[%c0_91, %c0_92] : memref<256x36xf32, #tpu.memory_space<vmem>>, vector<256x4xf32>
    tpu.vector_store %arg7[%c0_91, %c0_92], %72 {strides = array<i32>} : memref<256x36xf32, #tpu.memory_space<vmem>>, vector<256x4xf32>,
    %c0_93 = arith.constant 0 : index
    %c1_94 = arith.constant 1 : index
    %c0_95 = arith.constant 0 : index
    %74 = vector.load %arg6[%c0_93, %c1_94, %c0_95] : memref<18x18x4xf32, #tpu.memory_space<vmem>>, vector<16x16x4xf32>
    %75 = vector.shape_cast %74 : vector<16x16x4xf32> to vector<256x4xf32>
    %c0_96 = arith.constant 0 : index
    %c4_97 = arith.constant 4 : index
    %76 = vector.load %arg7[%c0_96, %c4_97] : memref<256x36xf32, #tpu.memory_space<vmem>>, vector<256x4xf32>
    tpu.vector_store %arg7[%c0_96, %c4_97], %75 {strides = array<i32>} : memref<256x36xf32, #tpu.memory_space<vmem>>, vector<256x4xf32>,
    %c0_98 = arith.constant 0 : index
    %c2_99 = arith.constant 2 : index
    %c0_100 = arith.constant 0 : index
    %77 = vector.load %arg6[%c0_98, %c2_99, %c0_100] : memref<18x18x4xf32, #tpu.memory_space<vmem>>, vector<16x16x4xf32>
    %78 = vector.shape_cast %77 : vector<16x16x4xf32> to vector<256x4xf32>
    %c0_101 = arith.constant 0 : index
    %c8_102 = arith.constant 8 : index
    %79 = vector.load %arg7[%c0_101, %c8_102] : memref<256x36xf32, #tpu.memory_space<vmem>>, vector<256x4xf32>
    tpu.vector_store %arg7[%c0_101, %c8_102], %78 {strides = array<i32>} : memref<256x36xf32, #tpu.memory_space<vmem>>, vector<256x4xf32>,
    %c1_103 = arith.constant 1 : index
    %c0_104 = arith.constant 0 : index
    %c0_105 = arith.constant 0 : index
    %80 = vector.load %arg6[%c1_103, %c0_104, %c0_105] : memref<18x18x4xf32, #tpu.memory_space<vmem>>, vector<16x16x4xf32>
    %81 = vector.shape_cast %80 : vector<16x16x4xf32> to vector<256x4xf32>
    %c0_106 = arith.constant 0 : index
    %c12_107 = arith.constant 12 : index
    %82 = vector.load %arg7[%c0_106, %c12_107] : memref<256x36xf32, #tpu.memory_space<vmem>>, vector<256x4xf32>
    tpu.vector_store %arg7[%c0_106, %c12_107], %81 {strides = array<i32>} : memref<256x36xf32, #tpu.memory_space<vmem>>, vector<256x4xf32>,
    %c1_108 = arith.constant 1 : index
    %c1_109 = arith.constant 1 : index
    %c0_110 = arith.constant 0 : index
    %83 = vector.load %arg6[%c1_108, %c1_109, %c0_110] : memref<18x18x4xf32, #tpu.memory_space<vmem>>, vector<16x16x4xf32>
    %84 = vector.shape_cast %83 : vector<16x16x4xf32> to vector<256x4xf32>
    %c0_111 = arith.constant 0 : index
    %c16_112 = arith.constant 16 : index
    %85 = vector.load %arg7[%c0_111, %c16_112] : memref<256x36xf32, #tpu.memory_space<vmem>>, vector<256x4xf32>
    tpu.vector_store %arg7[%c0_111, %c16_112], %84 {strides = array<i32>} : memref<256x36xf32, #tpu.memory_space<vmem>>, vector<256x4xf32>,
    %c1_113 = arith.constant 1 : index
    %c2_114 = arith.constant 2 : index
    %c0_115 = arith.constant 0 : index
    %86 = vector.load %arg6[%c1_113, %c2_114, %c0_115] : memref<18x18x4xf32, #tpu.memory_space<vmem>>, vector<16x16x4xf32>
    %87 = vector.shape_cast %86 : vector<16x16x4xf32> to vector<256x4xf32>
    %c0_116 = arith.constant 0 : index
    %c20_117 = arith.constant 20 : index
    %88 = vector.load %arg7[%c0_116, %c20_117] : memref<256x36xf32, #tpu.memory_space<vmem>>, vector<256x4xf32>
    tpu.vector_store %arg7[%c0_116, %c20_117], %87 {strides = array<i32>} : memref<256x36xf32, #tpu.memory_space<vmem>>, vector<256x4xf32>,
    %c2_118 = arith.constant 2 : index
    %c0_119 = arith.constant 0 : index
    %c0_120 = arith.constant 0 : index
    %89 = vector.load %arg6[%c2_118, %c0_119, %c0_120] : memref<18x18x4xf32, #tpu.memory_space<vmem>>, vector<16x16x4xf32>
    %90 = vector.shape_cast %89 : vector<16x16x4xf32> to vector<256x4xf32>
    %c0_121 = arith.constant 0 : index
    %c24_122 = arith.constant 24 : index
    %91 = vector.load %arg7[%c0_121, %c24_122] : memref<256x36xf32, #tpu.memory_space<vmem>>, vector<256x4xf32>
    tpu.vector_store %arg7[%c0_121, %c24_122], %90 {strides = array<i32>} : memref<256x36xf32, #tpu.memory_space<vmem>>, vector<256x4xf32>,
    %c2_123 = arith.constant 2 : index
    %c1_124 = arith.constant 1 : index
    %c0_125 = arith.constant 0 : index
    %92 = vector.load %arg6[%c2_123, %c1_124, %c0_125] : memref<18x18x4xf32, #tpu.memory_space<vmem>>, vector<16x16x4xf32>
    %93 = vector.shape_cast %92 : vector<16x16x4xf32> to vector<256x4xf32>
    %c0_126 = arith.constant 0 : index
    %c28_127 = arith.constant 28 : index
    %94 = vector.load %arg7[%c0_126, %c28_127] : memref<256x36xf32, #tpu.memory_space<vmem>>, vector<256x4xf32>
    tpu.vector_store %arg7[%c0_126, %c28_127], %93 {strides = array<i32>} : memref<256x36xf32, #tpu.memory_space<vmem>>, vector<256x4xf32>,
    %c2_128 = arith.constant 2 : index
    %c2_129 = arith.constant 2 : index
    %c0_130 = arith.constant 0 : index
    %95 = vector.load %arg6[%c2_128, %c2_129, %c0_130] : memref<18x18x4xf32, #tpu.memory_space<vmem>>, vector<16x16x4xf32>
    %96 = vector.shape_cast %95 : vector<16x16x4xf32> to vector<256x4xf32>
    %c0_131 = arith.constant 0 : index
    %c32_132 = arith.constant 32 : index
    %97 = vector.load %arg7[%c0_131, %c32_132] : memref<256x36xf32, #tpu.memory_space<vmem>>, vector<256x4xf32>
    tpu.vector_store %arg7[%c0_131, %c32_132], %96 {strides = array<i32>} : memref<256x36xf32, #tpu.memory_space<vmem>>, vector<256x4xf32>,
    %c0_133 = arith.constant 0 : index
    %c0_134 = arith.constant 0 : index
    %98 = vector.load %arg7[%c0_133, %c0_134] : memref<256x36xf32, #tpu.memory_space<vmem>>, vector<256x36xf32>
    %c0_135 = arith.constant 0 : index
    %c0_136 = arith.constant 0 : index
    %99 = vector.load %arg3[%c0_135, %c0_136] : memref<8x36xf32, #tpu.memory_space<vmem>>, vector<8x36xf32>
    %cst_137 = arith.constant dense<0.000000e+00> : vector<8x256xf32>
    %100 = tpu.matmul %99, %98, %cst_137 {dimension_numbers = #tpu.dot_dimension_numbers<[1], [1], [0], [0], [0, 0, 1, 0], [], []>} : vector<8x36xf32>, vector<256x36xf32>, vector<8x256xf32> -> vector<8x256xf32>
    %c0_138 = arith.constant 0 : index
    %c0_139 = arith.constant 0 : index
    %101 = vector.load %arg4[%c0_138, %c0_139] : memref<8x1xf32, #tpu.memory_space<vmem>>, vector<8x1xf32>
    %102 = vector.broadcast %101 : vector<8x1xf32> to vector<8x256xf32>
    %103 = arith.addf %100, %102 : vector<8x256xf32>
    %c0_140 = arith.constant 0 : index
    %c0_141 = arith.constant 0 : index
    %c0_142 = arith.constant 0 : index
    %104 = vector.load %arg5[%c0_140, %c0_141, %c0_142] : memref<1x8x256xf32, #tpu.memory_space<vmem>>, vector<1x8x256xf32>
    %105 = vector.shape_cast %104 : vector<1x8x256xf32> to vector<8x256xf32>
    %106 = vector.shape_cast %103 : vector<8x256xf32> to vector<1x8x256xf32>
    tpu.vector_store %arg5[%c0_140, %c0_141, %c0_142], %106 {strides = array<i32>} : memref<1x8x256xf32, #tpu.memory_space<vmem>>, vector<1x8x256xf32>,
    return
  }
  func.func @transform_0(%arg0: i32) -> (i32, i32, i32, i32) {
    %c0_i32 = arith.constant 0 : i32
    %c0_i32_0 = arith.constant 0 : i32
    %c0_i32_1 = arith.constant 0 : i32
    %c0_i32_2 = arith.constant 0 : i32
    return %arg0, %c0_i32, %c0_i32_0, %c0_i32_1 : i32, i32, i32, i32
  }
  func.func @transform_1(%arg0: i32) -> (i32, i32) {
    %c0_i32 = arith.constant 0 : i32
    %c0_i32_0 = arith.constant 0 : i32
    %c0_i32_1 = arith.constant 0 : i32
    return %c0_i32, %c0_i32_0 : i32, i32
  }
  func.func @transform_2(%arg0: i32) -> (i32, i32) {
    %c0_i32 = arith.constant 0 : i32
    %c0_i32_0 = arith.constant 0 : i32
    %c0_i32_1 = arith.constant 0 : i32
    return %c0_i32, %c0_i32_0 : i32, i32
  }
  func.func @transform_3(%arg0: i32) -> (i32, i32) {
    %c0_i32 = arith.constant 0 : i32
    %c0_i32_0 = arith.constant 0 : i32
    %c0_i32_1 = arith.constant 0 : i32
    return %c0_i32, %c0_i32_0 : i32, i32
  }
  func.func @transform_4(%arg0: i32) -> (i32, i32, i32) {
    %c0_i32 = arith.constant 0 : i32
    %c0_i32_0 = arith.constant 0 : i32
    %c0_i32_1 = arith.constant 0 : i32
    return %arg0, %c0_i32, %c0_i32_0 : i32, i32, i32
  }
}

</mosaic_0001>

<bundles_post_ra>
// kernel: conv_block2.1
= control target key start
LH: loop header
LB: loop body
LE: loop exit
PB: predicated region body
PF: predicated region fallthrough
CT: control target
= control target key end

     0   :  { %s4885_s15 = smov 0   ;;  %s7100_s0 = inlined_call_operand.vmem [shape: f32[2,16,16,4], index: 0, kind: input, shape index: {}]   ;;  %s7101_s1 = inlined_call_operand.vmem [shape: f32[36,4], index: 1, kind: input, shape index: {}]   ;;  %s7102_s2 = inlined_call_operand.vmem [shape: f32[8,36], index: 2, kind: input, shape index: {}]   ;;  %s7103_s3 = inlined_call_operand.vmem [shape: f32[8,1], index: 3, kind: input, shape index: {}]   ;;  %s7104_s4 = inlined_call_operand.vmem [shape: f32[2,8,256], index: 4, kind: output, shape index: {}]  }
   0x1 LB: > { %s4559_s16 = sadd.s32 4294967295, %s4849_s15   ;;  %p4563_p0 = scmp.ge.s32.totalorder %s4849_s15, 1  ;;  %s4849_s15 = sphi %s4885_s15, %s14_s15  }
   0x2   : > { %p162_p1 = scmp.lt.s32.totalorder %s4849_s15, 3 }
   0x4   : > { %p163_p2 = pnand %p4563_p0, %p162_p1 }
   0x6   : > { %166 = sbr.rel (%p163_p2) target bundleno = 1870 (0x74e), region = 36 }
   0xd   : > { %p188_p3 = scmp.lt.s32.totalorder %s4559_s16, 1  ;;  %vm231_vm0 = vcmask 31744   ;;  %s4851_s21 = smov 4   ;;  %vm287_vm1 = vcmask 24576   ;;  %vm566_vm2 = vcmask 64544   ;;  %vm759_vm3 = vcmask 97344  }
   0xe   : > { %s4852_s22 = smov 8   ;;  %s4853_s23 = smov 12   ;;  %vm2085_vm4 = vcmask 1043456   ;;  %vm952_vm5 = vcmask 130144   ;;  %vm1145_vm6 = vcmask 162944   ;;  %vm1338_vm7 = vcmask 195744  }
   0xf   : > { %s7114_s16 = smov (!%p188_p3, %s4559_s16), 1  ;;  %s4854_s24 = smov 16   ;;  %vm1532_vm8 = vcmask 228544   ;;  %vm1725_vm9 = vcmask 261344   ;;  %vm1918_vm10 = vcmask 294144   ;;  %vm1988_vm11 = vcmask 293888  }
  0x10   : > { %s4636_s17 = sshll.u32 %s7114_s16, 8  ;;  %s4855_s29 = smov 20   ;;  %vm6791_vm12 = vmpackc.low %vm1988_vm11, %vm1988_vm11 }
  0x11   : > { %s4899_s20 = scalar_lea.vmem %s7100_s0, %s4636_s17  ;;  %s4856_s8 = smov 24  }
  0x12   : > { %v200_v0 = vld [vmem:[%s4899_s20 + $0x10] sm:$0xff]  ;;  %v198_v1 = vld [vmem:[%s4899_s20] sm:$0xff]  ;;  %v201_v2 = vld [vmem:[%s4899_s20 + $0x18] sm:$0xff]  ;;  %s4857_s9 = smov 28   ;;  %s4858_s12 = smov 32  }
  0x13   : > { %264 = vst.msk [vmem:[#allocation2 + $0x1] sm:$0xff] %vm231_vm0, %v200_v0  ;;  %234 = vst.msk [vmem:[#allocation2 + $0x31] sm:$0xff] %vm231_vm0, %v200_v0  ;;  %v199_v3 = vld [vmem:[%s4899_s20 + $0x8] sm:$0xff]  ;;  %v202_v4 = vld [vmem:[%s4899_s20 + $0x20] sm:$0xff]  ;;  %s4637_s19 = sshll.u32 %s7114_s16, 4 }
  0x14   : > { %232 = vst.msk [vmem:[#allocation2 + $0x19] sm:$0xff] %vm231_vm0, %v198_v1  ;;  %265 = vst.msk [vmem:[#allocation2 + $0x9] sm:$0xff] %vm231_vm0, %v201_v2  ;;  %v203_v5 = vld [vmem:[%s4899_s20 + $0x28] sm:$0xff]  ;;  %v204_v6 = vld [vmem:[%s4899_s20 + $0x30] sm:$0xff] }
  0x15   : > { %235 = vst.msk [vmem:[#allocation2 + $0x39] sm:$0xff] %vm231_vm0, %v201_v2  ;;  %233 = vst.msk [vmem:[#allocation2 + $0x21] sm:$0xff] %vm231_vm0, %v199_v3  ;;  %v205_v7 = vld [vmem:[%s4899_s20 + $0x38] sm:$0xff]  ;;  %v206_v8 = vld [vmem:[%s4899_s20 + $0x40] sm:$0xff] }
  0x16   : > { %236 = vst.msk [vmem:[#allocation2 + $0x49] sm:$0xff] %vm231_vm0, %v202_v4  ;;  %237 = vst.msk [vmem:[#allocation2 + $0x51] sm:$0xff] %vm231_vm0, %v203_v5  ;;  %v207_v9 = vld [vmem:[%s4899_s20 + $0x48] sm:$0xff]  ;;  %v208_v10 = vld [vmem:[%s4899_s20 + $0x50] sm:$0xff] }
  0x17   : > { %238 = vst.msk [vmem:[#allocation2 + $0x61] sm:$0xff] %vm231_vm0, %v204_v6  ;;  %239 = vst.msk [vmem:[#allocation2 + $0x69] sm:$0xff] %vm231_vm0, %v205_v7  ;;  %v209_v11 = vld [vmem:[%s4899_s20 + $0x58] sm:$0xff]  ;;  %v210_v12 = vld [vmem:[%s4899_s20 + $0x60] sm:$0xff] }
  0x18   : > { %240 = vst.msk [vmem:[#allocation2 + $0x79] sm:$0xff] %vm231_vm0, %v206_v8  ;;  %241 = vst.msk [vmem:[#allocation2 + $0x81] sm:$0xff] %vm231_vm0, %v207_v9  ;;  %v211_v13 = vld [vmem:[%s4899_s20 + $0x68] sm:$0xff]  ;;  %v212_v14 = vld [vmem:[%s4899_s20 + $0x70] sm:$0xff] }
  0x19   : > { %242 = vst.msk [vmem:[#allocation2 + $0x91] sm:$0xff] %vm231_vm0, %v208_v10  ;;  %243 = vst.msk [vmem:[#allocation2 + $0x99] sm:$0xff] %vm231_vm0, %v209_v11  ;;  %v213_v15 = vld [vmem:[%s4899_s20 + $0x78] sm:$0xff]  ;;  %v214_v16 = vld [vmem:[%s4899_s20 + $0x80] sm:$0xff] }
  0x1a   : > { %244 = vst.msk [vmem:[#allocation2 + $0xa9] sm:$0xff] %vm231_vm0, %v210_v12  ;;  %245 = vst.msk [vmem:[#allocation2 + $0xb1] sm:$0xff] %vm231_vm0, %v211_v13  ;;  %v215_v17 = vld [vmem:[%s4899_s20 + $0x88] sm:$0xff]  ;;  %v216_v18 = vld [vmem:[%s4899_s20 + $0x90] sm:$0xff] }
  0x1b   : > { %246 = vst.msk [vmem:[#allocation2 + $0xc1] sm:$0xff] %vm231_vm0, %v212_v14  ;;  %247 = vst.msk [vmem:[#allocation2 + $0xc9] sm:$0xff] %vm231_vm0, %v213_v15  ;;  %v217_v19 = vld [vmem:[%s4899_s20 + $0x98] sm:$0xff]  ;;  %v218_v20 = vld [vmem:[%s4899_s20 + $0xa0] sm:$0xff] }
  0x1c   : > { %248 = vst.msk [vmem:[#allocation2 + $0xd9] sm:$0xff] %vm231_vm0, %v214_v16  ;;  %249 = vst.msk [vmem:[#allocation2 + $0xe1] sm:$0xff] %vm231_vm0, %v215_v17  ;;  %v219_v21 = vld [vmem:[%s4899_s20 + $0xa8] sm:$0xff]  ;;  %v220_v22 = vld [vmem:[%s4899_s20 + $0xb0] sm:$0xff] }
  0x1d   : > { %250 = vst.msk [vmem:[#allocation2 + $0xf1] sm:$0xff] %vm231_vm0, %v216_v18  ;;  %251 = vst.msk [vmem:[#allocation2 + $0xf9] sm:$0xff] %vm231_vm0, %v217_v19  ;;  %v221_v23 = vld [vmem:[%s4899_s20 + $0xb8] sm:$0xff]  ;;  %v406_v24 = vld [vmem:[#allocation2 + $0x1] sm:$0xff] }
  0x1e   : > { %252 = vst.msk [vmem:[#allocation2 + $0x109] sm:$0xff] %vm231_vm0, %v218_v20  ;;  %v4948_v25 = vld [vmem:[#allocation2 + $0x19] sm:$0xff]  ;;  %253 = vst.msk [vmem:[#allocation2 + $0x111] sm:$0xff] %vm231_vm0, %v219_v21  ;;  %470 = vrot.lane.b32.xlu0 %v406_v24, %s4851_s21  ;;  %v407_v26 = vld [vmem:[#allocation2 + $0x9] sm:$0xff] }
  0x1f   : > { %254 = vst.msk [vmem:[#allocation2 + $0x121] sm:$0xff] %vm231_vm0, %v220_v22  ;;  %255 = vst.msk [vmem:[#allocation2 + $0x129] sm:$0xff] %vm231_vm0, %v221_v23  ;;  %474 = vrot.lane.b32.xlu1 %v4948_v25, %s4851_s21  ;;  %v4956_v27 = vld [vmem:[#allocation2 + $0x21] sm:$0xff]  ;;  %v4961_v28 = vld [vmem:[#allocation2 + $0x31] sm:$0xff] }
  0x20   : > { %v4963_v29 = vld [vmem:[#allocation2 + $0x39] sm:$0xff]  ;;  %v412_v30 = vld [vmem:[#allocation2 + $0x49] sm:$0xff]  ;;  %v413_v32 = vld [vmem:[#allocation2 + $0x51] sm:$0xff] }
  0x21   : > { %v222_v31 = vld [vmem:[%s4899_s20 + $0xc0] sm:$0xff]  ;;  %v223_v33 = vld [vmem:[%s4899_s20 + $0xc8] sm:$0xff]  ;;  %v224_v34 = vld [vmem:[%s4899_s20 + $0xd0] sm:$0xff] }
  0x22   : > { %472 = vrot.lane.b32.xlu0 %v407_v26, %s4851_s21  ;;  %256 = vst.msk [vmem:[#allocation2 + $0x139] sm:$0xff] %vm231_vm0, %v222_v31  ;;  %257 = vst.msk [vmem:[#allocation2 + $0x141] sm:$0xff] %vm231_vm0, %v223_v33  ;;  %v225_v35 = vld [vmem:[%s4899_s20 + $0xd8] sm:$0xff]  ;;  %v226_v36 = vld [vmem:[%s4899_s20 + $0xe0] sm:$0xff] }
  0x23   : > { %476 = vrot.lane.b32.xlu1 %v4956_v27, %s4851_s21  ;;  %258 = vst.msk [vmem:[#allocation2 + $0x151] sm:$0xff] %vm231_vm0, %v224_v34  ;;  %v227_v37 = vld [vmem:[%s4899_s20 + $0xe8] sm:$0xff]  ;;  %259 = vst.msk [vmem:[#allocation2 + $0x159] sm:$0xff] %vm231_vm0, %v225_v35  ;;  %v307_v39 = vld [vmem:[#allocation2 + $0x27] sm:$0x1] }
  0x24   : > { %260 = vst.msk [vmem:[#allocation2 + $0x169] sm:$0xff] %vm231_vm0, %v226_v36  ;;  %267 = vst.msk [vmem:[#allocation2 + $0x199] sm:$0xff] %vm231_vm0, %v226_v36  ;;  %v306_v38 = vld [vmem:[#allocation2 + $0xf] sm:$0x1]  ;;  %v308_v40 = vld [vmem:[#allocation2 + $0x3f] sm:$0x1] }
  0x25   : > { %261 = vst.msk [vmem:[#allocation2 + $0x171] sm:$0xff] %vm231_vm0, %v227_v37  ;;  %268 = vst.msk [vmem:[#allocation2 + $0x1a1] sm:$0xff] %vm231_vm0, %v227_v37  ;;  %v309_v41 = vld [vmem:[#allocation2 + $0x57] sm:$0x1]  ;;  %v310_v42 = vld [vmem:[#allocation2 + $0x6f] sm:$0x1] }
  0x26   : > { %478 = vrot.lane.b32.xlu0 %v4961_v28, %s4851_s21  ;;  %324 = vst.msk [vmem:[#allocation2 + $0x11] sm:$0x1] %vm287_vm1, %v306_v38  ;;  %325 = vst.msk [vmem:[#allocation2 + $0x29] sm:$0x1] %vm287_vm1, %v307_v39  ;;  %v414_v43 = vld [vmem:[#allocation2 + $0x61] sm:$0xff]  ;;  %v415_v44 = vld [vmem:[#allocation2 + $0x69] sm:$0xff] }
  0x27   : > { %480 = vrot.lane.b32.xlu1 %v4963_v29, %s4851_s21  ;;  %326 = vst.msk [vmem:[#allocation2 + $0x41] sm:$0x1] %vm287_vm1, %v308_v40  ;;  %327 = vst.msk [vmem:[#allocation2 + $0x59] sm:$0x1] %vm287_vm1, %v309_v41  ;;  %v311_v45 = vld [vmem:[#allocation2 + $0x87] sm:$0x1] }
  0x28   : > { %328 = vst.msk [vmem:[#allocation2 + $0x71] sm:$0x1] %vm287_vm1, %v310_v42  ;;  %329 = vst.msk [vmem:[#allocation2 + $0x89] sm:$0x1] %vm287_vm1, %v311_v45  ;;  %v312_v46 = vld [vmem:[#allocation2 + $0x9f] sm:$0x1] }
  0x29   : > { %v313_v47 = vld [vmem:[#allocation2 + $0xb7] sm:$0x1]  ;;  %330 = vst.msk [vmem:[#allocation2 + $0xa1] sm:$0x1] %vm287_vm1, %v312_v46  ;;  %v314_v48 = vld [vmem:[#allocation2 + $0xcf] sm:$0x1] }
  0x2a   : > { %482 = vrot.lane.b32.xlu0 %v412_v30, %s4851_s21  ;;  %331 = vst.msk [vmem:[#allocation2 + $0xb9] sm:$0x1] %vm287_vm1, %v313_v47  ;;  %332 = vst.msk [vmem:[#allocation2 + $0xd1] sm:$0x1] %vm287_vm1, %v314_v48  ;;  %v416_v49 = vld [vmem:[#allocation2 + $0x79] sm:$0xff]  ;;  %v417_v50 = vld [vmem:[#allocation2 + $0x81] sm:$0xff] }
  0x2b   : > { %484 = vrot.lane.b32.xlu1 %v413_v32, %s4851_s21  ;;  %v315_v51 = vld [vmem:[#allocation2 + $0xe7] sm:$0x1]  ;;  %v316_v52 = vld [vmem:[#allocation2 + $0xff] sm:$0x1]  ;;  %v418_v53 = vld [vmem:[#allocation2 + $0x91] sm:$0xff] }
  0x2c   : > { %333 = vst.msk [vmem:[#allocation2 + $0xe9] sm:$0x1] %vm287_vm1, %v315_v51  ;;  %334 = vst.msk [vmem:[#allocation2 + $0x101] sm:$0x1] %vm287_vm1, %v316_v52  ;;  %v419_v54 = vld [vmem:[#allocation2 + $0x99] sm:$0xff]  ;;  %v420_v59 = vld [vmem:[#allocation2 + $0xa9] sm:$0xff] }
  0x2d   : > { %v317_v55 = vld [vmem:[#allocation2 + $0x117] sm:$0x1]  ;;  %v318_v56 = vld [vmem:[#allocation2 + $0x12f] sm:$0x1]  ;;  %v269_v57 = vld [vmem:[#allocation2 + $0x2] sm:$0x1] }
  0x2e   : > { %486 = vrot.lane.b32.xlu0 %v414_v43, %s4851_s21  ;;  %335 = vst.msk [vmem:[#allocation2 + $0x119] sm:$0x1] %vm287_vm1, %v317_v55  ;;  %336 = vst.msk [vmem:[#allocation2 + $0x131] sm:$0x1] %vm287_vm1, %v318_v56  ;;  %v270_v58 = vld [vmem:[#allocation2 + $0x1a] sm:$0x1] }
  0x2f   : > { %488 = vrot.lane.b32.xlu1 %v415_v44, %s4851_s21  ;;  %288 = vst.msk [vmem:[#allocation2] sm:$0x1] %vm287_vm1, %v269_v57  ;;  %289 = vst.msk [vmem:[#allocation2 + $0x18] sm:$0x1] %vm287_vm1, %v270_v58  ;;  %v319_v60 = vld [vmem:[#allocation2 + $0x147] sm:$0x1] }
  0x30   : > { %v343_v61 = vld [vmem:[#allocation2 + $0x8] sm:$0xff]  ;;  %v421_v62 = vld [vmem:[#allocation2 + $0xb1] sm:$0xff]  ;;  %337 = vst.msk [vmem:[#allocation2 + $0x149] sm:$0x1] %vm287_vm1, %v319_v60  ;;  %v5008_v63 = vld [vmem:[#allocation2 + $0x20] sm:$0xff] }
  0x31   : > { %375 = vst.msk [vmem:[#allocation3 + $0x8] sm:$0xff] %vm231_vm0, %v343_v61  ;;  %v320_v0 = vld [vmem:[#allocation2 + $0x15f] sm:$0x1]  ;;  %377 = vst.msk [vmem:[#allocation3 + $0x18] sm:$0xff] %vm231_vm0, %v5008_v63  ;;  %v271_v1 = vld [vmem:[#allocation2 + $0x32] sm:$0x1] }
  0x32   : > { %490 = vrot.lane.b32.xlu0 %v416_v49, %s4851_s21  ;;  %338 = vst.msk [vmem:[#allocation2 + $0x161] sm:$0x1] %vm287_vm1, %v320_v0  ;;  %v5013_v2 = vld [vmem:[#allocation2 + $0x38] sm:$0xff]  ;;  %v422_v3 = vld [vmem:[#allocation2 + $0xc1] sm:$0xff]  ;;  %290 = vst.msk [vmem:[#allocation2 + $0x30] sm:$0x1] %vm287_vm1, %v271_v1 }
  0x33   : > { %492 = vrot.lane.b32.xlu1 %v417_v50, %s4851_s21  ;;  %379 = vst.msk [vmem:[#allocation3 + $0x28] sm:$0xff] %vm231_vm0, %v5013_v2  ;;  %v321_v4 = vld [vmem:[#allocation2 + $0x177] sm:$0x1]  ;;  %v272_v5 = vld [vmem:[#allocation2 + $0x4a] sm:$0x1]  ;;  %v5032_v11 = vld [vmem:[#allocation2 + $0x80] sm:$0xff] }
  0x34   : > { %339 = vst.msk [vmem:[#allocation2 + $0x179] sm:$0x1] %vm287_vm1, %v321_v4  ;;  %v5021_v6 = vld [vmem:[#allocation2 + $0x50] sm:$0xff]  ;;  %v273_v7 = vld [vmem:[#allocation2 + $0x62] sm:$0x1]  ;;  %v5027_v9 = vld [vmem:[#allocation2 + $0x68] sm:$0xff] }
  0x35   : > { %v423_v8 = vld [vmem:[#allocation2 + $0xc9] sm:$0xff]  ;;  %291 = vst.msk [vmem:[#allocation2 + $0x48] sm:$0x1] %vm287_vm1, %v272_v5  ;;  %292 = vst.msk [vmem:[#allocation2 + $0x60] sm:$0x1] %vm287_vm1, %v273_v7  ;;  %v5039_v15 = vld [vmem:[#allocation2 + $0x98] sm:$0xff] }
  0x36   : > { %494 = vrot.lane.b32.xlu0 %v418_v53, %s4851_s21  ;;  %381 = vst.msk [vmem:[#allocation3 + $0x38] sm:$0xff] %vm231_vm0, %v5021_v6  ;;  %v274_v10 = vld [vmem:[#allocation2 + $0x7a] sm:$0x1]  ;;  %383 = vst.msk [vmem:[#allocation3 + $0x48] sm:$0xff] %vm231_vm0, %v5027_v9  ;;  %v275_v12 = vld [vmem:[#allocation2 + $0x92] sm:$0x1] }
  0x37   : > { %496 = vrot.lane.b32.xlu1 %v419_v54, %s4851_s21  ;;  %293 = vst.msk [vmem:[#allocation2 + $0x78] sm:$0x1] %vm287_vm1, %v274_v10  ;;  %v342_v13 = vld [vmem:[#allocation2] sm:$0xff]  ;;  %v5034_v14 = vld [vmem:[#allocation2 + $0x18] sm:$0xff]  ;;  %294 = vst.msk [vmem:[#allocation2 + $0x90] sm:$0x1] %vm287_vm1, %v275_v12 }
  0x38   : > { %385 = vst.msk [vmem:[#allocation3 + $0x58] sm:$0xff] %vm231_vm0, %v5032_v11  ;;  %v424_v16 = vld [vmem:[#allocation2 + $0xd9] sm:$0xff]  ;;  %374 = vst.msk [vmem:[#allocation3] sm:$0xff] %vm231_vm0, %v342_v13  ;;  %v276_v17 = vld [vmem:[#allocation2 + $0xaa] sm:$0x1] }
  0x39   : > { %376 = vst.msk [vmem:[#allocation3 + $0x10] sm:$0xff] %vm231_vm0, %v5034_v14  ;;  %387 = vst.msk [vmem:[#allocation3 + $0x68] sm:$0xff] %vm231_vm0, %v5039_v15  ;;  %v5048_v18 = vld [vmem:[#allocation2 + $0xb0] sm:$0xff]  ;;  %v425_v19 = vld [vmem:[#allocation2 + $0xe1] sm:$0xff] }
  0x3a   : > { %498 = vrot.lane.b32.xlu0 %v420_v59, %s4851_s21  ;;  %295 = vst.msk [vmem:[#allocation2 + $0xa8] sm:$0x1] %vm287_vm1, %v276_v17  ;;  %v277_v20 = vld [vmem:[#allocation2 + $0xc2] sm:$0x1]  ;;  %v5053_v21 = vld [vmem:[#allocation2 + $0xc8] sm:$0xff]  ;;  %v5055_v22 = vld [vmem:[#allocation2 + $0x30] sm:$0xff] }
  0x3b   : > { %500 = vrot.lane.b32.xlu1 %v421_v62, %s4851_s21  ;;  %389 = vst.msk [vmem:[#allocation3 + $0x78] sm:$0xff] %vm231_vm0, %v5048_v18  ;;  %391 = vst.msk [vmem:[#allocation3 + $0x88] sm:$0xff] %vm231_vm0, %v5053_v21  ;;  %v278_v23 = vld [vmem:[#allocation2 + $0xda] sm:$0x1]  ;;  %v5060_v24 = vld [vmem:[#allocation2 + $0xe0] sm:$0xff] }
  0x3c   : > { %296 = vst.msk [vmem:[#allocation2 + $0xc0] sm:$0x1] %vm287_vm1, %v277_v20  ;;  %v426_v26 = vld [vmem:[#allocation2 + $0xf1] sm:$0xff]  ;;  %v427_v30 = vld [vmem:[#allocation2 + $0xf9] sm:$0xff]  ;;  %297 = vst.msk [vmem:[#allocation2 + $0xd8] sm:$0x1] %vm287_vm1, %v278_v23 }
  0x3d   : > { %378 = vst.msk [vmem:[#allocation3 + $0x20] sm:$0xff] %vm231_vm0, %v5055_v22  ;;  %393 = vst.msk [vmem:[#allocation3 + $0x98] sm:$0xff] %vm231_vm0, %v5060_v24  ;;  %v279_v31 = vld [vmem:[#allocation2 + $0xf2] sm:$0x1]  ;;  %v5067_v32 = vld [vmem:[#allocation2 + $0xf8] sm:$0xff] }
  0x3e   : > { %502 = vrot.lane.b32.xlu0 %v422_v3, %s4851_s21  ;;  %v5071_v33 = vld [vmem:[#allocation2 + $0x48] sm:$0xff]  ;;  %v5073_v34 = vld [vmem:[#allocation2 + $0x60] sm:$0xff]  ;;  %298 = vst.msk [vmem:[#allocation2 + $0xf0] sm:$0x1] %vm287_vm1, %v279_v31  ;;  %v5082_v36 = vld [vmem:[#allocation2 + $0x78] sm:$0xff] }
  0x3f   : > { %504 = vrot.lane.b32.xlu1 %v423_v8, %s4851_s21  ;;  %395 = vst.msk [vmem:[#allocation3 + $0xa8] sm:$0xff] %vm231_vm0, %v5067_v32  ;;  %v280_v35 = vld [vmem:[#allocation2 + $0x10a] sm:$0x1]  ;;  %380 = vst.msk [vmem:[#allocation3 + $0x30] sm:$0xff] %vm231_vm0, %v5071_v33  ;;  %v5085_v37 = vld [vmem:[#allocation2 + $0x110] sm:$0xff] }
  0x40   : > { %382 = vst.msk [vmem:[#allocation3 + $0x40] sm:$0xff] %vm231_vm0, %v5073_v34  ;;  %v281_v38 = vld [vmem:[#allocation2 + $0x122] sm:$0x1]  ;;  %384 = vst.msk [vmem:[#allocation3 + $0x50] sm:$0xff] %vm231_vm0, %v5082_v36  ;;  %v5089_v39 = vld [vmem:[#allocation2 + $0x90] sm:$0xff] }
  0x41   : > { %299 = vst.msk [vmem:[#allocation2 + $0x108] sm:$0x1] %vm287_vm1, %v280_v35  ;;  %300 = vst.msk [vmem:[#allocation2 + $0x120] sm:$0x1] %vm287_vm1, %v281_v38  ;;  %v5094_v40 = vld [vmem:[#allocation2 + $0x128] sm:$0xff]  ;;  %v5101_v42 = vld [vmem:[#allocation2 + $0x140] sm:$0xff] }
  0x42   : > { %506 = vrot.lane.b32.xlu0 %v424_v16, %s4851_s21  ;;  %397 = vst.msk [vmem:[#allocation3 + $0xb8] sm:$0xff] %vm231_vm0, %v5085_v37  ;;  %v282_v41 = vld [vmem:[#allocation2 + $0x13a] sm:$0x1]  ;;  %386 = vst.msk [vmem:[#allocation3 + $0x60] sm:$0xff] %vm231_vm0, %v5089_v39  ;;  %v283_v43 = vld [vmem:[#allocation2 + $0x152] sm:$0x1] }
  0x43   : > { %508 = vrot.lane.b32.xlu1 %v425_v19, %s4851_s21  ;;  %399 = vst.msk [vmem:[#allocation3 + $0xc8] sm:$0xff] %vm231_vm0, %v5094_v40  ;;  %v284_v44 = vld [vmem:[#allocation2 + $0x16a] sm:$0x1]  ;;  %401 = vst.msk [vmem:[#allocation3 + $0xd8] sm:$0xff] %vm231_vm0, %v5101_v42  ;;  %v429_v47 = vld [vmem:[#allocation2 + $0x111] sm:$0xff] }
  0x44   : > { %301 = vst.msk [vmem:[#allocation2 + $0x138] sm:$0x1] %vm287_vm1, %v282_v41  ;;  %v5105_v45 = vld [vmem:[#allocation2 + $0xa8] sm:$0xff]  ;;  %302 = vst.msk [vmem:[#allocation2 + $0x150] sm:$0x1] %vm287_vm1, %v283_v43  ;;  %v5113_v48 = vld [vmem:[#allocation2 + $0xc0] sm:$0xff] }
  0x45   : > { %303 = vst.msk [vmem:[#allocation2 + $0x168] sm:$0x1] %vm287_vm1, %v284_v44  ;;  %v428_v46 = vld [vmem:[#allocation2 + $0x109] sm:$0xff]  ;;  %v5117_v49 = vld [vmem:[#allocation2 + $0xd8] sm:$0xff]  ;;  %v430_v54 = vld [vmem:[#allocation2 + $0x121] sm:$0xff] }
  0x46   : > { %510 = vrot.lane.b32.xlu0 %v426_v26, %s4851_s21  ;;  %388 = vst.msk [vmem:[#allocation3 + $0x70] sm:$0xff] %vm231_vm0, %v5105_v45  ;;  %390 = vst.msk [vmem:[#allocation3 + $0x80] sm:$0xff] %vm231_vm0, %v5113_v48  ;;  %v5119_v50 = vld [vmem:[#allocation2 + $0x158] sm:$0xff]  ;;  %v5123_v51 = vld [vmem:[#allocation2 + $0xf0] sm:$0xff] }
  0x47   : > { %512 = vrot.lane.b32.xlu1 %v427_v30, %s4851_s21  ;;  %392 = vst.msk [vmem:[#allocation3 + $0x90] sm:$0xff] %vm231_vm0, %v5117_v49  ;;  %403 = vst.msk [vmem:[#allocation3 + $0xe8] sm:$0xff] %vm231_vm0, %v5119_v50  ;;  %v228_v52 = vld [vmem:[%s4899_s20 + $0xf0] sm:$0xff]  ;;  %v432_v61 = vld [vmem:[#allocation2 + $0x139] sm:$0xff] }
  0x48   : > { %394 = vst.msk [vmem:[#allocation3 + $0xa0] sm:$0xff] %vm231_vm0, %v5123_v51  ;;  %v5132_v53 = vld [vmem:[#allocation2 + $0x108] sm:$0xff]  ;;  %262 = vst.msk [vmem:[#allocation2 + $0x181] sm:$0xff] %vm231_vm0, %v228_v52  ;;  %v5137_v56 = vld [vmem:[#allocation2 + $0x120] sm:$0xff] }
  0x49   : > { %v431_v55 = vld [vmem:[#allocation2 + $0x129] sm:$0xff]  ;;  %396 = vst.msk [vmem:[#allocation3 + $0xb0] sm:$0xff] %vm231_vm0, %v5132_v53  ;;  %398 = vst.msk [vmem:[#allocation3 + $0xc0] sm:$0xff] %vm231_vm0, %v5137_v56  ;;  %v433_v62 = vld [vmem:[#allocation2 + $0x141] sm:$0xff] }
  0x4a   : > { %514 = vrot.lane.b32.xlu0 %v428_v46, %s4851_s21  ;;  %v5143_v58 = vld [vmem:[#allocation2 + $0x170] sm:$0xff]  ;;  %v229_v1 = vld [vmem:[%s4899_s20 + $0xf8] sm:$0xff]  ;;  %v599_v8 = vld [vmem:[#allocation2 + $0x2] sm:$0xff] }
  0x4b   : > { %516 = vrot.lane.b32.xlu1 %v429_v47, %s4851_s21  ;;  %v5141_v57 = vld [vmem:[#allocation2 + $0x138] sm:$0xff]  ;;  %v5147_v59 = vld [vmem:[#allocation2 + $0x150] sm:$0xff]  ;;  %405 = vst.msk [vmem:[#allocation3 + $0xf8] sm:$0xff] %vm231_vm0, %v5143_v58  ;;  %263 = vst.msk [vmem:[#allocation2 + $0x189] sm:$0xff] %vm231_vm0, %v229_v1 }
  0x4c   : > { %400 = vst.msk [vmem:[#allocation3 + $0xd0] sm:$0xff] %vm231_vm0, %v5141_v57  ;;  %v5149_v60 = vld [vmem:[#allocation2 + $0x168] sm:$0xff]  ;;  %402 = vst.msk [vmem:[#allocation3 + $0xe0] sm:$0xff] %vm231_vm0, %v5147_v59  ;;  %v434_v3 = vld [vmem:[#allocation2 + $0x151] sm:$0xff] }
  0x4d   : > { %404 = vst.msk [vmem:[#allocation3 + $0xf0] sm:$0xff] %vm231_vm0, %v5149_v60  ;;  %v435_v4 = vld [vmem:[#allocation2 + $0x159] sm:$0xff]  ;;  %v436_v5 = vld [vmem:[#allocation2 + $0x169] sm:$0xff]  ;;  %v437_v7 = vld [vmem:[#allocation2 + $0x171] sm:$0xff] }
  0x4e   : > { %518 = vrot.lane.b32.xlu0 %v430_v54, %s4851_s21  ;;  %v600_v10 = vld [vmem:[#allocation2 + $0xa] sm:$0xff]  ;;  %v5170_v12 = vld [vmem:[#allocation2 + $0x1a] sm:$0xff]  ;;  %v5172_v13 = vld [vmem:[#allocation2 + $0x22] sm:$0xff] }
  0x4f   : > { %520 = vrot.lane.b32.xlu1 %v431_v55, %s4851_s21  ;;  %v285_v0 = vld [vmem:[#allocation2 + $0x182] sm:$0x1]  ;;  %v5178_v16 = vld [vmem:[#allocation2 + $0x32] sm:$0xff]  ;;  %v5180_v17 = vld [vmem:[#allocation2 + $0x3a] sm:$0xff] }
  0x50   : > { %304 = vst.msk [vmem:[#allocation2 + $0x180] sm:$0x1] %vm287_vm1, %v285_v0  ;;  %v5186_v19 = vld [vmem:[#allocation2 + $0x4a] sm:$0xff]  ;;  %v5188_v20 = vld [vmem:[#allocation2 + $0x52] sm:$0xff]  ;;  %v5194_v23 = vld [vmem:[#allocation2 + $0x62] sm:$0xff] }
  0x51   : > { %v5196_v26 = vld [vmem:[#allocation2 + $0x6a] sm:$0xff]  ;;  %v5202_v30 = vld [vmem:[#allocation2 + $0x7a] sm:$0xff]  ;;  %v5204_v31 = vld [vmem:[#allocation2 + $0x82] sm:$0xff] }
  0x52   : > { %522 = vrot.lane.b32.xlu0 %v432_v61, %s4851_s21  ;;  %v5210_v35 = vld [vmem:[#allocation2 + $0x92] sm:$0xff]  ;;  %v612_v38 = vld [vmem:[#allocation2 + $0x9a] sm:$0xff]  ;;  %v613_v41 = vld [vmem:[#allocation2 + $0xaa] sm:$0xff] }
  0x53   : > { %524 = vrot.lane.b32.xlu1 %v433_v62, %s4851_s21  ;;  %v614_v43 = vld [vmem:[#allocation2 + $0xb2] sm:$0xff]  ;;  %v615_v44 = vld [vmem:[#allocation2 + $0xc2] sm:$0xff]  ;;  %v616_v46 = vld [vmem:[#allocation2 + $0xca] sm:$0xff] }
  0x54   : > { %v617_v47 = vld [vmem:[#allocation2 + $0xda] sm:$0xff]  ;;  %v618_v52 = vld [vmem:[#allocation2 + $0xe2] sm:$0xff]  ;;  %v619_v54 = vld [vmem:[#allocation2 + $0xf2] sm:$0xff] }
  0x55   : > { %v620_v55 = vld [vmem:[#allocation2 + $0xfa] sm:$0xff]  ;;  %v621_v61 = vld [vmem:[#allocation2 + $0x10a] sm:$0xff]  ;;  %v622_v62 = vld [vmem:[#allocation2 + $0x112] sm:$0xff] }
  0x56   : > { %526 = vrot.lane.b32.xlu0 %v434_v3, %s4851_s21  ;;  %v623_v0 = vld [vmem:[#allocation2 + $0x122] sm:$0xff]  ;;  %v624_v1 = vld [vmem:[#allocation2 + $0x12a] sm:$0xff]  ;;  %v625_v3 = vld [vmem:[#allocation2 + $0x13a] sm:$0xff] }
  0x57   : > { %528 = vrot.lane.b32.xlu1 %v435_v4, %s4851_s21  ;;  %v626_v4 = vld [vmem:[#allocation2 + $0x142] sm:$0xff] }
  0x5a   : > { %530 = vrot.lane.b32.xlu0 %v436_v5, %s4851_s21 }
  0x5b   : > { %532 = vrot.lane.b32.xlu1 %v437_v7, %s4851_s21 }
  0x5e   : > { %663 = vrot.lane.b32.xlu0 %v599_v8, %s4852_s22  ;;  %v627_v8 = vld [vmem:[#allocation2 + $0x152] sm:$0xff] }
  0x5f   : > { %665 = vrot.lane.b32.xlu1 %v600_v10, %s4852_s22  ;;  %v628_v10 = vld [vmem:[#allocation2 + $0x15a] sm:$0xff] }
  0x62   : > { %667 = vrot.lane.b32.xlu0 %v5170_v12, %s4852_s22 }
  0x63   : > { %669 = vrot.lane.b32.xlu1 %v5172_v13, %s4852_s22 }
  0x66   : > { %671 = vrot.lane.b32.xlu0 %v5178_v16, %s4852_s22 }
  0x67   : > { %673 = vrot.lane.b32.xlu1 %v5180_v17, %s4852_s22 }
  0x6a   : > { %675 = vrot.lane.b32.xlu0 %v5186_v19, %s4852_s22 }
  0x6b   : > { %677 = vrot.lane.b32.xlu1 %v5188_v20, %s4852_s22 }
  0x6e   : > { %679 = vrot.lane.b32.xlu0 %v5194_v23, %s4852_s22 }
  0x6f   : > { %681 = vrot.lane.b32.xlu1 %v5196_v26, %s4852_s22 }
  0x72   : > { %683 = vrot.lane.b32.xlu0 %v5202_v30, %s4852_s22 }
  0x73   : > { %685 = vrot.lane.b32.xlu1 %v5204_v31, %s4852_s22 }
  0x76   : > { %687 = vrot.lane.b32.xlu0 %v5210_v35, %s4852_s22 }
  0x77   : > { %689 = vrot.lane.b32.xlu1 %v612_v38, %s4852_s22 }
  0x7a   : > { %691 = vrot.lane.b32.xlu0 %v613_v41, %s4852_s22 }
  0x7b   : > { %693 = vrot.lane.b32.xlu1 %v614_v43, %s4852_s22  ;;  %v629_v43 = vld [vmem:[#allocation2 + $0x16a] sm:$0xff] }
  0x7e   : > { %695 = vrot.lane.b32.xlu0 %v615_v44, %s4852_s22  ;;  %v630_v44 = vld [vmem:[#allocation2 + $0x172] sm:$0xff] }
  0x7f   : > { %697 = vrot.lane.b32.xlu1 %v616_v46, %s4852_s22 }
  0x82   : > { %699 = vrot.lane.b32.xlu0 %v617_v47, %s4852_s22 }
  0x83   : > { %701 = vrot.lane.b32.xlu1 %v618_v52, %s4852_s22 }
  0x86   : > { %703 = vrot.lane.b32.xlu0 %v619_v54, %s4852_s22 }
  0x87   : > { %705 = vrot.lane.b32.xlu1 %v620_v55, %s4852_s22 }
  0x8a   : > { %707 = vrot.lane.b32.xlu0 %v621_v61, %s4852_s22 }
  0x8b   : > { %709 = vrot.lane.b32.xlu1 %v622_v62, %s4852_s22 }
  0x8e   : > { %711 = vrot.lane.b32.xlu0 %v623_v0, %s4852_s22 }
  0x8f   : > { %713 = vrot.lane.b32.xlu1 %v624_v1, %s4852_s22 }
  0x90   : > { %v471_v5 = vpop.permute.xlu0 %470 }
  0x91   : > { %v475_v7 = vpop.permute.xlu1 %474  ;;  %567 = vst.msk [vmem:[#allocation3] sm:$0xff] %vm566_vm2, %v471_v5 }
  0x92   : > { %569 = vst.msk [vmem:[#allocation3 + $0x10] sm:$0xff] %vm566_vm2, %v475_v7  ;;  %715 = vrot.lane.b32.xlu0 %v625_v3, %s4852_s22 }
  0x93   : > { %717 = vrot.lane.b32.xlu1 %v626_v4, %s4852_s22 }
  0x94   : > { %v473_v38 = vpop.permute.xlu0 %472 }
  0x95   : > { %v477_v41 = vpop.permute.xlu1 %476  ;;  %568 = vst.msk [vmem:[#allocation3 + $0x8] sm:$0xff] %vm566_vm2, %v473_v38 }
  0x96   : > { %570 = vst.msk [vmem:[#allocation3 + $0x18] sm:$0xff] %vm566_vm2, %v477_v41  ;;  %719 = vrot.lane.b32.xlu0 %v627_v8, %s4852_s22 }
  0x97   : > { %721 = vrot.lane.b32.xlu1 %v628_v10, %s4852_s22 }
  0x98   : > { %v479_v46 = vpop.permute.xlu0 %478 }
  0x99   : > { %v481_v47 = vpop.permute.xlu1 %480  ;;  %571 = vst.msk [vmem:[#allocation3 + $0x20] sm:$0xff] %vm566_vm2, %v479_v46 }
  0x9a   : > { %572 = vst.msk [vmem:[#allocation3 + $0x28] sm:$0xff] %vm566_vm2, %v481_v47  ;;  %723 = vrot.lane.b32.xlu0 %v629_v43, %s4852_s22 }
  0x9b   : > { %725 = vrot.lane.b32.xlu1 %v630_v44, %s4852_s22 }
  0x9c   : > { %v483_v52 = vpop.permute.xlu0 %482 }
  0x9d   : > { %v485_v54 = vpop.permute.xlu1 %484  ;;  %573 = vst.msk [vmem:[#allocation3 + $0x30] sm:$0xff] %vm566_vm2, %v483_v52 }
  0x9e   : > { %574 = vst.msk [vmem:[#allocation3 + $0x38] sm:$0xff] %vm566_vm2, %v485_v54  ;;  %856 = vrot.lane.b32.xlu0 %v5034_v14, %s4853_s23 }
  0x9f   : > { %858 = vrot.lane.b32.xlu1 %v5008_v63, %s4853_s23 }
  0xa0   : > { %v487_v55 = vpop.permute.xlu0 %486 }
  0xa1   : > { %v489_v61 = vpop.permute.xlu1 %488  ;;  %575 = vst.msk [vmem:[#allocation3 + $0x40] sm:$0xff] %vm566_vm2, %v487_v55 }
  0xa2   : > { %576 = vst.msk [vmem:[#allocation3 + $0x48] sm:$0xff] %vm566_vm2, %v489_v61  ;;  %860 = vrot.lane.b32.xlu0 %v5055_v22, %s4853_s23 }
  0xa3   : > { %862 = vrot.lane.b32.xlu1 %v5013_v2, %s4853_s23 }
  0xa4   : > { %v491_v62 = vpop.permute.xlu0 %490 }
  0xa5   : > { %v493_v0 = vpop.permute.xlu1 %492  ;;  %577 = vst.msk [vmem:[#allocation3 + $0x50] sm:$0xff] %vm566_vm2, %v491_v62 }
  0xa6   : > { %578 = vst.msk [vmem:[#allocation3 + $0x58] sm:$0xff] %vm566_vm2, %v493_v0  ;;  %864 = vrot.lane.b32.xlu0 %v5071_v33, %s4853_s23 }
  0xa7   : > { %866 = vrot.lane.b32.xlu1 %v5021_v6, %s4853_s23 }
  0xa8   : > { %v495_v63 = vpop.permute.xlu0 %494 }
  0xa9   : > { %v497_v14 = vpop.permute.xlu1 %496  ;;  %579 = vst.msk [vmem:[#allocation3 + $0x60] sm:$0xff] %vm566_vm2, %v495_v63 }
  0xaa   : > { %580 = vst.msk [vmem:[#allocation3 + $0x68] sm:$0xff] %vm566_vm2, %v497_v14  ;;  %868 = vrot.lane.b32.xlu0 %v5073_v34, %s4853_s23 }
  0xab   : > { %870 = vrot.lane.b32.xlu1 %v5027_v9, %s4853_s23 }
  0xac   : > { %v499_v1 = vpop.permute.xlu0 %498 }
  0xad   : > { %v501_v3 = vpop.permute.xlu1 %500  ;;  %581 = vst.msk [vmem:[#allocation3 + $0x70] sm:$0xff] %vm566_vm2, %v499_v1 }
  0xae   : > { %582 = vst.msk [vmem:[#allocation3 + $0x78] sm:$0xff] %vm566_vm2, %v501_v3  ;;  %872 = vrot.lane.b32.xlu0 %v5082_v36, %s4853_s23 }
  0xaf   : > { %874 = vrot.lane.b32.xlu1 %v5032_v11, %s4853_s23 }
  0xb0   : > { %v503_v4 = vpop.permute.xlu0 %502 }
  0xb1   : > { %v505_v5 = vpop.permute.xlu1 %504  ;;  %583 = vst.msk [vmem:[#allocation3 + $0x80] sm:$0xff] %vm566_vm2, %v503_v4 }
  0xb2   : > { %584 = vst.msk [vmem:[#allocation3 + $0x88] sm:$0xff] %vm566_vm2, %v505_v5  ;;  %876 = vrot.lane.b32.xlu0 %v5089_v39, %s4853_s23 }
  0xb3   : > { %878 = vrot.lane.b32.xlu1 %v5039_v15, %s4853_s23 }
  0xb4   : > { %v507_v7 = vpop.permute.xlu0 %506 }
  0xb5   : > { %v509_v8 = vpop.permute.xlu1 %508  ;;  %585 = vst.msk [vmem:[#allocation3 + $0x90] sm:$0xff] %vm566_vm2, %v507_v7  ;;  %v1985_v7 = vld [vmem:[%s7101_s1 + $0x10] sm:$0xff] }
  0xb6   : > { %586 = vst.msk [vmem:[#allocation3 + $0x98] sm:$0xff] %vm566_vm2, %v509_v8  ;;  %880 = vrot.lane.b32.xlu0 %v5105_v45, %s4853_s23  ;;  %v1986_v8 = vld [vmem:[%s7101_s1 + $0x18] sm:$0xff] }
  0xb7   : > { %882 = vrot.lane.b32.xlu1 %v5048_v18, %s4853_s23 }
  0xb8   : > { %v511_v10 = vpop.permute.xlu0 %510 }
  0xb9   : > { %v513_v38 = vpop.permute.xlu1 %512  ;;  %587 = vst.msk [vmem:[#allocation3 + $0xa0] sm:$0xff] %vm566_vm2, %v511_v10 }
  0xba   : > { %588 = vst.msk [vmem:[#allocation3 + $0xa8] sm:$0xff] %vm566_vm2, %v513_v38  ;;  %884 = vrot.lane.b32.xlu0 %v5113_v48, %s4853_s23 }
  0xbb   : > { %886 = vrot.lane.b32.xlu1 %v5053_v21, %s4853_s23 }
  0xbc   : > { %v515_v41 = vpop.permute.xlu0 %514 }
  0xbd   : > { %v517_v43 = vpop.permute.xlu1 %516  ;;  %589 = vst.msk [vmem:[#allocation3 + $0xb0] sm:$0xff] %vm566_vm2, %v515_v41 }
  0xbe   : > { %590 = vst.msk [vmem:[#allocation3 + $0xb8] sm:$0xff] %vm566_vm2, %v517_v43  ;;  %888 = vrot.lane.b32.xlu0 %v5117_v49, %s4853_s23 }
  0xbf   : > { %890 = vrot.lane.b32.xlu1 %v5060_v24, %s4853_s23 }
  0xc0   : > { %v519_v44 = vpop.permute.xlu0 %518 }
  0xc1   : > { %v521_v46 = vpop.permute.xlu1 %520  ;;  %591 = vst.msk [vmem:[#allocation3 + $0xc0] sm:$0xff] %vm566_vm2, %v519_v44 }
  0xc2   : > { %592 = vst.msk [vmem:[#allocation3 + $0xc8] sm:$0xff] %vm566_vm2, %v521_v46  ;;  %892 = vrot.lane.b32.xlu0 %v5123_v51, %s4853_s23 }
  0xc3   : > { %894 = vrot.lane.b32.xlu1 %v5067_v32, %s4853_s23 }
  0xc4   : > { %v523_v47 = vpop.permute.xlu0 %522 }
  0xc5   : > { %v525_v52 = vpop.permute.xlu1 %524  ;;  %593 = vst.msk [vmem:[#allocation3 + $0xd0] sm:$0xff] %vm566_vm2, %v523_v47 }
  0xc6   : > { %594 = vst.msk [vmem:[#allocation3 + $0xd8] sm:$0xff] %vm566_vm2, %v525_v52  ;;  %896 = vrot.lane.b32.xlu0 %v5132_v53, %s4853_s23 }
  0xc7   : > { %898 = vrot.lane.b32.xlu1 %v5085_v37, %s4853_s23 }
  0xc8   : > { %v527_v54 = vpop.permute.xlu0 %526 }
  0xc9   : > { %v529_v55 = vpop.permute.xlu1 %528  ;;  %595 = vst.msk [vmem:[#allocation3 + $0xe0] sm:$0xff] %vm566_vm2, %v527_v54 }
  0xca   : > { %596 = vst.msk [vmem:[#allocation3 + $0xe8] sm:$0xff] %vm566_vm2, %v529_v55  ;;  %900 = vrot.lane.b32.xlu0 %v5137_v56, %s4853_s23 }
  0xcb   : > { %902 = vrot.lane.b32.xlu1 %v5094_v40, %s4853_s23 }
  0xcc   : > { %v531_v61 = vpop.permute.xlu0 %530 }
  0xcd   : > { %v533_v62 = vpop.permute.xlu1 %532  ;;  %597 = vst.msk [vmem:[#allocation3 + $0xf0] sm:$0xff] %vm566_vm2, %v531_v61 }
  0xce   : > { %598 = vst.msk [vmem:[#allocation3 + $0xf8] sm:$0xff] %vm566_vm2, %v533_v62  ;;  %904 = vrot.lane.b32.xlu0 %v5141_v57, %s4853_s23  ;;  %v823_v57 = vld [vmem:[#allocation2 + $0x188] sm:$0xff] }
  0xcf   : > { %906 = vrot.lane.b32.xlu1 %v5101_v42, %s4853_s23  ;;  %v822_v42 = vld [vmem:[#allocation2 + $0x180] sm:$0xff] }
  0xd0   : > { %v664_v37 = vpop.permute.xlu0 %663 }
  0xd1   : > { %v666_v53 = vpop.permute.xlu1 %665  ;;  %760 = vst.msk [vmem:[#allocation3] sm:$0xff] %vm759_vm3, %v664_v37 }
  0xd2   : > { %761 = vst.msk [vmem:[#allocation3 + $0x8] sm:$0xff] %vm759_vm3, %v666_v53  ;;  %908 = vrot.lane.b32.xlu0 %v5147_v59, %s4853_s23 }
  0xd3   : > { %910 = vrot.lane.b32.xlu1 %v5119_v50, %s4853_s23 }
  0xd4   : > { %v668_v40 = vpop.permute.xlu0 %667 }
  0xd5   : > { %v670_v56 = vpop.permute.xlu1 %669  ;;  %762 = vst.msk [vmem:[#allocation3 + $0x10] sm:$0xff] %vm759_vm3, %v668_v40 }
  0xd6   : > { %763 = vst.msk [vmem:[#allocation3 + $0x18] sm:$0xff] %vm759_vm3, %v670_v56  ;;  %912 = vrot.lane.b32.xlu0 %v5149_v60, %s4853_s23 }
  0xd7   : > { %914 = vrot.lane.b32.xlu1 %v5143_v58, %s4853_s23 }
  0xd8   : > { %v672_v0 = vpop.permute.xlu0 %671 }
  0xd9   : > { %v674_v63 = vpop.permute.xlu1 %673  ;;  %764 = vst.msk [vmem:[#allocation3 + $0x20] sm:$0xff] %vm759_vm3, %v672_v0 }
  0xda   : > { %765 = vst.msk [vmem:[#allocation3 + $0x28] sm:$0xff] %vm759_vm3, %v674_v63  ;;  %916 = vrot.lane.b32.xlu0 %v822_v42, %s4853_s23 }
  0xdb   : > { %918 = vrot.lane.b32.xlu1 %v823_v57, %s4853_s23 }
  0xdc   : > { %v676_v50 = vpop.permute.xlu0 %675 }
  0xdd   : > { %v678_v59 = vpop.permute.xlu1 %677  ;;  %766 = vst.msk [vmem:[#allocation3 + $0x30] sm:$0xff] %vm759_vm3, %v676_v50 }
  0xde   : > { %767 = vst.msk [vmem:[#allocation3 + $0x38] sm:$0xff] %vm759_vm3, %v678_v59  ;;  %1049 = vrot.lane.b32.xlu0 %v4948_v25, %s4854_s24  ;;  %v1983_v25 = vld [vmem:[%s7101_s1] sm:$0xff] }
  0xdf   : > { %1051 = vrot.lane.b32.xlu1 %v4956_v27, %s4854_s24  ;;  %v1984_v27 = vld [vmem:[%s7101_s1 + $0x8] sm:$0xff] }
  0xe0   : > { %v680_v58 = vpop.permute.xlu0 %679  ;;  %v4767_v3 = vpack.c.bf16 %v1984_v27, %v1983_v25 }
  0xe1   : > { %v682_v60 = vpop.permute.xlu1 %681  ;;  %768 = vst.msk [vmem:[#allocation3 + $0x40] sm:$0xff] %vm759_vm3, %v680_v58 }
  0xe2   : > { %769 = vst.msk [vmem:[#allocation3 + $0x48] sm:$0xff] %vm759_vm3, %v682_v60  ;;  %1053 = vrot.lane.b32.xlu0 %v4961_v28, %s4854_s24  ;;  %4768 = vmatprep.subr.bf16.mxu0 %v4767_v3 }
  0xe3   : > { %1055 = vrot.lane.b32.xlu1 %v4963_v29, %s4854_s24  ;;  %4770 = vmatpush3.bf16.msra.mxu0 %v4767_v3 }
  0xe4   : > { %v684_v14 = vpop.permute.xlu0 %683 }
  0xe5   : > { %v686_v1 = vpop.permute.xlu1 %685  ;;  %770 = vst.msk [vmem:[#allocation3 + $0x50] sm:$0xff] %vm759_vm3, %v684_v14 }
  0xe6   : > { %771 = vst.msk [vmem:[#allocation3 + $0x58] sm:$0xff] %vm759_vm3, %v686_v1  ;;  %1242 = vrot.lane.b32.xlu0 %v5170_v12, %s4855_s29  ;;  %v4771_v12 = vpack.c.bf16 %v1986_v8, %v1985_v7 }
  0xe7   : > { %1244 = vrot.lane.b32.xlu1 %v5172_v13, %s4855_s29 }
  0xe8   : > { %v688_v4 = vpop.permute.xlu0 %687  ;;  %4772 = vmatprep.subr.bf16.mxu0 %v4771_v12 }
  0xe9   : > { %v690_v5 = vpop.permute.xlu1 %689  ;;  %772 = vst.msk [vmem:[#allocation3 + $0x60] sm:$0xff] %vm759_vm3, %v688_v4  ;;  %4774 = vmatpush3.bf16.msra.mxu0 %v4771_v12  ;;  %v1767_v12 = vld [vmem:[#allocation2 + $0x9a] sm:$0xff] }
  0xea   : > { %773 = vst.msk [vmem:[#allocation3 + $0x68] sm:$0xff] %vm759_vm3, %v690_v5  ;;  %1436 = vrot.lane.b32.xlu0 %v5055_v22, %s4856_s8  ;;  %v1987_v22 = vld [vmem:[%s7101_s1 + $0x20] sm:$0xf] }
  0xeb   : > { %1438 = vrot.lane.b32.xlu1 %v5013_v2, %s4856_s8  ;;  %4717 = vmatprep.subr.msk.mxu0 %vm2085_vm4, %v1987_v22 }
  0xec   : > { %v692_v13 = vpop.permute.xlu0 %691 }
  0xed   : > { %v694_v10 = vpop.permute.xlu1 %693  ;;  %774 = vst.msk [vmem:[#allocation3 + $0x70] sm:$0xff] %vm759_vm3, %v692_v13  ;;  %4718 = vmatpush3.msk.msra.mxu0 %vm2085_vm4, %v1987_v22 }
  0xee   : > { %775 = vst.msk [vmem:[#allocation3 + $0x78] sm:$0xff] %vm759_vm3, %v694_v10  ;;  %1629 = vrot.lane.b32.xlu0 %v4961_v28, %s4857_s9 }
  0xef   : > { %1631 = vrot.lane.b32.xlu1 %v4963_v29, %s4857_s9 }
  0xf0   : > { %v696_v2 = vpop.permute.xlu0 %695 }
  0xf1   : > { %v698_v38 = vpop.permute.xlu1 %697  ;;  %776 = vst.msk [vmem:[#allocation3 + $0x80] sm:$0xff] %vm759_vm3, %v696_v2  ;;  %v1575_v2 = vld [vmem:[#allocation2 + $0xa9] sm:$0xff] }
  0xf2   : > { %777 = vst.msk [vmem:[#allocation3 + $0x88] sm:$0xff] %vm759_vm3, %v698_v38  ;;  %1822 = vrot.lane.b32.xlu0 %v5178_v16, %s4858_s12 }
  0xf3   : > { %1246 = vrot.lane.b32.xlu1 %v5178_v16, %s4855_s29  ;;  %v1567_v16 = vld [vmem:[#allocation2 + $0x49] sm:$0xff] }
  0xf4   : > { %v700_v28 = vpop.permute.xlu0 %699 }
  0xf5   : > { %v702_v29 = vpop.permute.xlu1 %701  ;;  %778 = vst.msk [vmem:[#allocation3 + $0x90] sm:$0xff] %vm759_vm3, %v700_v28 }
  0xf6   : > { %779 = vst.msk [vmem:[#allocation3 + $0x98] sm:$0xff] %vm759_vm3, %v702_v29  ;;  %1824 = vrot.lane.b32.xlu0 %v5180_v17, %s4858_s12  ;;  %v1576_v29 = vld [vmem:[#allocation2 + $0xb1] sm:$0xff] }
  0xf7   : > { %1248 = vrot.lane.b32.xlu1 %v5180_v17, %s4855_s29  ;;  %v1568_v17 = vld [vmem:[#allocation2 + $0x51] sm:$0xff] }
  0xf8   : > { %v704_v41 = vpop.permute.xlu0 %703 }
  0xf9   : > { %v706_v43 = vpop.permute.xlu1 %705  ;;  %780 = vst.msk [vmem:[#allocation3 + $0xa0] sm:$0xff] %vm759_vm3, %v704_v41  ;;  %v1768_v41 = vld [vmem:[#allocation2 + $0xaa] sm:$0xff] }
  0xfa   : > { %781 = vst.msk [vmem:[#allocation3 + $0xa8] sm:$0xff] %vm759_vm3, %v706_v43  ;;  %1440 = vrot.lane.b32.xlu0 %v5071_v33, %s4856_s8 }
  0xfb   : > { %1442 = vrot.lane.b32.xlu1 %v5021_v6, %s4856_s8 }
  0xfc   : > { %v708_v44 = vpop.permute.xlu0 %707 }
  0xfd   : > { %v710_v46 = vpop.permute.xlu1 %709  ;;  %782 = vst.msk [vmem:[#allocation3 + $0xb0] sm:$0xff] %vm759_vm3, %v708_v44  ;;  %v1769_v44 = vld [vmem:[#allocation2 + $0xb2] sm:$0xff] }
  0xfe   : > { %783 = vst.msk [vmem:[#allocation3 + $0xb8] sm:$0xff] %vm759_vm3, %v710_v46  ;;  %1633 = vrot.lane.b32.xlu0 %v1567_v16, %s4857_s9 }
  0xff   : > { %1057 = vrot.lane.b32.xlu1 %v1567_v16, %s4854_s24 }
 0x100   : > { %v712_v47 = vpop.permute.xlu0 %711 }
 0x101   : > { %v714_v52 = vpop.permute.xlu1 %713  ;;  %784 = vst.msk [vmem:[#allocation3 + $0xc0] sm:$0xff] %vm759_vm3, %v712_v47 }
 0x102   : > { %785 = vst.msk [vmem:[#allocation3 + $0xc8] sm:$0xff] %vm759_vm3, %v714_v52  ;;  %1635 = vrot.lane.b32.xlu0 %v1568_v17, %s4857_s9 }
 0x103   : > { %1826 = vrot.lane.b32.xlu1 %v5186_v19, %s4858_s12 }
 0x104   : > { %v716_v6 = vpop.permute.xlu0 %715 }
 0x105   : > { %v718_v33 = vpop.permute.xlu1 %717  ;;  %786 = vst.msk [vmem:[#allocation3 + $0xd0] sm:$0xff] %vm759_vm3, %v716_v6  ;;  %v1577_v6 = vld [vmem:[#allocation2 + $0xc1] sm:$0xff] }
 0x106   : > { %787 = vst.msk [vmem:[#allocation3 + $0xd8] sm:$0xff] %vm759_vm3, %v718_v33  ;;  %1059 = vrot.lane.b32.xlu0 %v1568_v17, %s4854_s24 }
 0x107   : > { %1250 = vrot.lane.b32.xlu1 %v5186_v19, %s4855_s29  ;;  %v1569_v19 = vld [vmem:[#allocation2 + $0x61] sm:$0xff] }
 0x108   : > { %v720_v54 = vpop.permute.xlu0 %719 }
 0x109   : > { %v722_v55 = vpop.permute.xlu1 %721  ;;  %788 = vst.msk [vmem:[#allocation3 + $0xe0] sm:$0xff] %vm759_vm3, %v720_v54 }
 0x10a   : > { %789 = vst.msk [vmem:[#allocation3 + $0xe8] sm:$0xff] %vm759_vm3, %v722_v55  ;;  %1828 = vrot.lane.b32.xlu0 %v5188_v20, %s4858_s12  ;;  %v1578_v55 = vld [vmem:[#allocation2 + $0xc9] sm:$0xff] }
 0x10b   : > { %1252 = vrot.lane.b32.xlu1 %v5188_v20, %s4855_s29  ;;  %v1570_v20 = vld [vmem:[#allocation2 + $0x69] sm:$0xff] }
 0x10c   : > { %v724_v61 = vpop.permute.xlu0 %723 }
 0x10d   : > { %v726_v62 = vpop.permute.xlu1 %725  ;;  %790 = vst.msk [vmem:[#allocation3 + $0xf0] sm:$0xff] %vm759_vm3, %v724_v61  ;;  %v1770_v61 = vld [vmem:[#allocation2 + $0xc2] sm:$0xff] }
 0x10e   : > { %791 = vst.msk [vmem:[#allocation3 + $0xf8] sm:$0xff] %vm759_vm3, %v726_v62  ;;  %1444 = vrot.lane.b32.xlu0 %v5073_v34, %s4856_s8 }
 0x10f   : > { %1446 = vrot.lane.b32.xlu1 %v5027_v9, %s4856_s8 }
 0x110   : > { %v857_v37 = vpop.permute.xlu0 %856 }
 0x111   : > { %v859_v53 = vpop.permute.xlu1 %858  ;;  %953 = vst.msk [vmem:[#allocation3] sm:$0xff] %vm952_vm5, %v857_v37  ;;  %v1771_v37 = vld [vmem:[#allocation2 + $0xca] sm:$0xff] }
 0x112   : > { %954 = vst.msk [vmem:[#allocation3 + $0x8] sm:$0xff] %vm952_vm5, %v859_v53  ;;  %1637 = vrot.lane.b32.xlu0 %v1569_v19, %s4857_s9 }
 0x113   : > { %1061 = vrot.lane.b32.xlu1 %v1569_v19, %s4854_s24 }
 0x114   : > { %v861_v40 = vpop.permute.xlu0 %860 }
 0x115   : > { %v863_v56 = vpop.permute.xlu1 %862  ;;  %955 = vst.msk [vmem:[#allocation3 + $0x10] sm:$0xff] %vm952_vm5, %v861_v40 }
 0x116   : > { %956 = vst.msk [vmem:[#allocation3 + $0x18] sm:$0xff] %vm952_vm5, %v863_v56  ;;  %1639 = vrot.lane.b32.xlu0 %v1570_v20, %s4857_s9 }
 0x117   : > { %1830 = vrot.lane.b32.xlu1 %v5194_v23, %s4858_s12 }
 0x118   : > { %v865_v9 = vpop.permute.xlu0 %864 }
 0x119   : > { %v867_v34 = vpop.permute.xlu1 %866  ;;  %957 = vst.msk [vmem:[#allocation3 + $0x20] sm:$0xff] %vm952_vm5, %v865_v9 }
 0x11a   : > { %958 = vst.msk [vmem:[#allocation3 + $0x28] sm:$0xff] %vm952_vm5, %v867_v34  ;;  %1063 = vrot.lane.b32.xlu0 %v1570_v20, %s4854_s24 }
 0x11b   : > { %1254 = vrot.lane.b32.xlu1 %v5194_v23, %s4855_s29  ;;  %v1571_v23 = vld [vmem:[#allocation2 + $0x79] sm:$0xff] }
 0x11c   : > { %v869_v42 = vpop.permute.xlu0 %868 }
 0x11d   : > { %v871_v57 = vpop.permute.xlu1 %870  ;;  %959 = vst.msk [vmem:[#allocation3 + $0x30] sm:$0xff] %vm952_vm5, %v869_v42  ;;  %v1579_v42 = vld [vmem:[#allocation2 + $0xd9] sm:$0xff] }
 0x11e   : > { %960 = vst.msk [vmem:[#allocation3 + $0x38] sm:$0xff] %vm952_vm5, %v871_v57  ;;  %1832 = vrot.lane.b32.xlu0 %v5196_v26, %s4858_s12 }
 0x11f   : > { %1256 = vrot.lane.b32.xlu1 %v5196_v26, %s4855_s29  ;;  %v1572_v26 = vld [vmem:[#allocation2 + $0x81] sm:$0xff] }
 0x120   : > { %v873_v0 = vpop.permute.xlu0 %872 }
 0x121   : > { %v875_v63 = vpop.permute.xlu1 %874  ;;  %961 = vst.msk [vmem:[#allocation3 + $0x40] sm:$0xff] %vm952_vm5, %v873_v0 }
 0x122   : > { %962 = vst.msk [vmem:[#allocation3 + $0x48] sm:$0xff] %vm952_vm5, %v875_v63  ;;  %1448 = vrot.lane.b32.xlu0 %v5082_v36, %s4856_s8  ;;  %v1580_v63 = vld [vmem:[#allocation2 + $0xe1] sm:$0xff] }
 0x123   : > { %1450 = vrot.lane.b32.xlu1 %v5032_v11, %s4856_s8 }
 0x124   : > { %v877_v50 = vpop.permute.xlu0 %876 }
 0x125   : > { %v879_v59 = vpop.permute.xlu1 %878  ;;  %963 = vst.msk [vmem:[#allocation3 + $0x50] sm:$0xff] %vm952_vm5, %v877_v50 }
 0x126   : > { %964 = vst.msk [vmem:[#allocation3 + $0x58] sm:$0xff] %vm952_vm5, %v879_v59  ;;  %1641 = vrot.lane.b32.xlu0 %v1571_v23, %s4857_s9 }
 0x127   : > { %1065 = vrot.lane.b32.xlu1 %v1571_v23, %s4854_s24  ;;  %v1772_v23 = vld [vmem:[#allocation2 + $0xda] sm:$0xff] }
 0x128   : > { %v881_v58 = vpop.permute.xlu0 %880 }
 0x129   : > { %v883_v60 = vpop.permute.xlu1 %882  ;;  %965 = vst.msk [vmem:[#allocation3 + $0x60] sm:$0xff] %vm952_vm5, %v881_v58  ;;  %v1773_v58 = vld [vmem:[#allocation2 + $0xe2] sm:$0xff] }
 0x12a   : > { %966 = vst.msk [vmem:[#allocation3 + $0x68] sm:$0xff] %vm952_vm5, %v883_v60  ;;  %1643 = vrot.lane.b32.xlu0 %v1572_v26, %s4857_s9 }
 0x12b   : > { %1834 = vrot.lane.b32.xlu1 %v5202_v30, %s4858_s12 }
 0x12c   : > { %v885_v11 = vpop.permute.xlu0 %884 }
 0x12d   : > { %v887_v36 = vpop.permute.xlu1 %886  ;;  %967 = vst.msk [vmem:[#allocation3 + $0x70] sm:$0xff] %vm952_vm5, %v885_v11 }
 0x12e   : > { %968 = vst.msk [vmem:[#allocation3 + $0x78] sm:$0xff] %vm952_vm5, %v887_v36  ;;  %1067 = vrot.lane.b32.xlu0 %v1572_v26, %s4854_s24 }
 0x12f   : > { %1258 = vrot.lane.b32.xlu1 %v5202_v30, %s4855_s29  ;;  %v1573_v30 = vld [vmem:[#allocation2 + $0x91] sm:$0xff] }
 0x130   : > { %v889_v14 = vpop.permute.xlu0 %888 }
 0x131   : > { %v891_v1 = vpop.permute.xlu1 %890  ;;  %969 = vst.msk [vmem:[#allocation3 + $0x80] sm:$0xff] %vm952_vm5, %v889_v14 }
 0x132   : > { %970 = vst.msk [vmem:[#allocation3 + $0x88] sm:$0xff] %vm952_vm5, %v891_v1  ;;  %1836 = vrot.lane.b32.xlu0 %v5204_v31, %s4858_s12 }
 0x133   : > { %1260 = vrot.lane.b32.xlu1 %v5204_v31, %s4855_s29  ;;  %v1574_v31 = vld [vmem:[#allocation2 + $0x99] sm:$0xff] }
 0x134   : > { %v893_v25 = vpop.permute.xlu0 %892 }
 0x135   : > { %v895_v27 = vpop.permute.xlu1 %894  ;;  %971 = vst.msk [vmem:[#allocation3 + $0x90] sm:$0xff] %vm952_vm5, %v893_v25  ;;  %v322_v25 = vld [vmem:[#allocation2 + $0x18f] sm:$0x1] }
 0x136   : > { %972 = vst.msk [vmem:[#allocation3 + $0x98] sm:$0xff] %vm952_vm5, %v895_v27  ;;  %1452 = vrot.lane.b32.xlu0 %v5089_v39, %s4856_s8  ;;  %v1581_v27 = vld [vmem:[#allocation2 + $0xf1] sm:$0xff] }
 0x137   : > { %1454 = vrot.lane.b32.xlu1 %v5039_v15, %s4856_s8  ;;  %v1188_v15 = vld [vmem:[#allocation2 + $0x92] sm:$0xff]  ;;  %340 = vst.msk [vmem:[#allocation2 + $0x191] sm:$0x1] %vm287_vm1, %v322_v25 }
 0x138   : > { %v897_v3 = vpop.permute.xlu0 %896 }
 0x139   : > { %v899_v4 = vpop.permute.xlu1 %898  ;;  %973 = vst.msk [vmem:[#allocation3 + $0xa0] sm:$0xff] %vm952_vm5, %v897_v3 }
 0x13a   : > { %974 = vst.msk [vmem:[#allocation3 + $0xa8] sm:$0xff] %vm952_vm5, %v899_v4  ;;  %1645 = vrot.lane.b32.xlu0 %v1573_v30, %s4857_s9  ;;  %v286_v4 = vld [vmem:[#allocation2 + $0x19a] sm:$0x1] }
 0x13b   : > { %1069 = vrot.lane.b32.xlu1 %v1573_v30, %s4854_s24  ;;  %305 = vst.msk [vmem:[#allocation2 + $0x198] sm:$0x1] %vm287_vm1, %v286_v4 }
 0x13c   : > { %v901_v5 = vpop.permute.xlu0 %900 }
 0x13d   : > { %v903_v7 = vpop.permute.xlu1 %902  ;;  %975 = vst.msk [vmem:[#allocation3 + $0xb0] sm:$0xff] %vm952_vm5, %v901_v5 }
 0x13e   : > { %976 = vst.msk [vmem:[#allocation3 + $0xb8] sm:$0xff] %vm952_vm5, %v903_v7  ;;  %1647 = vrot.lane.b32.xlu0 %v1574_v31, %s4857_s9 }
 0x13f   : > { %1838 = vrot.lane.b32.xlu1 %v5210_v35, %s4858_s12 }
 0x140   : > { %v905_v39 = vpop.permute.xlu0 %904 }
 0x141   : > { %v907_v8 = vpop.permute.xlu1 %906  ;;  %977 = vst.msk [vmem:[#allocation3 + $0xc0] sm:$0xff] %vm952_vm5, %v905_v39 }
 0x142   : > { %978 = vst.msk [vmem:[#allocation3 + $0xc8] sm:$0xff] %vm952_vm5, %v907_v8  ;;  %1071 = vrot.lane.b32.xlu0 %v1574_v31, %s4854_s24  ;;  %v1774_v31 = vld [vmem:[#allocation2 + $0xf2] sm:$0xff]  ;;  %v323_v8 = vld [vmem:[#allocation2 + $0x1a7] sm:$0x1] }
 0x143   : > { %1262 = vrot.lane.b32.xlu1 %v1188_v15, %s4855_s29  ;;  %341 = vst.msk [vmem:[#allocation2 + $0x1a9] sm:$0x1] %vm287_vm1, %v323_v8 }
 0x144   : > { %v909_v13 = vpop.permute.xlu0 %908 }
 0x145   : > { %v911_v10 = vpop.permute.xlu1 %910  ;;  %979 = vst.msk [vmem:[#allocation3 + $0xd0] sm:$0xff] %vm952_vm5, %v909_v13 }
 0x146   : > { %980 = vst.msk [vmem:[#allocation3 + $0xd8] sm:$0xff] %vm952_vm5, %v911_v10  ;;  %1840 = vrot.lane.b32.xlu0 %v1767_v12, %s4858_s12 }
 0x147   : > { %1264 = vrot.lane.b32.xlu1 %v1767_v12, %s4855_s29  ;;  %v1775_v12 = vld [vmem:[#allocation2 + $0xfa] sm:$0xff] }
 0x148   : > { %v913_v35 = vpop.permute.xlu0 %912 }
 0x149   : > { %v915_v22 = vpop.permute.xlu1 %914  ;;  %981 = vst.msk [vmem:[#allocation3 + $0xe0] sm:$0xff] %vm952_vm5, %v913_v35  ;;  %v1390_v35 = vld [vmem:[#allocation2 + $0x108] sm:$0xff] }
 0x14a   : > { %982 = vst.msk [vmem:[#allocation3 + $0xe8] sm:$0xff] %vm952_vm5, %v915_v22  ;;  %1456 = vrot.lane.b32.xlu0 %v5105_v45, %s4856_s8  ;;  %v1391_v22 = vld [vmem:[#allocation2 + $0x110] sm:$0xff] }
 0x14b   : > { %1458 = vrot.lane.b32.xlu1 %v5048_v18, %s4856_s8 }
 0x14c   : > { %v917_v38 = vpop.permute.xlu0 %916 }
 0x14d   : > { %v919_v28 = vpop.permute.xlu1 %918  ;;  %983 = vst.msk [vmem:[#allocation3 + $0xf0] sm:$0xff] %vm952_vm5, %v917_v38 }
 0x14e   : > { %984 = vst.msk [vmem:[#allocation3 + $0xf8] sm:$0xff] %vm952_vm5, %v919_v28  ;;  %1649 = vrot.lane.b32.xlu0 %v1575_v2, %s4857_s9 }
 0x14f   : > { %1073 = vrot.lane.b32.xlu1 %v1575_v2, %s4854_s24 }
 0x150   : > { %v1050_v43 = vpop.permute.xlu0 %1049 }
 0x151   : > { %v1052_v16 = vpop.permute.xlu1 %1051  ;;  %1146 = vst.msk [vmem:[#allocation3] sm:$0xff] %vm1145_vm6, %v1050_v43 }
 0x152   : > { %1147 = vst.msk [vmem:[#allocation3 + $0x8] sm:$0xff] %vm1145_vm6, %v1052_v16  ;;  %1651 = vrot.lane.b32.xlu0 %v1576_v29, %s4857_s9  ;;  %v1584_v16 = vld [vmem:[#allocation2 + $0x111] sm:$0xff] }
 0x153   : > { %1842 = vrot.lane.b32.xlu1 %v1768_v41, %s4858_s12 }
 0x154   : > { %v1054_v18 = vpop.permute.xlu0 %1053 }
 0x155   : > { %v1056_v45 = vpop.permute.xlu1 %1055  ;;  %1148 = vst.msk [vmem:[#allocation3 + $0x10] sm:$0xff] %vm1145_vm6, %v1054_v18  ;;  %v1776_v18 = vld [vmem:[#allocation2 + $0x10a] sm:$0xff] }
 0x156   : > { %1149 = vst.msk [vmem:[#allocation3 + $0x18] sm:$0xff] %vm1145_vm6, %v1056_v45  ;;  %1075 = vrot.lane.b32.xlu0 %v1576_v29, %s4854_s24  ;;  %v1583_v29 = vld [vmem:[#allocation2 + $0x109] sm:$0xff] }
 0x157   : > { %1266 = vrot.lane.b32.xlu1 %v1768_v41, %s4855_s29 }
 0x158   : > { %v1243_v46 = vpop.permute.xlu0 %1242 }
 0x159   : > { %v1245_v17 = vpop.permute.xlu1 %1244  ;;  %1339 = vst.msk [vmem:[#allocation3] sm:$0xff] %vm1338_vm7, %v1243_v46 }
 0x15a   : > { %1340 = vst.msk [vmem:[#allocation3 + $0x8] sm:$0xff] %vm1338_vm7, %v1245_v17  ;;  %1844 = vrot.lane.b32.xlu0 %v1769_v44, %s4858_s12 }
 0x15b   : > { %1268 = vrot.lane.b32.xlu1 %v1769_v44, %s4855_s29 }
 0x15c   : > { %v1437_v47 = vpop.permute.xlu0 %1436 }
 0x15d   : > { %v1439_v52 = vpop.permute.xlu1 %1438  ;;  %1533 = vst.msk [vmem:[#allocation3] sm:$0xff] %vm1532_vm8, %v1437_v47 }
 0x15e   : > { %1534 = vst.msk [vmem:[#allocation3 + $0x8] sm:$0xff] %vm1532_vm8, %v1439_v52  ;;  %1460 = vrot.lane.b32.xlu0 %v5113_v48, %s4856_s8  ;;  %v1777_v52 = vld [vmem:[#allocation2 + $0x112] sm:$0xff] }
 0x15f   : > { %1462 = vrot.lane.b32.xlu1 %v5053_v21, %s4856_s8 }
 0x160   : > { %v1630_v33 = vpop.permute.xlu0 %1629 }
 0x161   : > { %v1632_v54 = vpop.permute.xlu1 %1631  ;;  %1726 = vst.msk [vmem:[#allocation3] sm:$0xff] %vm1725_vm9, %v1630_v33 }
 0x162   : > { %1727 = vst.msk [vmem:[#allocation3 + $0x8] sm:$0xff] %vm1725_vm9, %v1632_v54  ;;  %1653 = vrot.lane.b32.xlu0 %v1577_v6, %s4857_s9  ;;  %v1392_v54 = vld [vmem:[#allocation2 + $0x120] sm:$0xff] }
 0x163   : > { %1077 = vrot.lane.b32.xlu1 %v1577_v6, %s4854_s24 }
 0x164   : > { %v1823_v62 = vpop.permute.xlu0 %1822 }
 0x165   : > { %v1247_v48 = vpop.permute.xlu1 %1246  ;;  %1919 = vst.msk [vmem:[#allocation3] sm:$0xff] %vm1918_vm10, %v1823_v62 }
 0x166   : > { %1341 = vst.msk [vmem:[#allocation3 + $0x10] sm:$0xff] %vm1338_vm7, %v1247_v48  ;;  %1655 = vrot.lane.b32.xlu0 %v1578_v55, %s4857_s9 }
 0x167   : > { %1846 = vrot.lane.b32.xlu1 %v1770_v61, %s4858_s12 }
 0x168   : > { %v1825_v21 = vpop.permute.xlu0 %1824 }
 0x169   : > { %v1249_v19 = vpop.permute.xlu1 %1248  ;;  %1920 = vst.msk [vmem:[#allocation3 + $0x8] sm:$0xff] %vm1918_vm10, %v1825_v21  ;;  %v1585_v21 = vld [vmem:[#allocation2 + $0x121] sm:$0xff] }
 0x16a   : > { %1342 = vst.msk [vmem:[#allocation3 + $0x18] sm:$0xff] %vm1338_vm7, %v1249_v19  ;;  %1079 = vrot.lane.b32.xlu0 %v1578_v55, %s4854_s24  ;;  %v1393_v55 = vld [vmem:[#allocation2 + $0x128] sm:$0xff] }
 0x16b   : > { %1270 = vrot.lane.b32.xlu1 %v1770_v61, %s4855_s29 }
 0x16c   : > { %v1441_v53 = vpop.permute.xlu0 %1440  ;;  %v1951_v40 = vld [vmem:[#allocation3] sm:$0xff] }
 0x16d   : > { %v1443_v20 = vpop.permute.xlu1 %1442  ;;  %1535 = vst.msk [vmem:[#allocation3 + $0x10] sm:$0xff] %vm1532_vm8, %v1441_v53  ;;  %4719 = vmatprep.mubr.msk.f32.mxu0 %vm1988_vm11, %v1951_v40  ;;  %v1586_v53 = vld [vmem:[#allocation2 + $0x129] sm:$0xff] }
 0x16e   : > { %1536 = vst.msk [vmem:[#allocation3 + $0x18] sm:$0xff] %vm1532_vm8, %v1443_v20  ;;  %1848 = vrot.lane.b32.xlu0 %v1771_v37, %s4858_s12  ;;  %v1778_v20 = vld [vmem:[#allocation2 + $0x122] sm:$0xff] }
 0x16f   : > { %1272 = vrot.lane.b32.xlu1 %v1771_v37, %s4855_s29 }
 0x170   : > { %v1634_v56 = vpop.permute.xlu0 %1633  ;;  %v1952_v34 = vld [vmem:[#allocation3 + $0x8] sm:$0xff] }
 0x171   : > { %v1058_v9 = vpop.permute.xlu1 %1057  ;;  %1728 = vst.msk [vmem:[#allocation3 + $0x10] sm:$0xff] %vm1725_vm9, %v1634_v56  ;;  %4720 = vmatmul.mubr.msk.f32.vlgmr.msra.gmra.mrb[0].mxu0 %vm1988_vm11, %v1952_v34 }
 0x172   : > { %1150 = vst.msk [vmem:[#allocation3 + $0x20] sm:$0xff] %vm1145_vm6, %v1058_v9  ;;  %1464 = vrot.lane.b32.xlu0 %v5117_v49, %s4856_s8 }
 0x173   : > { %1466 = vrot.lane.b32.xlu1 %v5060_v24, %s4856_s8 }
 0x174   : > { %v1636_v57 = vpop.permute.xlu0 %1635 }
 0x175   : > { %v1827_v0 = vpop.permute.xlu1 %1826  ;;  %1729 = vst.msk [vmem:[#allocation3 + $0x18] sm:$0xff] %vm1725_vm9, %v1636_v57  ;;  %v1779_v57 = vld [vmem:[#allocation2 + $0x12a] sm:$0xff] }
 0x176   : > { %1921 = vst.msk [vmem:[#allocation3 + $0x10] sm:$0xff] %vm1918_vm10, %v1827_v0  ;;  %1657 = vrot.lane.b32.xlu0 %v1579_v42, %s4857_s9 }
 0x177   : > { %1081 = vrot.lane.b32.xlu1 %v1579_v42, %s4854_s24 }
 0x178   : > { %v1060_v50 = vpop.permute.xlu0 %1059 }
 0x179   : > { %v1251_v59 = vpop.permute.xlu1 %1250  ;;  %1151 = vst.msk [vmem:[#allocation3 + $0x28] sm:$0xff] %vm1145_vm6, %v1060_v50  ;;  %v1395_v50 = vld [vmem:[#allocation2 + $0x140] sm:$0xff] }
 0x17a   : > { %1343 = vst.msk [vmem:[#allocation3 + $0x20] sm:$0xff] %vm1338_vm7, %v1251_v59  ;;  %1659 = vrot.lane.b32.xlu0 %v1580_v63, %s4857_s9 }
 0x17b   : > { %1850 = vrot.lane.b32.xlu1 %v1772_v23, %s4858_s12 }
 0x17c   : > { %v1829_v24 = vpop.permute.xlu0 %1828 }
 0x17d   : > { %v1253_v49 = vpop.permute.xlu1 %1252  ;;  %v1953_v26 = vld [vmem:[#allocation3 + $0x10] sm:$0xff]  ;;  %1922 = vst.msk [vmem:[#allocation3 + $0x18] sm:$0xff] %vm1918_vm10, %v1829_v24 }
 0x17e   : > { %1344 = vst.msk [vmem:[#allocation3 + $0x28] sm:$0xff] %vm1338_vm7, %v1253_v49  ;;  %4722 = vmatprep.mubr.msk.f32.mxu0 %vm1988_vm11, %v1953_v26  ;;  %1083 = vrot.lane.b32.xlu0 %v1580_v63, %s4854_s24  ;;  %v1587_v26 = vld [vmem:[#allocation2 + $0x139] sm:$0xff] }
 0x17f   : > { %1274 = vrot.lane.b32.xlu1 %v1772_v23, %s4855_s29  ;;  %v1394_v23 = vld [vmem:[#allocation2 + $0x138] sm:$0xff] }
 0x180   : > { %v1445_v60 = vpop.permute.xlu0 %1444 }
 0x181   : > { %v1447_v11 = vpop.permute.xlu1 %1446  ;;  %1537 = vst.msk [vmem:[#allocation3 + $0x20] sm:$0xff] %vm1532_vm8, %v1445_v60 }
 0x182   : > { %1538 = vst.msk [vmem:[#allocation3 + $0x28] sm:$0xff] %vm1532_vm8, %v1447_v11  ;;  %1852 = vrot.lane.b32.xlu0 %v1773_v58, %s4858_s12  ;;  %v1588_v11 = vld [vmem:[#allocation2 + $0x141] sm:$0xff] }
 0x183   : > { %1276 = vrot.lane.b32.xlu1 %v1773_v58, %s4855_s29 }
 0x184   : > { %v1638_v36 = vpop.permute.xlu0 %1637  ;;  %v1954_v1 = vld [vmem:[#allocation3 + $0x18] sm:$0xff] }
 0x185   : > { %v1062_v14 = vpop.permute.xlu1 %1061  ;;  %1730 = vst.msk [vmem:[#allocation3 + $0x20] sm:$0xff] %vm1725_vm9, %v1638_v36  ;;  %4723 = vmatmul.mubr.msk.f32.gmra.mrb[2].mxu0 %vm1988_vm11, %v1954_v1  ;;  %v1780_v36 = vld [vmem:[#allocation2 + $0x13a] sm:$0xff] }
 0x186   : > { %1152 = vst.msk [vmem:[#allocation3 + $0x30] sm:$0xff] %vm1145_vm6, %v1062_v14  ;;  %1468 = vrot.lane.b32.xlu0 %v5123_v51, %s4856_s8  ;;  %v1582_v51 = vld [vmem:[#allocation2 + $0xf9] sm:$0xff] }
 0x187   : > { %1470 = vrot.lane.b32.xlu1 %v5067_v32, %s4856_s8 }
 0x188   : > { %v1640_v30 = vpop.permute.xlu0 %1639 }
 0x189   : > { %v1831_v3 = vpop.permute.xlu1 %1830  ;;  %1731 = vst.msk [vmem:[#allocation3 + $0x28] sm:$0xff] %vm1725_vm9, %v1640_v30 }
 0x18a   : > { %1923 = vst.msk [vmem:[#allocation3 + $0x20] sm:$0xff] %vm1918_vm10, %v1831_v3  ;;  %1661 = vrot.lane.b32.xlu0 %v1581_v27, %s4857_s9  ;;  %v1781_v3 = vld [vmem:[#allocation2 + $0x142] sm:$0xff] }
 0x18b   : > { %1085 = vrot.lane.b32.xlu1 %v1581_v27, %s4854_s24 }
 0x18c   : > { %v1064_v5 = vpop.permute.xlu0 %1063 }
 0x18d   : > { %v1255_v32 = vpop.permute.xlu1 %1254  ;;  %1153 = vst.msk [vmem:[#allocation3 + $0x38] sm:$0xff] %vm1145_vm6, %v1064_v5  ;;  %v1397_v5 = vld [vmem:[#allocation2 + $0x158] sm:$0xff] }
 0x18e   : > { %1345 = vst.msk [vmem:[#allocation3 + $0x30] sm:$0xff] %vm1338_vm7, %v1255_v32  ;;  %1663 = vrot.lane.b32.xlu0 %v1582_v51, %s4857_s9 }
 0x18f   : > { %1854 = vrot.lane.b32.xlu1 %v1774_v31, %s4858_s12 }
 0x190   : > { %v1833_v7 = vpop.permute.xlu0 %1832 }
 0x191   : > { %v1257_v15 = vpop.permute.xlu1 %1256  ;;  %v1955_v39 = vld [vmem:[#allocation3 + $0x20] sm:$0xff]  ;;  %1924 = vst.msk [vmem:[#allocation3 + $0x28] sm:$0xff] %vm1918_vm10, %v1833_v7 }
 0x192   : > { %1346 = vst.msk [vmem:[#allocation3 + $0x38] sm:$0xff] %vm1338_vm7, %v1257_v15  ;;  %4725 = vmatprep.mubr.msk.f32.mxu0 %vm1988_vm11, %v1955_v39  ;;  %1087 = vrot.lane.b32.xlu0 %v1582_v51, %s4854_s24  ;;  %v1589_v39 = vld [vmem:[#allocation2 + $0x151] sm:$0xff] }
 0x193   : > { %1278 = vrot.lane.b32.xlu1 %v1774_v31, %s4855_s29  ;;  %v1396_v31 = vld [vmem:[#allocation2 + $0x150] sm:$0xff] }
 0x194   : > { %v1449_v13 = vpop.permute.xlu0 %1448 }
 0x195   : > { %v1451_v10 = vpop.permute.xlu1 %1450  ;;  %1539 = vst.msk [vmem:[#allocation3 + $0x30] sm:$0xff] %vm1532_vm8, %v1449_v13  ;;  %v1590_v13 = vld [vmem:[#allocation2 + $0x159] sm:$0xff] }
 0x196   : > { %1540 = vst.msk [vmem:[#allocation3 + $0x38] sm:$0xff] %vm1532_vm8, %v1451_v10  ;;  %1856 = vrot.lane.b32.xlu0 %v1775_v12, %s4858_s12  ;;  %v1782_v10 = vld [vmem:[#allocation2 + $0x152] sm:$0xff] }
 0x197   : > { %1280 = vrot.lane.b32.xlu1 %v1775_v12, %s4855_s29 }
 0x198   : > { %v1642_v2 = vpop.permute.xlu0 %1641  ;;  %v1956_v28 = vld [vmem:[#allocation3 + $0x28] sm:$0xff] }
 0x199   : > { %v1066_v38 = vpop.permute.xlu1 %1065  ;;  %1732 = vst.msk [vmem:[#allocation3 + $0x30] sm:$0xff] %vm1725_vm9, %v1642_v2  ;;  %4726 = vmatmul.mubr.msk.f32.gmra.mrb[4].mxu0 %vm1988_vm11, %v1956_v28 }
 0x19a   : > { %1154 = vst.msk [vmem:[#allocation3 + $0x40] sm:$0xff] %vm1145_vm6, %v1066_v38  ;;  %1472 = vrot.lane.b32.xlu0 %v1390_v35, %s4856_s8 }
 0x19b   : > { %1474 = vrot.lane.b32.xlu1 %v1391_v22, %s4856_s8 }
 0x19c   : > { %v1644_v41 = vpop.permute.xlu0 %1643 }
 0x19d   : > { %v1835_v43 = vpop.permute.xlu1 %1834  ;;  %1733 = vst.msk [vmem:[#allocation3 + $0x38] sm:$0xff] %vm1725_vm9, %v1644_v41 }
 0x19e   : > { %1925 = vst.msk [vmem:[#allocation3 + $0x30] sm:$0xff] %vm1918_vm10, %v1835_v43  ;;  %1665 = vrot.lane.b32.xlu0 %v1583_v29, %s4857_s9 }
 0x19f   : > { %1089 = vrot.lane.b32.xlu1 %v1583_v29, %s4854_s24  ;;  %v1783_v29 = vld [vmem:[#allocation2 + $0x15a] sm:$0xff] }
 0x1a0   : > { %v1068_v45 = vpop.permute.xlu0 %1067 }
 0x1a1   : > { %v1259_v44 = vpop.permute.xlu1 %1258  ;;  %1155 = vst.msk [vmem:[#allocation3 + $0x48] sm:$0xff] %vm1145_vm6, %v1068_v45 }
 0x1a2   : > { %1347 = vst.msk [vmem:[#allocation3 + $0x40] sm:$0xff] %vm1338_vm7, %v1259_v44  ;;  %1667 = vrot.lane.b32.xlu0 %v1584_v16, %s4857_s9 }
 0x1a3   : > { %1858 = vrot.lane.b32.xlu1 %v1776_v18, %s4858_s12 }
 0x1a4   : > { %v1837_v46 = vpop.permute.xlu0 %1836 }
 0x1a5   : > { %v1261_v17 = vpop.permute.xlu1 %1260  ;;  %v1957_v47 = vld [vmem:[#allocation3 + $0x30] sm:$0xff]  ;;  %1926 = vst.msk [vmem:[#allocation3 + $0x38] sm:$0xff] %vm1918_vm10, %v1837_v46 }
 0x1a6   : > { %1348 = vst.msk [vmem:[#allocation3 + $0x48] sm:$0xff] %vm1338_vm7, %v1261_v17  ;;  %4728 = vmatprep.mubr.msk.f32.mxu0 %vm1988_vm11, %v1957_v47  ;;  %1091 = vrot.lane.b32.xlu0 %v1584_v16, %s4854_s24  ;;  %v1398_v16 = vld [vmem:[#allocation2 + $0x168] sm:$0xff] }
 0x1a7   : > { %1282 = vrot.lane.b32.xlu1 %v1776_v18, %s4855_s29  ;;  %v1399_v18 = vld [vmem:[#allocation2 + $0x170] sm:$0xff] }
 0x1a8   : > { %v1453_v6 = vpop.permute.xlu0 %1452  ;;  %v1591_v17 = vld [vmem:[#allocation2 + $0x169] sm:$0xff] }
 0x1a9   : > { %v1455_v33 = vpop.permute.xlu1 %1454  ;;  %1541 = vst.msk [vmem:[#allocation3 + $0x40] sm:$0xff] %vm1532_vm8, %v1453_v6  ;;  %v1592_v6 = vld [vmem:[#allocation2 + $0x171] sm:$0xff] }
 0x1aa   : > { %1542 = vst.msk [vmem:[#allocation3 + $0x48] sm:$0xff] %vm1532_vm8, %v1455_v33  ;;  %1860 = vrot.lane.b32.xlu0 %v1777_v52, %s4858_s12  ;;  %v1784_v33 = vld [vmem:[#allocation2 + $0x16a] sm:$0xff] }
 0x1ab   : > { %1284 = vrot.lane.b32.xlu1 %v1777_v52, %s4855_s29 }
 0x1ac   : > { %v1646_v61 = vpop.permute.xlu0 %1645  ;;  %v1958_v48 = vld [vmem:[#allocation3 + $0x38] sm:$0xff] }
 0x1ad   : > { %v1070_v62 = vpop.permute.xlu1 %1069  ;;  %1734 = vst.msk [vmem:[#allocation3 + $0x40] sm:$0xff] %vm1725_vm9, %v1646_v61  ;;  %4729 = vmatmul.mubr.msk.f32.gmra.mrb[6].mxu0 %vm1988_vm11, %v1958_v48 }
 0x1ae   : > { %1156 = vst.msk [vmem:[#allocation3 + $0x50] sm:$0xff] %vm1145_vm6, %v1070_v62  ;;  %1476 = vrot.lane.b32.xlu0 %v1392_v54, %s4856_s8 }
 0x1af   : > { %1478 = vrot.lane.b32.xlu1 %v1393_v55, %s4856_s8 }
 0x1b0   : > { %v1648_v19 = vpop.permute.xlu0 %1647 }
 0x1b1   : > { %v1839_v37 = vpop.permute.xlu1 %1838  ;;  %1735 = vst.msk [vmem:[#allocation3 + $0x48] sm:$0xff] %vm1725_vm9, %v1648_v19 }
 0x1b2   : > { %1927 = vst.msk [vmem:[#allocation3 + $0x40] sm:$0xff] %vm1918_vm10, %v1839_v37  ;;  %1669 = vrot.lane.b32.xlu0 %v1585_v21, %s4857_s9 }
 0x1b3   : > { %1093 = vrot.lane.b32.xlu1 %v1585_v21, %s4854_s24  ;;  %v1785_v21 = vld [vmem:[#allocation2 + $0x172] sm:$0xff] }
 0x1b4   : > { %v1072_v40 = vpop.permute.xlu0 %1071 }
 0x1b5   : > { %v1263_v56 = vpop.permute.xlu1 %1262  ;;  %1157 = vst.msk [vmem:[#allocation3 + $0x58] sm:$0xff] %vm1145_vm6, %v1072_v40 }
 0x1b6   : > { %1349 = vst.msk [vmem:[#allocation3 + $0x50] sm:$0xff] %vm1338_vm7, %v1263_v56  ;;  %1671 = vrot.lane.b32.xlu0 %v1586_v53, %s4857_s9 }
 0x1b7   : > { %1862 = vrot.lane.b32.xlu1 %v1778_v20, %s4858_s12 }
 0x1b8   : > { %v1841_v9 = vpop.permute.xlu0 %1840 }
 0x1b9   : > { %v1265_v34 = vpop.permute.xlu1 %1264  ;;  %v1959_v42 = vld [vmem:[#allocation3 + $0x40] sm:$0xff]  ;;  %1928 = vst.msk [vmem:[#allocation3 + $0x48] sm:$0xff] %vm1918_vm10, %v1841_v9 }
 0x1ba   : > { %1350 = vst.msk [vmem:[#allocation3 + $0x58] sm:$0xff] %vm1338_vm7, %v1265_v34  ;;  %4731 = vmatprep.mubr.msk.f32.mxu0 %vm1988_vm11, %v1959_v42  ;;  %1095 = vrot.lane.b32.xlu0 %v1586_v53, %s4854_s24  ;;  %v1400_v53 = vld [vmem:[#allocation2 + $0x180] sm:$0xff] }
 0x1bb   : > { %1286 = vrot.lane.b32.xlu1 %v1778_v20, %s4855_s29  ;;  %v1401_v20 = vld [vmem:[#allocation2 + $0x188] sm:$0xff] }
 0x1bc   : > { %v1457_v0 = vpop.permute.xlu0 %1456  ;;  %v1593_v34 = vld [vmem:[#allocation2 + $0x181] sm:$0xff] }
 0x1bd   : > { %v1459_v63 = vpop.permute.xlu1 %1458  ;;  %1543 = vst.msk [vmem:[#allocation3 + $0x50] sm:$0xff] %vm1532_vm8, %v1457_v0  ;;  %v1594_v0 = vld [vmem:[#allocation2 + $0x189] sm:$0xff] }
 0x1be   : > { %1544 = vst.msk [vmem:[#allocation3 + $0x58] sm:$0xff] %vm1532_vm8, %v1459_v63  ;;  %1864 = vrot.lane.b32.xlu0 %v1779_v57, %s4858_s12  ;;  %v1786_v63 = vld [vmem:[#allocation2 + $0x182] sm:$0xff] }
 0x1bf   : > { %1288 = vrot.lane.b32.xlu1 %v1779_v57, %s4855_s29 }
 0x1c0   : > { %v1650_v59 = vpop.permute.xlu0 %1649  ;;  %v1960_v49 = vld [vmem:[#allocation3 + $0x48] sm:$0xff] }
 0x1c1   : > { %v1074_v24 = vpop.permute.xlu1 %1073  ;;  %1736 = vst.msk [vmem:[#allocation3 + $0x50] sm:$0xff] %vm1725_vm9, %v1650_v59  ;;  %4732 = vmatmul.mubr.msk.f32.gmra.mrb[8].mxu0 %vm1988_vm11, %v1960_v49 }
 0x1c2   : > { %1158 = vst.msk [vmem:[#allocation3 + $0x60] sm:$0xff] %vm1145_vm6, %v1074_v24  ;;  %1480 = vrot.lane.b32.xlu0 %v1394_v23, %s4856_s8 }
 0x1c3   : > { %1482 = vrot.lane.b32.xlu1 %v1395_v50, %s4856_s8 }
 0x1c4   : > { %v1652_v58 = vpop.permute.xlu0 %1651 }
 0x1c5   : > { %v1843_v60 = vpop.permute.xlu1 %1842  ;;  %1737 = vst.msk [vmem:[#allocation3 + $0x58] sm:$0xff] %vm1725_vm9, %v1652_v58 }
 0x1c6   : > { %1929 = vst.msk [vmem:[#allocation3 + $0x50] sm:$0xff] %vm1918_vm10, %v1843_v60  ;;  %1673 = vrot.lane.b32.xlu0 %v1587_v26, %s4857_s9 }
 0x1c7   : > { %1097 = vrot.lane.b32.xlu1 %v1587_v26, %s4854_s24  ;;  %v1787_v26 = vld [vmem:[#allocation2 + $0x18a] sm:$0xff] }
 0x1c8   : > { %v1076_v14 = vpop.permute.xlu0 %1075 }
 0x1c9   : > { %v1267_v1 = vpop.permute.xlu1 %1266  ;;  %1159 = vst.msk [vmem:[#allocation3 + $0x68] sm:$0xff] %vm1145_vm6, %v1076_v14 }
 0x1ca   : > { %1351 = vst.msk [vmem:[#allocation3 + $0x60] sm:$0xff] %vm1338_vm7, %v1267_v1  ;;  %1675 = vrot.lane.b32.xlu0 %v1588_v11, %s4857_s9 }
 0x1cb   : > { %1866 = vrot.lane.b32.xlu1 %v1780_v36, %s4858_s12 }
 0x1cc   : > { %v1845_v25 = vpop.permute.xlu0 %1844 }
 0x1cd   : > { %v1269_v27 = vpop.permute.xlu1 %1268  ;;  %v1961_v30 = vld [vmem:[#allocation3 + $0x50] sm:$0xff]  ;;  %1930 = vst.msk [vmem:[#allocation3 + $0x58] sm:$0xff] %vm1918_vm10, %v1845_v25 }
 0x1ce   : > { %1352 = vst.msk [vmem:[#allocation3 + $0x68] sm:$0xff] %vm1338_vm7, %v1269_v27  ;;  %4734 = vmatprep.mubr.msk.f32.mxu0 %vm1988_vm11, %v1961_v30  ;;  %1099 = vrot.lane.b32.xlu0 %v1588_v11, %s4854_s24  ;;  %v1402_v11 = vld [vmem:[#allocation2 + $0x198] sm:$0xff]  ;;  %v1596_v30 = vld [vmem:[#allocation2 + $0x1a1] sm:$0xff] }
 0x1cf   : > { %1290 = vrot.lane.b32.xlu1 %v1780_v36, %s4855_s29  ;;  %v1403_v36 = vld [vmem:[#allocation2 + $0x1a0] sm:$0xff] }
 0x1d0   : > { %v1461_v4 = vpop.permute.xlu0 %1460  ;;  %v1595_v27 = vld [vmem:[#allocation2 + $0x199] sm:$0xff] }
 0x1d1   : > { %v1463_v51 = vpop.permute.xlu1 %1462  ;;  %1545 = vst.msk [vmem:[#allocation3 + $0x60] sm:$0xff] %vm1532_vm8, %v1461_v4 }
 0x1d2   : > { %1546 = vst.msk [vmem:[#allocation3 + $0x68] sm:$0xff] %vm1532_vm8, %v1463_v51  ;;  %1868 = vrot.lane.b32.xlu0 %v1781_v3, %s4858_s12  ;;  %v1788_v51 = vld [vmem:[#allocation2 + $0x19a] sm:$0xff] }
 0x1d3   : > { %1292 = vrot.lane.b32.xlu1 %v1781_v3, %s4855_s29 }
 0x1d4   : > { %v1654_v32 = vpop.permute.xlu0 %1653  ;;  %v1962_v15 = vld [vmem:[#allocation3 + $0x58] sm:$0xff] }
 0x1d5   : > { %v1078_v7 = vpop.permute.xlu1 %1077  ;;  %1738 = vst.msk [vmem:[#allocation3 + $0x60] sm:$0xff] %vm1725_vm9, %v1654_v32  ;;  %4735 = vmatmul.mubr.msk.f32.gmra.mrb[10].mxu0 %vm1988_vm11, %v1962_v15 }
 0x1d6   : > { %1160 = vst.msk [vmem:[#allocation3 + $0x70] sm:$0xff] %vm1145_vm6, %v1078_v7  ;;  %1484 = vrot.lane.b32.xlu0 %v1396_v31, %s4856_s8  ;;  %v1789_v31 = vld [vmem:[#allocation2 + $0x1a2] sm:$0xff] }
 0x1d7   : > { %1486 = vrot.lane.b32.xlu1 %v1397_v5, %s4856_s8 }
 0x1d8   : > { %v1656_v8 = vpop.permute.xlu0 %1655 }
 0x1d9   : > { %v1847_v12 = vpop.permute.xlu1 %1846  ;;  %1739 = vst.msk [vmem:[#allocation3 + $0x68] sm:$0xff] %vm1725_vm9, %v1656_v8 }
 0x1da   : > { %1931 = vst.msk [vmem:[#allocation3 + $0x60] sm:$0xff] %vm1918_vm10, %v1847_v12  ;;  %1677 = vrot.lane.b32.xlu0 %v1589_v39, %s4857_s9 }
 0x1db   : > { %1101 = vrot.lane.b32.xlu1 %v1589_v39, %s4854_s24 }
 0x1dc   : > { %v1080_v35 = vpop.permute.xlu0 %1079 }
 0x1dd   : > { %v1271_v22 = vpop.permute.xlu1 %1270  ;;  %1161 = vst.msk [vmem:[#allocation3 + $0x78] sm:$0xff] %vm1145_vm6, %v1080_v35 }
 0x1de   : > { %1353 = vst.msk [vmem:[#allocation3 + $0x70] sm:$0xff] %vm1338_vm7, %v1271_v22  ;;  %1679 = vrot.lane.b32.xlu0 %v1590_v13, %s4857_s9 }
 0x1df   : > { %1870 = vrot.lane.b32.xlu1 %v1782_v10, %s4858_s12 }
 0x1e0   : > { %v1849_v2 = vpop.permute.xlu0 %1848 }
 0x1e1   : > { %v1273_v38 = vpop.permute.xlu1 %1272  ;;  %v1963_v28 = vld [vmem:[#allocation3 + $0x60] sm:$0xff]  ;;  %1932 = vst.msk [vmem:[#allocation3 + $0x68] sm:$0xff] %vm1918_vm10, %v1849_v2 }
 0x1e2   : > { %1354 = vst.msk [vmem:[#allocation3 + $0x78] sm:$0xff] %vm1338_vm7, %v1273_v38  ;;  %4737 = vmatprep.mubr.msk.f32.mxu0 %vm1988_vm11, %v1963_v28  ;;  %1103 = vrot.lane.b32.xlu0 %v1590_v13, %s4854_s24 }
 0x1e3   : > { %1294 = vrot.lane.b32.xlu1 %v1782_v10, %s4855_s29 }
 0x1e4   : > { %v1465_v41 = vpop.permute.xlu0 %1464 }
 0x1e5   : > { %v1467_v43 = vpop.permute.xlu1 %1466  ;;  %1547 = vst.msk [vmem:[#allocation3 + $0x70] sm:$0xff] %vm1532_vm8, %v1465_v41 }
 0x1e6   : > { %1548 = vst.msk [vmem:[#allocation3 + $0x78] sm:$0xff] %vm1532_vm8, %v1467_v43  ;;  %1872 = vrot.lane.b32.xlu0 %v1783_v29, %s4858_s12 }
 0x1e7   : > { %1296 = vrot.lane.b32.xlu1 %v1783_v29, %s4855_s29 }
 0x1e8   : > { %v1658_v45 = vpop.permute.xlu0 %1657  ;;  %v1964_v46 = vld [vmem:[#allocation3 + $0x68] sm:$0xff] }
 0x1e9   : > { %v1082_v44 = vpop.permute.xlu1 %1081  ;;  %1740 = vst.msk [vmem:[#allocation3 + $0x70] sm:$0xff] %vm1725_vm9, %v1658_v45  ;;  %4738 = vmatmul.mubr.msk.f32.gmra.mrb[12].mxu0 %vm1988_vm11, %v1964_v46 }
 0x1ea   : > { %1162 = vst.msk [vmem:[#allocation3 + $0x80] sm:$0xff] %vm1145_vm6, %v1082_v44  ;;  %1488 = vrot.lane.b32.xlu0 %v1398_v16, %s4856_s8 }
 0x1eb   : > { %1490 = vrot.lane.b32.xlu1 %v1399_v18, %s4856_s8 }
 0x1ec   : > { %v1660_v47 = vpop.permute.xlu0 %1659 }
 0x1ed   : > { %v1851_v52 = vpop.permute.xlu1 %1850  ;;  %1741 = vst.msk [vmem:[#allocation3 + $0x78] sm:$0xff] %vm1725_vm9, %v1660_v47 }
 0x1ee   : > { %1933 = vst.msk [vmem:[#allocation3 + $0x70] sm:$0xff] %vm1918_vm10, %v1851_v52  ;;  %1681 = vrot.lane.b32.xlu0 %v1591_v17, %s4857_s9 }
 0x1ef   : > { %1105 = vrot.lane.b32.xlu1 %v1591_v17, %s4854_s24 }
 0x1f0   : > { %v1084_v54 = vpop.permute.xlu0 %1083 }
 0x1f1   : > { %v1275_v55 = vpop.permute.xlu1 %1274  ;;  %1163 = vst.msk [vmem:[#allocation3 + $0x88] sm:$0xff] %vm1145_vm6, %v1084_v54 }
 0x1f2   : > { %1355 = vst.msk [vmem:[#allocation3 + $0x80] sm:$0xff] %vm1338_vm7, %v1275_v55  ;;  %1683 = vrot.lane.b32.xlu0 %v1592_v6, %s4857_s9 }
 0x1f3   : > { %1874 = vrot.lane.b32.xlu1 %v1784_v33, %s4858_s12 }
 0x1f4   : > { %v1853_v61 = vpop.permute.xlu0 %1852 }
 0x1f5   : > { %v1277_v62 = vpop.permute.xlu1 %1276  ;;  %v1965_v48 = vld [vmem:[#allocation3 + $0x70] sm:$0xff]  ;;  %1934 = vst.msk [vmem:[#allocation3 + $0x78] sm:$0xff] %vm1918_vm10, %v1853_v61 }
 0x1f6   : > { %1356 = vst.msk [vmem:[#allocation3 + $0x88] sm:$0xff] %vm1338_vm7, %v1277_v62  ;;  %4740 = vmatprep.mubr.msk.f32.mxu0 %vm1988_vm11, %v1965_v48  ;;  %1107 = vrot.lane.b32.xlu0 %v1592_v6, %s4854_s24 }
 0x1f7   : > { %1298 = vrot.lane.b32.xlu1 %v1784_v33, %s4855_s29 }
 0x1f8   : > { %v1469_v19 = vpop.permute.xlu0 %1468 }
 0x1f9   : > { %v1471_v37 = vpop.permute.xlu1 %1470  ;;  %1549 = vst.msk [vmem:[#allocation3 + $0x80] sm:$0xff] %vm1532_vm8, %v1469_v19 }
 0x1fa   : > { %1550 = vst.msk [vmem:[#allocation3 + $0x88] sm:$0xff] %vm1532_vm8, %v1471_v37  ;;  %1876 = vrot.lane.b32.xlu0 %v1785_v21, %s4858_s12 }
 0x1fb   : > { %1300 = vrot.lane.b32.xlu1 %v1785_v21, %s4855_s29 }
 0x1fc   : > { %v1662_v40 = vpop.permute.xlu0 %1661  ;;  %v1966_v9 = vld [vmem:[#allocation3 + $0x78] sm:$0xff] }
 0x1fd   : > { %v1086_v56 = vpop.permute.xlu1 %1085  ;;  %1742 = vst.msk [vmem:[#allocation3 + $0x80] sm:$0xff] %vm1725_vm9, %v1662_v40  ;;  %4741 = vmatmul.mubr.msk.f32.gmra.mrb[14].mxu0 %vm1988_vm11, %v1966_v9 }
 0x1fe   : > { %1164 = vst.msk [vmem:[#allocation3 + $0x90] sm:$0xff] %vm1145_vm6, %v1086_v56  ;;  %1492 = vrot.lane.b32.xlu0 %v1400_v53, %s4856_s8 }
 0x1ff   : > { %1494 = vrot.lane.b32.xlu1 %v1401_v20, %s4856_s8 }
 0x200   : > { %v1664_v42 = vpop.permute.xlu0 %1663 }
 0x201   : > { %v1855_v57 = vpop.permute.xlu1 %1854  ;;  %1743 = vst.msk [vmem:[#allocation3 + $0x88] sm:$0xff] %vm1725_vm9, %v1664_v42 }
 0x202   : > { %1935 = vst.msk [vmem:[#allocation3 + $0x80] sm:$0xff] %vm1918_vm10, %v1855_v57  ;;  %1685 = vrot.lane.b32.xlu0 %v1593_v34, %s4857_s9 }
 0x203   : > { %1109 = vrot.lane.b32.xlu1 %v1593_v34, %s4854_s24 }
 0x204   : > { %v1088_v23 = vpop.permute.xlu0 %1087 }
 0x205   : > { %v1279_v50 = vpop.permute.xlu1 %1278  ;;  %1165 = vst.msk [vmem:[#allocation3 + $0x98] sm:$0xff] %vm1145_vm6, %v1088_v23 }
 0x206   : > { %1357 = vst.msk [vmem:[#allocation3 + $0x90] sm:$0xff] %vm1338_vm7, %v1279_v50  ;;  %1687 = vrot.lane.b32.xlu0 %v1594_v0, %s4857_s9 }
 0x207   : > { %1878 = vrot.lane.b32.xlu1 %v1786_v63, %s4858_s12 }
 0x208   : > { %v1857_v59 = vpop.permute.xlu0 %1856 }
 0x209   : > { %v1281_v24 = vpop.permute.xlu1 %1280  ;;  %v1967_v49 = vld [vmem:[#allocation3 + $0x80] sm:$0xff]  ;;  %1936 = vst.msk [vmem:[#allocation3 + $0x88] sm:$0xff] %vm1918_vm10, %v1857_v59 }
 0x20a   : > { %1358 = vst.msk [vmem:[#allocation3 + $0x98] sm:$0xff] %vm1338_vm7, %v1281_v24  ;;  %4743 = vmatprep.mubr.msk.f32.mxu0 %vm1988_vm11, %v1967_v49  ;;  %1111 = vrot.lane.b32.xlu0 %v1594_v0, %s4854_s24 }
 0x20b   : > { %1302 = vrot.lane.b32.xlu1 %v1786_v63, %s4855_s29 }
 0x20c   : > { %v1473_v58 = vpop.permute.xlu0 %1472 }
 0x20d   : > { %v1475_v60 = vpop.permute.xlu1 %1474  ;;  %1551 = vst.msk [vmem:[#allocation3 + $0x90] sm:$0xff] %vm1532_vm8, %v1473_v58 }
 0x20e   : > { %1552 = vst.msk [vmem:[#allocation3 + $0x98] sm:$0xff] %vm1532_vm8, %v1475_v60  ;;  %1880 = vrot.lane.b32.xlu0 %v1787_v26, %s4858_s12 }
 0x20f   : > { %1304 = vrot.lane.b32.xlu1 %v1787_v26, %s4855_s29 }
 0x210   : > { %v1666_v14 = vpop.permute.xlu0 %1665  ;;  %v1968_v25 = vld [vmem:[#allocation3 + $0x88] sm:$0xff] }
 0x211   : > { %v1090_v1 = vpop.permute.xlu1 %1089  ;;  %1744 = vst.msk [vmem:[#allocation3 + $0x90] sm:$0xff] %vm1725_vm9, %v1666_v14  ;;  %4744 = vmatmul.mubr.msk.f32.gmra.mrb[16].mxu0 %vm1988_vm11, %v1968_v25 }
 0x212   : > { %1166 = vst.msk [vmem:[#allocation3 + $0xa0] sm:$0xff] %vm1145_vm6, %v1090_v1  ;;  %1496 = vrot.lane.b32.xlu0 %v1402_v11, %s4856_s8 }
 0x213   : > { %1498 = vrot.lane.b32.xlu1 %v1403_v36, %s4856_s8 }
 0x214   : > { %v1668_v3 = vpop.permute.xlu0 %1667 }
 0x215   : > { %v1859_v4 = vpop.permute.xlu1 %1858  ;;  %1745 = vst.msk [vmem:[#allocation3 + $0x98] sm:$0xff] %vm1725_vm9, %v1668_v3 }
 0x216   : > { %1937 = vst.msk [vmem:[#allocation3 + $0x90] sm:$0xff] %vm1918_vm10, %v1859_v4  ;;  %1689 = vrot.lane.b32.xlu0 %v1595_v27, %s4857_s9 }
 0x217   : > { %1691 = vrot.lane.b32.xlu1 %v1596_v30, %s4857_s9 }
 0x218   : > { %v1092_v5 = vpop.permute.xlu0 %1091 }
 0x219   : > { %v1283_v32 = vpop.permute.xlu1 %1282  ;;  %1167 = vst.msk [vmem:[#allocation3 + $0xa8] sm:$0xff] %vm1145_vm6, %v1092_v5 }
 0x21a   : > { %1359 = vst.msk [vmem:[#allocation3 + $0xa0] sm:$0xff] %vm1338_vm7, %v1283_v32  ;;  %1882 = vrot.lane.b32.xlu0 %v1788_v51, %s4858_s12 }
 0x21b   : > { %1884 = vrot.lane.b32.xlu1 %v1789_v31, %s4858_s12 }
 0x21c   : > { %v1861_v7 = vpop.permute.xlu0 %1860 }
 0x21d   : > { %v1285_v15 = vpop.permute.xlu1 %1284  ;;  %v1969_v39 = vld [vmem:[#allocation3 + $0x90] sm:$0xff]  ;;  %1938 = vst.msk [vmem:[#allocation3 + $0x98] sm:$0xff] %vm1918_vm10, %v1861_v7 }
 0x21e   : > { %1360 = vst.msk [vmem:[#allocation3 + $0xa8] sm:$0xff] %vm1338_vm7, %v1285_v15  ;;  %4746 = vmatprep.mubr.msk.f32.mxu0 %vm1988_vm11, %v1969_v39 }
 0x220   : > { %v1477_v8 = vpop.permute.xlu0 %1476 }
 0x221   : > { %v1479_v12 = vpop.permute.xlu1 %1478  ;;  %1553 = vst.msk [vmem:[#allocation3 + $0xa0] sm:$0xff] %vm1532_vm8, %v1477_v8 }
 0x222   : > { %1554 = vst.msk [vmem:[#allocation3 + $0xa8] sm:$0xff] %vm1532_vm8, %v1479_v12 }
 0x224   : > { %v1670_v13 = vpop.permute.xlu0 %1669  ;;  %v1970_v35 = vld [vmem:[#allocation3 + $0x98] sm:$0xff] }
 0x225   : > { %v1094_v10 = vpop.permute.xlu1 %1093  ;;  %1746 = vst.msk [vmem:[#allocation3 + $0xa0] sm:$0xff] %vm1725_vm9, %v1670_v13  ;;  %4747 = vmatmul.mubr.msk.f32.gmra.mrb[18].mxu0 %vm1988_vm11, %v1970_v35 }
 0x226   : > { %1168 = vst.msk [vmem:[#allocation3 + $0xb0] sm:$0xff] %vm1145_vm6, %v1094_v10 }
 0x228   : > { %v1672_v22 = vpop.permute.xlu0 %1671 }
 0x229   : > { %v1863_v2 = vpop.permute.xlu1 %1862  ;;  %1747 = vst.msk [vmem:[#allocation3 + $0xa8] sm:$0xff] %vm1725_vm9, %v1672_v22 }
 0x22a   : > { %1939 = vst.msk [vmem:[#allocation3 + $0xa0] sm:$0xff] %vm1918_vm10, %v1863_v2 }
 0x22c   : > { %v1096_v38 = vpop.permute.xlu0 %1095 }
 0x22d   : > { %v1287_v28 = vpop.permute.xlu1 %1286  ;;  %1169 = vst.msk [vmem:[#allocation3 + $0xb8] sm:$0xff] %vm1145_vm6, %v1096_v38 }
 0x22e   : > { %1361 = vst.msk [vmem:[#allocation3 + $0xb0] sm:$0xff] %vm1338_vm7, %v1287_v28 }
 0x230   : > { %v1865_v29 = vpop.permute.xlu0 %1864 }
 0x231   : > { %v1289_v41 = vpop.permute.xlu1 %1288  ;;  %v1971_v43 = vld [vmem:[#allocation3 + $0xa0] sm:$0xff]  ;;  %1940 = vst.msk [vmem:[#allocation3 + $0xa8] sm:$0xff] %vm1918_vm10, %v1865_v29 }
 0x232   : > { %1362 = vst.msk [vmem:[#allocation3 + $0xb8] sm:$0xff] %vm1338_vm7, %v1289_v41  ;;  %4749 = vmatprep.mubr.msk.f32.mxu0 %vm1988_vm11, %v1971_v43 }
 0x234   : > { %v1481_v16 = vpop.permute.xlu0 %1480 }
 0x235   : > { %v1483_v18 = vpop.permute.xlu1 %1482  ;;  %1555 = vst.msk [vmem:[#allocation3 + $0xb0] sm:$0xff] %vm1532_vm8, %v1481_v16 }
 0x236   : > { %1556 = vst.msk [vmem:[#allocation3 + $0xb8] sm:$0xff] %vm1532_vm8, %v1483_v18 }
 0x238   : > { %v1674_v45 = vpop.permute.xlu0 %1673  ;;  %v1972_v46 = vld [vmem:[#allocation3 + $0xa8] sm:$0xff] }
 0x239   : > { %v1098_v44 = vpop.permute.xlu1 %1097  ;;  %1748 = vst.msk [vmem:[#allocation3 + $0xb0] sm:$0xff] %vm1725_vm9, %v1674_v45  ;;  %4750 = vmatmul.mubr.msk.f32.gmra.mrb[20].mxu0 %vm1988_vm11, %v1972_v46 }
 0x23a   : > { %1170 = vst.msk [vmem:[#allocation3 + $0xc0] sm:$0xff] %vm1145_vm6, %v1098_v44 }
 0x23c   : > { %v1676_v17 = vpop.permute.xlu0 %1675 }
 0x23d   : > { %v1867_v47 = vpop.permute.xlu1 %1866  ;;  %1749 = vst.msk [vmem:[#allocation3 + $0xb8] sm:$0xff] %vm1725_vm9, %v1676_v17 }
 0x23e   : > { %1941 = vst.msk [vmem:[#allocation3 + $0xb0] sm:$0xff] %vm1918_vm10, %v1867_v47 }
 0x240   : > { %v1100_v52 = vpop.permute.xlu0 %1099 }
 0x241   : > { %v1291_v6 = vpop.permute.xlu1 %1290  ;;  %1171 = vst.msk [vmem:[#allocation3 + $0xc8] sm:$0xff] %vm1145_vm6, %v1100_v52 }
 0x242   : > { %1363 = vst.msk [vmem:[#allocation3 + $0xc0] sm:$0xff] %vm1338_vm7, %v1291_v6 }
 0x244   : > { %v5756_v33 = vpop.f32.mrb[0].mxu0  ;;  %v1869_v54 = vpop.permute.xlu0 %1868 }
 0x245   : > { %v1973_v55 = vld [vmem:[#allocation3 + $0xb0] sm:$0xff]  ;;  %v2315_v61 = vsel %vm231_vm0, %v5756_v33, 0.0  ;;  %1942 = vst.msk [vmem:[#allocation3 + $0xb8] sm:$0xff] %vm1918_vm10, %v1869_v54  ;;  %v1293_v62 = vpop.permute.xlu1 %1292  ;;  %v5761_v48 = vpop.f32.mrb[1].mxu0 }
 0x246   : > { %4752 = vmatprep.mubr.msk.f32.mxu0 %vm1988_vm11, %v1973_v55  ;;  %1364 = vst.msk [vmem:[#allocation3 + $0xc8] sm:$0xff] %vm1338_vm7, %v1293_v62  ;;  %v2314_v21 = vsel %vm231_vm0, %v5761_v48, 0.0 }
 0x247   : > { %v2316_v19 = vadd.f32 %v2315_v61, %v2314_v21 }
 0x248   : > { %v1485_v37 = vpop.permute.xlu0 %1484 }
 0x249   : > { %1557 = vst.msk [vmem:[#allocation3 + $0xc0] sm:$0xff] %vm1532_vm8, %v1485_v37  ;;  %v1487_v53 = vpop.permute.xlu1 %1486 }
 0x24a   : > { %1558 = vst.msk [vmem:[#allocation3 + $0xc8] sm:$0xff] %vm1532_vm8, %v1487_v53 }
 0x24c   : > { %v1678_v20 = vpop.permute.xlu0 %1677  ;;  %v1974_v40 = vld [vmem:[#allocation3 + $0xb8] sm:$0xff] }
 0x24d   : > { %1750 = vst.msk [vmem:[#allocation3 + $0xc0] sm:$0xff] %vm1725_vm9, %v1678_v20  ;;  %v1102_v56 = vpop.permute.xlu1 %1101  ;;  %4753 = vmatmul.mubr.msk.f32.gmra.mrb[22].mxu0 %vm1988_vm11, %v1974_v40 }
 0x24e   : > { %1172 = vst.msk [vmem:[#allocation3 + $0xd0] sm:$0xff] %vm1145_vm6, %v1102_v56 }
 0x250   : > { %v1680_v9 = vpop.permute.xlu0 %1679 }
 0x251   : > { %1751 = vst.msk [vmem:[#allocation3 + $0xc8] sm:$0xff] %vm1725_vm9, %v1680_v9  ;;  %v1871_v34 = vpop.permute.xlu1 %1870 }
 0x252   : > { %1943 = vst.msk [vmem:[#allocation3 + $0xc0] sm:$0xff] %vm1918_vm10, %v1871_v34 }
 0x254   : > { %v1104_v42 = vpop.permute.xlu0 %1103 }
 0x255   : > { %1173 = vst.msk [vmem:[#allocation3 + $0xd8] sm:$0xff] %vm1145_vm6, %v1104_v42  ;;  %v1295_v57 = vpop.permute.xlu1 %1294 }
 0x256   : > { %1365 = vst.msk [vmem:[#allocation3 + $0xd0] sm:$0xff] %vm1338_vm7, %v1295_v57 }
 0x258   : > { %v1873_v0 = vpop.permute.xlu0 %1872  ;;  %v5776_v63 = vpop.f32.mrb[2].mxu0 }
 0x259   : > { %1944 = vst.msk [vmem:[#allocation3 + $0xc8] sm:$0xff] %vm1918_vm10, %v1873_v0  ;;  %v1297_v23 = vpop.permute.xlu1 %1296  ;;  %v5779_v50 = vpop.f32.mrb[3].mxu0  ;;  %v1975_v59 = vld [vmem:[#allocation3 + $0xc0] sm:$0xff]  ;;  %v2319_v26 = vsel %vm231_vm0, %v5776_v63, 0.0 }
 0x25a   : > { %1366 = vst.msk [vmem:[#allocation3 + $0xd8] sm:$0xff] %vm1338_vm7, %v1297_v23  ;;  %v2317_v24 = vsel %vm231_vm0, %v5779_v50, 0.0  ;;  %4755 = vmatprep.mubr.msk.f32.mxu0 %vm1988_vm11, %v1975_v59 }
 0x25b   : > { %v2318_v49 = vadd.f32 %v2317_v24, %v2316_v19 }
 0x25c   : > { %v1489_v58 = vpop.permute.xlu0 %1488 }
 0x25d   : > { %1559 = vst.msk [vmem:[#allocation3 + $0xd0] sm:$0xff] %vm1532_vm8, %v1489_v58  ;;  %v1491_v60 = vpop.permute.xlu1 %1490  ;;  %v2320_v11 = vadd.f32 %v2319_v26, %v2318_v49 }
 0x25e   : > { %1560 = vst.msk [vmem:[#allocation3 + $0xd8] sm:$0xff] %vm1532_vm8, %v1491_v60 }
 0x260   : > { %v1682_v36 = vpop.permute.xlu0 %1681  ;;  %v1976_v14 = vld [vmem:[#allocation3 + $0xc8] sm:$0xff] }
 0x261   : > { %1752 = vst.msk [vmem:[#allocation3 + $0xd0] sm:$0xff] %vm1725_vm9, %v1682_v36  ;;  %v1106_v1 = vpop.permute.xlu1 %1105  ;;  %4756 = vmatmul.mubr.msk.f32.gmra.mrb[24].mxu0 %vm1988_vm11, %v1976_v14 }
 0x262   : > { %1174 = vst.msk [vmem:[#allocation3 + $0xe0] sm:$0xff] %vm1145_vm6, %v1106_v1 }
 0x264   : > { %v1684_v25 = vpop.permute.xlu0 %1683 }
 0x265   : > { %1753 = vst.msk [vmem:[#allocation3 + $0xd8] sm:$0xff] %vm1725_vm9, %v1684_v25  ;;  %v1875_v27 = vpop.permute.xlu1 %1874 }
 0x266   : > { %1945 = vst.msk [vmem:[#allocation3 + $0xd0] sm:$0xff] %vm1918_vm10, %v1875_v27 }
 0x268   : > { %v1108_v30 = vpop.permute.xlu0 %1107 }
 0x269   : > { %1175 = vst.msk [vmem:[#allocation3 + $0xe8] sm:$0xff] %vm1145_vm6, %v1108_v30  ;;  %v1299_v3 = vpop.permute.xlu1 %1298 }
 0x26a   : > { %1367 = vst.msk [vmem:[#allocation3 + $0xe0] sm:$0xff] %vm1338_vm7, %v1299_v3 }
 0x26c   : > { %v1877_v4 = vpop.permute.xlu0 %1876  ;;  %v5796_v51 = vpop.f32.mrb[4].mxu0 }
 0x26d   : > { %1946 = vst.msk [vmem:[#allocation3 + $0xd8] sm:$0xff] %vm1918_vm10, %v1877_v4  ;;  %v1301_v31 = vpop.permute.xlu1 %1300  ;;  %v5799_v5 = vpop.f32.mrb[5].mxu0  ;;  %v1977_v32 = vld [vmem:[#allocation3 + $0xd0] sm:$0xff]  ;;  %v2323_v39 = vsel %vm231_vm0, %v5796_v51, 0.0 }
 0x26e   : > { %1368 = vst.msk [vmem:[#allocation3 + $0xe8] sm:$0xff] %vm1338_vm7, %v1301_v31  ;;  %v2321_v7 = vsel %vm231_vm0, %v5799_v5, 0.0  ;;  %4758 = vmatprep.mubr.msk.f32.mxu0 %vm1988_vm11, %v1977_v32 }
 0x26f   : > { %v2322_v15 = vadd.f32 %v2321_v7, %v2320_v11 }
 0x270   : > { %v1493_v8 = vpop.permute.xlu0 %1492 }
 0x271   : > { %1561 = vst.msk [vmem:[#allocation3 + $0xe0] sm:$0xff] %vm1532_vm8, %v1493_v8  ;;  %v1495_v12 = vpop.permute.xlu1 %1494  ;;  %v2324_v13 = vadd.f32 %v2323_v39, %v2322_v15 }
 0x272   : > { %1562 = vst.msk [vmem:[#allocation3 + $0xe8] sm:$0xff] %vm1532_vm8, %v1495_v12 }
 0x274   : > { %v1686_v10 = vpop.permute.xlu0 %1685  ;;  %v1978_v35 = vld [vmem:[#allocation3 + $0xd8] sm:$0xff] }
 0x275   : > { %1754 = vst.msk [vmem:[#allocation3 + $0xe0] sm:$0xff] %vm1725_vm9, %v1686_v10  ;;  %v1110_v22 = vpop.permute.xlu1 %1109  ;;  %4759 = vmatmul.mubr.msk.f32.gmra.mrb[26].mxu0 %vm1988_vm11, %v1978_v35 }
 0x276   : > { %1176 = vst.msk [vmem:[#allocation3 + $0xf0] sm:$0xff] %vm1145_vm6, %v1110_v22 }
 0x278   : > { %v1688_v2 = vpop.permute.xlu0 %1687 }
 0x279   : > { %1755 = vst.msk [vmem:[#allocation3 + $0xe8] sm:$0xff] %vm1725_vm9, %v1688_v2  ;;  %v1879_v38 = vpop.permute.xlu1 %1878 }
 0x27a   : > { %1947 = vst.msk [vmem:[#allocation3 + $0xe0] sm:$0xff] %vm1918_vm10, %v1879_v38 }
 0x27c   : > { %v1112_v28 = vpop.permute.xlu0 %1111 }
 0x27d   : > { %1177 = vst.msk [vmem:[#allocation3 + $0xf8] sm:$0xff] %vm1145_vm6, %v1112_v28  ;;  %v1303_v29 = vpop.permute.xlu1 %1302 }
 0x27e   : > { %1369 = vst.msk [vmem:[#allocation3 + $0xf0] sm:$0xff] %vm1338_vm7, %v1303_v29 }
 0x280   : > { %v1881_v41 = vpop.permute.xlu0 %1880  ;;  %v5816_v43 = vpop.f32.mrb[6].mxu0 }
 0x281   : > { %1948 = vst.msk [vmem:[#allocation3 + $0xe8] sm:$0xff] %vm1918_vm10, %v1881_v41  ;;  %v1305_v16 = vpop.permute.xlu1 %1304  ;;  %v5819_v18 = vpop.f32.mrb[7].mxu0  ;;  %v1979_v45 = vld [vmem:[#allocation3 + $0xe0] sm:$0xff]  ;;  %v2327_v17 = vsel %vm231_vm0, %v5816_v43, 0.0 }
 0x282   : > { %1370 = vst.msk [vmem:[#allocation3 + $0xf8] sm:$0xff] %vm1338_vm7, %v1305_v16  ;;  %v2325_v44 = vsel %vm231_vm0, %v5819_v18, 0.0  ;;  %4761 = vmatprep.mubr.msk.f32.mxu0 %vm1988_vm11, %v1979_v45 }
 0x283   : > { %v2326_v46 = vadd.f32 %v2325_v44, %v2324_v13 }
 0x284   : > { %v1497_v47 = vpop.permute.xlu0 %1496 }
 0x285   : > { %1563 = vst.msk [vmem:[#allocation3 + $0xf0] sm:$0xff] %vm1532_vm8, %v1497_v47  ;;  %v1499_v52 = vpop.permute.xlu1 %1498  ;;  %v2328_v6 = vadd.f32 %v2327_v17, %v2326_v46 }
 0x286   : > { %1564 = vst.msk [vmem:[#allocation3 + $0xf8] sm:$0xff] %vm1532_vm8, %v1499_v52 }
 0x288   : > { %v1690_v54 = vpop.permute.xlu0 %1689  ;;  %v1980_v55 = vld [vmem:[#allocation3 + $0xe8] sm:$0xff] }
 0x289   : > { %1756 = vst.msk [vmem:[#allocation3 + $0xf0] sm:$0xff] %vm1725_vm9, %v1690_v54  ;;  %v1692_v61 = vpop.permute.xlu1 %1691  ;;  %4762 = vmatmul.mubr.msk.f32.gmra.mrb[28].mxu0 %vm1988_vm11, %v1980_v55 }
 0x28a   : > { %1757 = vst.msk [vmem:[#allocation3 + $0xf8] sm:$0xff] %vm1725_vm9, %v1692_v61 }
 0x28c   : > { %v1883_v62 = vpop.permute.xlu0 %1882 }
 0x28d   : > { %1949 = vst.msk [vmem:[#allocation3 + $0xf0] sm:$0xff] %vm1918_vm10, %v1883_v62  ;;  %v1885_v21 = vpop.permute.xlu1 %1884 }
 0x28e   : > { %1950 = vst.msk [vmem:[#allocation3 + $0xf8] sm:$0xff] %vm1918_vm10, %v1885_v21 }
 0x294   : > { %v5834_v19 = vpop.f32.mrb[8].mxu0  ;;  %v1981_v37 = vld [vmem:[#allocation3 + $0xf0] sm:$0xff] }
 0x295   : > { %v5836_v53 = vpop.f32.mrb[9].mxu0  ;;  %4764 = vmatprep.mubr.msk.f32.mxu0 %vm1988_vm11, %v1981_v37  ;;  %v1982_v20 = vld [vmem:[#allocation3 + $0xf8] sm:$0xff]  ;;  %v2331_v9 = vsel %vm231_vm0, %v5834_v19, 0.0 }
 0x296   : > { %v2329_v40 = vsel %vm231_vm0, %v5836_v53, 0.0  ;;  %4765 = vmatmul.mubr.msk.f32.gmra.mrb[30].mxu0 %vm1988_vm11, %v1982_v20 }
 0x297   : > { %v2330_v56 = vadd.f32 %v2329_v40, %v2328_v6 }
 0x299   : > { %v2332_v34 = vadd.f32 %v2331_v9, %v2330_v56 }
 0x2a8   : > { %v5844_v42 = vpop.f32.mrb[10].mxu0 }
 0x2a9   : > { %v5846_v57 = vpop.f32.mrb[11].mxu0  ;;  %v2335_v59 = vsel %vm231_vm0, %v5844_v42, 0.0 }
 0x2aa   : > { %v2333_v0 = vsel %vm231_vm0, %v5846_v57, 0.0 }
 0x2ab   : > { %v2334_v23 = vadd.f32 %v2333_v0, %v2332_v34 }
 0x2ad   : > { %v2336_v24 = vadd.f32 %v2335_v59, %v2334_v23 }
 0x2bc   : > { %v5852_v49 = vpop.f32.mrb[12].mxu0 }
 0x2bd   : > { %v5854_v26 = vpop.f32.mrb[13].mxu0  ;;  %v2339_v11 = vsel %vm231_vm0, %v5852_v49, 0.0 }
 0x2be   : > { %v2337_v58 = vsel %vm231_vm0, %v5854_v26, 0.0 }
 0x2bf   : > { %v2338_v60 = vadd.f32 %v2337_v58, %v2336_v24 }
 0x2c1   : > { %v2340_v36 = vadd.f32 %v2339_v11, %v2338_v60 }
 0x2d0   : > { %v5860_v14 = vpop.f32.mrb[14].mxu0 }
 0x2d1   : > { %v5862_v1 = vpop.f32.mrb[15].mxu0  ;;  %v2343_v30 = vsel %vm231_vm0, %v5860_v14, 0.0 }
 0x2d2   : > { %v2341_v25 = vsel %vm231_vm0, %v5862_v1, 0.0 }
 0x2d3   : > { %v2342_v27 = vadd.f32 %v2341_v25, %v2340_v36 }
 0x2d5   : > { %v2344_v3 = vadd.f32 %v2343_v30, %v2342_v27 }
 0x2e4   : > { %v5868_v4 = vpop.f32.mrb[16].mxu0 }
 0x2e5   : > { %v5870_v31 = vpop.f32.mrb[17].mxu0  ;;  %v2347_v15 = vsel %vm231_vm0, %v5868_v4, 0.0 }
 0x2e6   : > { %v2345_v32 = vsel %vm231_vm0, %v5870_v31, 0.0 }
 0x2e7   : > { %v2346_v7 = vadd.f32 %v2345_v32, %v2344_v3 }
 0x2e9   : > { %v2348_v39 = vadd.f32 %v2347_v15, %v2346_v7 }
 0x2f8   : > { %v5876_v8 = vpop.f32.mrb[18].mxu0 }
 0x2f9   : > { %v5878_v12 = vpop.f32.mrb[19].mxu0  ;;  %v2351_v35 = vsel %vm231_vm0, %v5876_v8, 0.0 }
 0x2fa   : > { %v2349_v13 = vsel %vm231_vm0, %v5878_v12, 0.0 }
 0x2fb   : > { %v2350_v10 = vadd.f32 %v2349_v13, %v2348_v39 }
 0x2fd   : > { %v2352_v22 = vadd.f32 %v2351_v35, %v2350_v10 }
 0x30c   : > { %v5884_v2 = vpop.f32.mrb[20].mxu0 }
 0x30d   : > { %v2255_v38 = vpop.f32.mrb[21].mxu0  ;;  %v2355_v41 = vsel %vm231_vm0, %v5884_v2, 0.0 }
 0x30e   : > { %v2353_v28 = vsel %vm231_vm0, %v2255_v38, 0.0 }
 0x30f   : > { %v2354_v29 = vadd.f32 %v2353_v28, %v2352_v22 }
 0x311   : > { %v2356_v16 = vadd.f32 %v2355_v41, %v2354_v29 }
 0x320   : > { %v4754_v45 = vpop.f32.mrb[22].mxu0 }
 0x321   : > { %v2265_v44 = vpop.f32.mrb[23].mxu0  ;;  %v2359_v47 = vsel %vm231_vm0, %v4754_v45, 0.0 }
 0x322   : > { %v2357_v46 = vsel %vm231_vm0, %v2265_v44, 0.0 }
 0x323   : > { %v2358_v17 = vadd.f32 %v2357_v46, %v2356_v16 }
 0x325   : > { %v2360_v52 = vadd.f32 %v2359_v47, %v2358_v17 }
 0x334   : > { %v4757_v6 = vpop.f32.mrb[24].mxu0 }
 0x335   : > { %v2275_v54 = vpop.f32.mrb[25].mxu0  ;;  %v2363_v62 = vsel %vm231_vm0, %v4757_v6, 0.0 }
 0x336   : > { %v2361_v55 = vsel %vm231_vm0, %v2275_v54, 0.0 }
 0x337   : > { %v2362_v61 = vadd.f32 %v2361_v55, %v2360_v52 }
 0x339   : > { %v2364_v21 = vadd.f32 %v2363_v62, %v2362_v61 }
 0x348   : > { %v4760_v37 = vpop.f32.mrb[26].mxu0 }
 0x349   : > { %v2285_v20 = vpop.f32.mrb[27].mxu0  ;;  %v2367_v9 = vsel %vm231_vm0, %v4760_v37, 0.0 }
 0x34a   : > { %v2365_v40 = vsel %vm231_vm0, %v2285_v20, 0.0 }
 0x34b   : > { %v2366_v56 = vadd.f32 %v2365_v40, %v2364_v21 }
 0x34d   : > { %v2368_v34 = vadd.f32 %v2367_v9, %v2366_v56 }
 0x35c   : > { %v4763_v0 = vpop.f32.mrb[28].mxu0 }
 0x35d   : > { %v2295_v23 = vpop.f32.mrb[29].mxu0  ;;  %v2371_v58 = vsel %vm231_vm0, %v4763_v0, 0.0 }
 0x35e   : > { %v2369_v59 = vsel %vm231_vm0, %v2295_v23, 0.0 }
 0x35f   : > { %v2370_v24 = vadd.f32 %v2369_v59, %v2368_v34 }
 0x361   : > { %v2372_v60 = vadd.f32 %v2371_v58, %v2370_v24 }
 0x369   : > { %v4766_v11 = vpop.f32.mrb[30].mxu0 }
 0x36a   : > { %v2305_v36 = vpop.f32.mrb[31].mxu0  ;;  %v2375_v30 = vsel %vm231_vm0, %v4766_v11, 0.0 }
 0x36b   : > { %v2373_v25 = vsel %vm231_vm0, %v2305_v36, 0.0 }
 0x36c   : > { %v2374_v27 = vadd.f32 %v2373_v25, %v2372_v60 }
 0x36e   : > { %v2376_v3 = vadd.f32 %v2375_v30, %v2374_v27 }
 0x370   : > { %v2377_v32 = vrot.slane %v2376_v3, 4 }
 0x372   : > { %v2378_v7 = vadd.f32 %v2377_v32, %v2376_v3 }
 0x374   : > { %v2379_v15 = vrot.slane %v2378_v7, 2 }
 0x376   : > { %v2380_v39 = vadd.f32 %v2379_v15, %v2378_v7 }
 0x378   : > { %v2381_v13 = vrot.slane %v2380_v39, 1 }
 0x37a   : > { %v2382_v10 = vadd.f32 %v2381_v13, %v2380_v39 }
 0x37c   : > { %v2384_v35 = vmul.f32 0.00390625, %v2382_v10 }
 0x37e   : > { %v5900_v22 = vsub.f32 %v5761_v48, %v2384_v35  ;;  %v5903_v28 = vsub.f32 %v5756_v33, %v2384_v35  ;;  %v5906_v29 = vsub.f32 %v5779_v50, %v2384_v35  ;;  %v5909_v41 = vsub.f32 %v5776_v63, %v2384_v35 }
 0x37f   : > { %v5912_v16 = vsub.f32 %v5799_v5, %v2384_v35  ;;  %v5915_v46 = vsub.f32 %v5796_v51, %v2384_v35  ;;  %v5918_v17 = vsub.f32 %v5819_v18, %v2384_v35  ;;  %v5921_v48 = vsub.f32 %v5816_v43, %v2384_v35 }
 0x380   : > { %v5924_v33 = vsub.f32 %v5836_v53, %v2384_v35  ;;  %v5927_v50 = vsub.f32 %v5834_v19, %v2384_v35  ;;  %v5930_v63 = vsub.f32 %v5846_v57, %v2384_v35  ;;  %v5933_v5 = vsub.f32 %v5844_v42, %v2384_v35 }
 0x381   : > { %v5936_v51 = vsub.f32 %v5854_v26, %v2384_v35  ;;  %v5939_v18 = vsub.f32 %v5852_v49, %v2384_v35  ;;  %v5942_v43 = vsub.f32 %v5862_v1, %v2384_v35  ;;  %v5945_v53 = vsub.f32 %v5860_v14, %v2384_v35 }
 0x382   : > { %v5948_v19 = vsub.f32 %v5870_v31, %v2384_v35  ;;  %v5951_v57 = vsub.f32 %v5868_v4, %v2384_v35  ;;  %v5954_v42 = vsub.f32 %v5878_v12, %v2384_v35  ;;  %v5957_v26 = vsub.f32 %v5876_v8, %v2384_v35 }
 0x383   : > { %v5959_v49 = vsub.f32 %v2255_v38, %v2384_v35  ;;  %v5962_v1 = vsub.f32 %v5884_v2, %v2384_v35  ;;  %v5964_v47 = vsub.f32 %v2265_v44, %v2384_v35  ;;  %v5966_v14 = vsub.f32 %v4754_v45, %v2384_v35 }
 0x384   : > { %v5968_v31 = vsub.f32 %v2275_v54, %v2384_v35  ;;  %v5970_v52 = vsub.f32 %v4757_v6, %v2384_v35  ;;  %v5972_v4 = vsub.f32 %v2285_v20, %v2384_v35  ;;  %v5974_v12 = vsub.f32 %v4760_v37, %v2384_v35 }
 0x385   : > { %v5976_v55 = vsub.f32 %v2295_v23, %v2384_v35  ;;  %v5978_v8 = vsub.f32 %v4763_v0, %v2384_v35  ;;  %v5980_v38 = vsub.f32 %v2305_v36, %v2384_v35  ;;  %v5982_v2 = vsub.f32 %v4766_v11, %v2384_v35 }
 0x386   : > { %v2417_v45 = vmul.f32 %v5900_v22, %v5900_v22  ;;  %v2418_v44 = vmul.f32 %v5903_v28, %v5903_v28  ;;  %v2419_v6 = vmul.f32 %v5906_v29, %v5906_v29  ;;  %v2420_v54 = vmul.f32 %v5909_v41, %v5909_v41 }
 0x387   : > { %v2421_v37 = vmul.f32 %v5912_v16, %v5912_v16  ;;  %v2422_v56 = vmul.f32 %v5915_v46, %v5915_v46  ;;  %v2423_v0 = vmul.f32 %v5918_v17, %v5918_v17  ;;  %v2424_v24 = vmul.f32 %v5921_v48, %v5921_v48 }
 0x388   : > { %v2449_v61 = vsel %vm231_vm0, %v2417_v45, 0.0  ;;  %v2450_v62 = vsel %vm231_vm0, %v2418_v44, 0.0  ;;  %v2452_v20 = vsel %vm231_vm0, %v2419_v6, 0.0  ;;  %v2454_v9 = vsel %vm231_vm0, %v2420_v54, 0.0 }
 0x389   : > { %v2451_v21 = vadd.f32 %v2450_v62, %v2449_v61  ;;  %v2456_v23 = vsel %vm231_vm0, %v2421_v37, 0.0  ;;  %v2458_v58 = vsel %vm231_vm0, %v2422_v56, 0.0  ;;  %v2425_v11 = vmul.f32 %v5924_v33, %v5924_v33 }
 0x38a   : > { %v2460_v36 = vsel %vm231_vm0, %v2423_v0, 0.0  ;;  %v2426_v27 = vmul.f32 %v5927_v50, %v5927_v50  ;;  %v2462_v30 = vsel %vm231_vm0, %v2424_v24, 0.0  ;;  %v2427_v32 = vmul.f32 %v5930_v63, %v5930_v63 }
 0x38b   : > { %v2453_v40 = vadd.f32 %v2452_v20, %v2451_v21  ;;  %v2464_v7 = vsel %vm231_vm0, %v2425_v11, 0.0  ;;  %v2428_v39 = vmul.f32 %v5933_v5, %v5933_v5  ;;  %v2429_v35 = vmul.f32 %v5936_v51, %v5936_v51 }
 0x38c   : > { %v2466_v13 = vsel %vm231_vm0, %v2426_v27, 0.0  ;;  %v2468_v45 = vsel %vm231_vm0, %v2427_v32, 0.0  ;;  %v2430_v6 = vmul.f32 %v5939_v18, %v5939_v18  ;;  %v2431_v62 = vmul.f32 %v5942_v43, %v5942_v43 }
 0x38d   : > { %v2455_v34 = vadd.f32 %v2454_v9, %v2453_v40  ;;  %v2470_v54 = vsel %vm231_vm0, %v2428_v39, 0.0  ;;  %v2472_v21 = vsel %vm231_vm0, %v2429_v35, 0.0  ;;  %v2432_v20 = vmul.f32 %v5945_v53, %v5945_v53 }
 0x38e   : > { %v2474_v40 = vsel %vm231_vm0, %v2430_v6, 0.0  ;;  %v2433_v9 = vmul.f32 %v5948_v19, %v5948_v19 }
 0x38f   : > { %v2457_v59 = vadd.f32 %v2456_v23, %v2455_v34  ;;  %v2476_v34 = vsel %vm231_vm0, %v2431_v62, 0.0  ;;  %v2434_v23 = vmul.f32 %v5951_v57, %v5951_v57 }
 0x391   : > { %v2459_v60 = vadd.f32 %v2458_v58, %v2457_v59  ;;  %v2478_v59 = vsel %vm231_vm0, %v2432_v20, 0.0  ;;  %v2435_v58 = vmul.f32 %v5954_v42, %v5954_v42 }
 0x393   : > { %v2461_v25 = vadd.f32 %v2460_v36, %v2459_v60  ;;  %v2480_v60 = vsel %vm231_vm0, %v2433_v9, 0.0  ;;  %v2436_v36 = vmul.f32 %v5957_v26, %v5957_v26 }
 0x395   : > { %v2463_v3 = vadd.f32 %v2462_v30, %v2461_v25  ;;  %v2482_v25 = vsel %vm231_vm0, %v2434_v23, 0.0  ;;  %v2437_v30 = vmul.f32 %v5959_v49, %v5959_v49 }
 0x397   : > { %v2465_v15 = vadd.f32 %v2464_v7, %v2463_v3  ;;  %v2484_v3 = vsel %vm231_vm0, %v2435_v58, 0.0  ;;  %v2438_v7 = vmul.f32 %v5962_v1, %v5962_v1 }
 0x399   : > { %v2467_v10 = vadd.f32 %v2466_v13, %v2465_v15  ;;  %v2486_v15 = vsel %vm231_vm0, %v2436_v36, 0.0  ;;  %v2439_v13 = vmul.f32 %v5964_v47, %v5964_v47 }
 0x39b   : > { %v2469_v44 = vadd.f32 %v2468_v45, %v2467_v10  ;;  %v2488_v10 = vsel %vm231_vm0, %v2437_v30, 0.0  ;;  %v2440_v45 = vmul.f32 %v5966_v14, %v5966_v14 }
 0x39d   : > { %v2471_v61 = vadd.f32 %v2470_v54, %v2469_v44  ;;  %v2490_v44 = vsel %vm231_vm0, %v2438_v7, 0.0  ;;  %v2441_v54 = vmul.f32 %v5968_v31, %v5968_v31 }
 0x39f   : > { %v2473_v37 = vadd.f32 %v2472_v21, %v2471_v61  ;;  %v2492_v61 = vsel %vm231_vm0, %v2439_v13, 0.0  ;;  %v2442_v21 = vmul.f32 %v5970_v52, %v5970_v52 }
 0x3a1   : > { %v2475_v56 = vadd.f32 %v2474_v40, %v2473_v37  ;;  %v2494_v37 = vsel %vm231_vm0, %v2440_v45, 0.0  ;;  %v2443_v40 = vmul.f32 %v5972_v4, %v5972_v4 }
 0x3a3   : > { %v2477_v0 = vadd.f32 %v2476_v34, %v2475_v56  ;;  %v2496_v56 = vsel %vm231_vm0, %v2441_v54, 0.0  ;;  %v2444_v34 = vmul.f32 %v5974_v12, %v5974_v12 }
 0x3a5   : > { %v2479_v24 = vadd.f32 %v2478_v59, %v2477_v0  ;;  %v2498_v0 = vsel %vm231_vm0, %v2442_v21, 0.0  ;;  %v2445_v59 = vmul.f32 %v5976_v55, %v5976_v55 }
 0x3a7   : > { %v2481_v11 = vadd.f32 %v2480_v60, %v2479_v24  ;;  %v2500_v24 = vsel %vm231_vm0, %v2443_v40, 0.0  ;;  %v2446_v60 = vmul.f32 %v5978_v8, %v5978_v8 }
 0x3a9   : > { %v2483_v27 = vadd.f32 %v2482_v25, %v2481_v11  ;;  %v2502_v11 = vsel %vm231_vm0, %v2444_v34, 0.0  ;;  %v2447_v25 = vmul.f32 %v5980_v38, %v5980_v38 }
 0x3ab   : > { %v2485_v32 = vadd.f32 %v2484_v3, %v2483_v27  ;;  %v2504_v27 = vsel %vm231_vm0, %v2445_v59, 0.0  ;;  %v2448_v3 = vmul.f32 %v5982_v2, %v5982_v2 }
 0x3ad   : > { %v2487_v39 = vadd.f32 %v2486_v15, %v2485_v32  ;;  %v2506_v32 = vsel %vm231_vm0, %v2446_v60, 0.0  ;;  %v2508_v15 = vsel %vm231_vm0, %v2447_v25, 0.0  ;;  %v2510_v13 = vsel %vm231_vm0, %v2448_v3, 0.0 }
 0x3af   : > { %v2489_v35 = vadd.f32 %v2488_v10, %v2487_v39 }
 0x3b1   : > { %v2491_v6 = vadd.f32 %v2490_v44, %v2489_v35 }
 0x3b3   : > { %v2493_v62 = vadd.f32 %v2492_v61, %v2491_v6 }
 0x3b5   : > { %v2495_v20 = vadd.f32 %v2494_v37, %v2493_v62 }
 0x3b7   : > { %v2497_v9 = vadd.f32 %v2496_v56, %v2495_v20 }
 0x3b9   : > { %v2499_v23 = vadd.f32 %v2498_v0, %v2497_v9 }
 0x3bb   : > { %v2501_v58 = vadd.f32 %v2500_v24, %v2499_v23 }
 0x3bd   : > { %v2503_v36 = vadd.f32 %v2502_v11, %v2501_v58 }
 0x3bf   : > { %v2505_v30 = vadd.f32 %v2504_v27, %v2503_v36 }
 0x3c1   : > { %v2507_v7 = vadd.f32 %v2506_v32, %v2505_v30 }
 0x3c3   : > { %v2509_v39 = vadd.f32 %v2508_v15, %v2507_v7 }
 0x3c5   : > { %v2511_v10 = vadd.f32 %v2510_v13, %v2509_v39 }
 0x3c7   : > { %v2512_v35 = vrot.slane %v2511_v10, 4 }
 0x3c9   : > { %v2513_v45 = vadd.f32 %v2512_v35, %v2511_v10 }
 0x3cb   : > { %v2514_v44 = vrot.slane %v2513_v45, 2 }
 0x3cd   : > { %v2515_v6 = vadd.f32 %v2514_v44, %v2513_v45 }
 0x3cf   : > { %v2516_v54 = vrot.slane %v2515_v6, 1 }
 0x3d1   : > { %v2517_v61 = vadd.f32 %v2516_v54, %v2515_v6 }
 0x3d3   : > { %v2518_v62 = vmul.f32 0.00390625, %v2517_v61 }
 0x3d5   : > { %v2519_v21 = vadd.f32 1e-05, %v2518_v62 }
 0x3d7   : > { %4841 = vrsqrt.f32 %v2519_v21 }
 0x3e1   : > { %v4842_v37 = vpop.eup %4841 }
 0x3e2   : > { %v2551_v20 = vmul.f32 %v4842_v37, %v5980_v38  ;;  %v2521_v40 = vmul.f32 %v4842_v37, %v5900_v22  ;;  %v2522_v56 = vmul.f32 %v4842_v37, %v5903_v28  ;;  %v2523_v9 = vmul.f32 %v4842_v37, %v5906_v29 }
 0x3e3   : > { %v2524_v34 = vmul.f32 %v4842_v37, %v5909_v41  ;;  %v2525_v0 = vmul.f32 %v4842_v37, %v5912_v16  ;;  %v2526_v23 = vmul.f32 %v4842_v37, %v5915_v46  ;;  %v2527_v59 = vmul.f32 %v4842_v37, %v5918_v17 }
 0x3e4   : > { %v2583_v24 = vmax.f32 %v2551_v20, 0.0  ;;  %v2528_v58 = vmul.f32 %v4842_v37, %v5921_v48  ;;  %v2529_v60 = vmul.f32 %v4842_v37, %v5924_v33  ;;  %v2530_v38 = vmul.f32 %v4842_v37, %v5927_v50 }
 0x3e5   : > { %v2531_v22 = vmul.f32 %v4842_v37, %v5930_v63  ;;  %v2532_v28 = vmul.f32 %v4842_v37, %v5933_v5  ;;  %v2533_v29 = vmul.f32 %v4842_v37, %v5936_v51  ;;  %v2534_v41 = vmul.f32 %v4842_v37, %v5939_v18 }
 0x3e6   : > { %v2535_v16 = vmul.f32 %v4842_v37, %v5942_v43  ;;  %v6097_v46 = vmul.f32 %v4842_v37, %v5945_v53  ;;  %v6100_v17 = vmul.f32 %v4842_v37, %v5948_v19  ;;  %v6103_v48 = vmul.f32 %v4842_v37, %v5951_v57  ;;  %2615 = vst.msk [vmem:[#allocation2 + $0x181] sm:$0xff] %vm231_vm0, %v2583_v24 }
 0x3e7   : > { %v6107_v33 = vmul.f32 %v4842_v37, %v5954_v42  ;;  %v6110_v50 = vmul.f32 %v4842_v37, %v5957_v26  ;;  %v6113_v63 = vmul.f32 %v4842_v37, %v5959_v49  ;;  %v6116_v5 = vmul.f32 %v4842_v37, %v5962_v1 }
 0x3e8   : > { %v6119_v51 = vmul.f32 %v4842_v37, %v5964_v47  ;;  %v6122_v18 = vmul.f32 %v4842_v37, %v5966_v14  ;;  %v6125_v43 = vmul.f32 %v4842_v37, %v5968_v31  ;;  %v6128_v53 = vmul.f32 %v4842_v37, %v5970_v52 }
 0x3e9   : > { %v6131_v19 = vmul.f32 %v4842_v37, %v5972_v4  ;;  %v6134_v57 = vmul.f32 %v4842_v37, %v5974_v12  ;;  %v6137_v42 = vmul.f32 %v4842_v37, %v5976_v55  ;;  %v6140_v26 = vmul.f32 %v4842_v37, %v5978_v8 }
 0x3ea   : > { %v6143_v49 = vmul.f32 %v4842_v37, %v5982_v2  ;;  %v2556_v1 = vmax.f32 %v2524_v34, 0.0  ;;  %v2553_v47 = vmax.f32 %v2521_v40, 0.0  ;;  %v2554_v14 = vmax.f32 %v2522_v56, 0.0 }
 0x3eb   : > { %v2555_v31 = vmax.f32 %v2523_v9, 0.0  ;;  %v2557_v52 = vmax.f32 %v2525_v0, 0.0  ;;  %v2558_v11 = vmax.f32 %v2526_v23, 0.0  ;;  %v2559_v4 = vmax.f32 %v2527_v59, 0.0 }
 0x3ec   : > { %2618 = vst.msk [vmem:[#allocation2 + $0x9] sm:$0xff] %vm231_vm0, %v2556_v1  ;;  %v2560_v12 = vmax.f32 %v2528_v58, 0.0  ;;  %v2561_v36 = vmax.f32 %v2529_v60, 0.0  ;;  %v2562_v25 = vmax.f32 %v2530_v38, 0.0  ;;  %v2563_v55 = vmax.f32 %v2531_v22, 0.0  ;;  %2588 = vst.msk [vmem:[#allocation2 + $0x39] sm:$0xff] %vm231_vm0, %v2556_v1 }
 0x3ed   : > { %2585 = vst.msk [vmem:[#allocation2 + $0x19] sm:$0xff] %vm231_vm0, %v2553_v47  ;;  %2586 = vst.msk [vmem:[#allocation2 + $0x21] sm:$0xff] %vm231_vm0, %v2554_v14  ;;  %v2564_v8 = vmax.f32 %v2532_v28, 0.0  ;;  %v2565_v2 = vmax.f32 %v2533_v29, 0.0  ;;  %v2566_v27 = vmax.f32 %v2534_v41, 0.0  ;;  %v2567_v30 = vmax.f32 %v2535_v16, 0.0 }
 0x3ee   : > { %2617 = vst.msk [vmem:[#allocation2 + $0x1] sm:$0xff] %vm231_vm0, %v2555_v31  ;;  %2587 = vst.msk [vmem:[#allocation2 + $0x31] sm:$0xff] %vm231_vm0, %v2555_v31  ;;  %v2637_v3 = vld [vmem:[#allocation2 + $0x182] sm:$0x1]  ;;  %v2568_v32 = vmax.f32 %v6097_v46, 0.0  ;;  %v2569_v7 = vmax.f32 %v6100_v17, 0.0 }
 0x3ef   : > { %2589 = vst.msk [vmem:[#allocation2 + $0x49] sm:$0xff] %vm231_vm0, %v2557_v52  ;;  %2590 = vst.msk [vmem:[#allocation2 + $0x51] sm:$0xff] %vm231_vm0, %v2558_v11  ;;  %v2570_v15 = vmax.f32 %v6103_v48, 0.0  ;;  %v2571_v39 = vmax.f32 %v6107_v33, 0.0  ;;  %v2572_v13 = vmax.f32 %v6110_v50, 0.0  ;;  %v2573_v10 = vmax.f32 %v6113_v63, 0.0 }
 0x3f0   : > { %2591 = vst.msk [vmem:[#allocation2 + $0x61] sm:$0xff] %vm231_vm0, %v2559_v4  ;;  %2592 = vst.msk [vmem:[#allocation2 + $0x69] sm:$0xff] %vm231_vm0, %v2560_v12  ;;  %v2574_v35 = vmax.f32 %v6116_v5, 0.0  ;;  %v2575_v45 = vmax.f32 %v6119_v51, 0.0  ;;  %v2576_v44 = vmax.f32 %v6122_v18, 0.0  ;;  %v2577_v6 = vmax.f32 %v6125_v43, 0.0 }
 0x3f1   : > { %2593 = vst.msk [vmem:[#allocation2 + $0x79] sm:$0xff] %vm231_vm0, %v2561_v36  ;;  %2594 = vst.msk [vmem:[#allocation2 + $0x81] sm:$0xff] %vm231_vm0, %v2562_v25  ;;  %v2578_v54 = vmax.f32 %v6128_v53, 0.0  ;;  %v2579_v61 = vmax.f32 %v6131_v19, 0.0  ;;  %v2580_v62 = vmax.f32 %v6134_v57, 0.0  ;;  %v2581_v21 = vmax.f32 %v6137_v42, 0.0 }
 0x3f2   : > { %2595 = vst.msk [vmem:[#allocation2 + $0x91] sm:$0xff] %vm231_vm0, %v2563_v55  ;;  %2596 = vst.msk [vmem:[#allocation2 + $0x99] sm:$0xff] %vm231_vm0, %v2564_v8  ;;  %v2582_v37 = vmax.f32 %v6140_v26, 0.0  ;;  %v2584_v20 = vmax.f32 %v6143_v49, 0.0 }
 0x3f3   : > { %2655 = vst.msk [vmem:[#allocation2 + $0x180] sm:$0x1] %vm287_vm1, %v2637_v3  ;;  %v2758_v40 = vld [vmem:[#allocation2 + $0x9] sm:$0xff]  ;;  %v6207_v0 = vld [vmem:[#allocation2 + $0x39] sm:$0xff] }
 0x3f4   : > { %2597 = vst.msk [vmem:[#allocation2 + $0xa9] sm:$0xff] %vm231_vm0, %v2565_v2  ;;  %2598 = vst.msk [vmem:[#allocation2 + $0xb1] sm:$0xff] %vm231_vm0, %v2566_v27  ;;  %2823 = vrot.lane.b32.xlu1 %v2758_v40, %s4851_s21  ;;  %v6199_v9 = vld [vmem:[#allocation2 + $0x21] sm:$0xff]  ;;  %v6203_v34 = vld [vmem:[#allocation2 + $0x19] sm:$0xff] }
 0x3f5   : > { %2599 = vst.msk [vmem:[#allocation2 + $0xc1] sm:$0xff] %vm231_vm0, %v2567_v30  ;;  %2600 = vst.msk [vmem:[#allocation2 + $0xc9] sm:$0xff] %vm231_vm0, %v2568_v32  ;;  %v2757_v56 = vld [vmem:[#allocation2 + $0x1] sm:$0xff]  ;;  %v6211_v23 = vld [vmem:[#allocation2 + $0x31] sm:$0xff] }
 0x3f6   : > { %2601 = vst.msk [vmem:[#allocation2 + $0xd9] sm:$0xff] %vm231_vm0, %v2569_v7  ;;  %2602 = vst.msk [vmem:[#allocation2 + $0xe1] sm:$0xff] %vm231_vm0, %v2570_v15  ;;  %2821 = vrot.lane.b32.xlu0 %v2757_v56, %s4851_s21  ;;  %v2657_v59 = vld [vmem:[#allocation2 + $0xf] sm:$0x1]  ;;  %v2658_v24 = vld [vmem:[#allocation2 + $0x27] sm:$0x1] }
 0x3f7   : > { %2603 = vst.msk [vmem:[#allocation2 + $0xf1] sm:$0xff] %vm231_vm0, %v2571_v39  ;;  %2604 = vst.msk [vmem:[#allocation2 + $0xf9] sm:$0xff] %vm231_vm0, %v2572_v13  ;;  %v6216_v58 = vld [vmem:[#allocation2 + $0x51] sm:$0xff]  ;;  %v2659_v60 = vld [vmem:[#allocation2 + $0x3f] sm:$0x1] }
 0x3f8   : > { %2605 = vst.msk [vmem:[#allocation2 + $0x109] sm:$0xff] %vm231_vm0, %v2573_v10  ;;  %2606 = vst.msk [vmem:[#allocation2 + $0x111] sm:$0xff] %vm231_vm0, %v2574_v35  ;;  %2827 = vrot.lane.b32.xlu1 %v6199_v9, %s4851_s21  ;;  %v2660_v38 = vld [vmem:[#allocation2 + $0x57] sm:$0x1]  ;;  %v6221_v22 = vld [vmem:[#allocation2 + $0x49] sm:$0xff] }
 0x3f9   : > { %2607 = vst.msk [vmem:[#allocation2 + $0x121] sm:$0xff] %vm231_vm0, %v2575_v45  ;;  %2608 = vst.msk [vmem:[#allocation2 + $0x129] sm:$0xff] %vm231_vm0, %v2576_v44  ;;  %v2661_v28 = vld [vmem:[#allocation2 + $0x6f] sm:$0x1]  ;;  %v2662_v29 = vld [vmem:[#allocation2 + $0x87] sm:$0x1] }
 0x3fa   : > { %2609 = vst.msk [vmem:[#allocation2 + $0x139] sm:$0xff] %vm231_vm0, %v2577_v6  ;;  %2610 = vst.msk [vmem:[#allocation2 + $0x141] sm:$0xff] %vm231_vm0, %v2578_v54  ;;  %2825 = vrot.lane.b32.xlu0 %v6203_v34, %s4851_s21  ;;  %v2663_v41 = vld [vmem:[#allocation2 + $0x9f] sm:$0x1]  ;;  %v2766_v46 = vld [vmem:[#allocation2 + $0x69] sm:$0xff] }
 0x3fb   : > { %2611 = vst.msk [vmem:[#allocation2 + $0x151] sm:$0xff] %vm231_vm0, %v2579_v61  ;;  %2612 = vst.msk [vmem:[#allocation2 + $0x159] sm:$0xff] %vm231_vm0, %v2580_v62  ;;  %v2664_v16 = vld [vmem:[#allocation2 + $0xb7] sm:$0x1]  ;;  %v2765_v33 = vld [vmem:[#allocation2 + $0x61] sm:$0xff] }
 0x3fc   : > { %2613 = vst.msk [vmem:[#allocation2 + $0x169] sm:$0xff] %vm231_vm0, %v2581_v21  ;;  %2614 = vst.msk [vmem:[#allocation2 + $0x171] sm:$0xff] %vm231_vm0, %v2582_v37  ;;  %2831 = vrot.lane.b32.xlu1 %v6207_v0, %s4851_s21  ;;  %v2665_v17 = vld [vmem:[#allocation2 + $0xcf] sm:$0x1]  ;;  %v2768_v51 = vld [vmem:[#allocation2 + $0x81] sm:$0xff] }
 0x3fd   : > { %2616 = vst.msk [vmem:[#allocation2 + $0x189] sm:$0xff] %vm231_vm0, %v2584_v20  ;;  %2619 = vst.msk [vmem:[#allocation2 + $0x199] sm:$0xff] %vm231_vm0, %v2581_v21  ;;  %v2666_v48 = vld [vmem:[#allocation2 + $0xe7] sm:$0x1]  ;;  %v2694_v18 = vld [vmem:[#allocation2 + $0x8] sm:$0xff] }
 0x3fe   : > { %2620 = vst.msk [vmem:[#allocation2 + $0x1a1] sm:$0xff] %vm231_vm0, %v2582_v37  ;;  %2829 = vrot.lane.b32.xlu0 %v6211_v23, %s4851_s21  ;;  %v2667_v50 = vld [vmem:[#allocation2 + $0xff] sm:$0x1]  ;;  %2726 = vst.msk [vmem:[#allocation3 + $0x8] sm:$0xff] %vm231_vm0, %v2694_v18  ;;  %v2621_v53 = vld [vmem:[#allocation2 + $0x2] sm:$0x1] }
 0x3ff   : > { %2675 = vst.msk [vmem:[#allocation2 + $0x11] sm:$0x1] %vm287_vm1, %v2657_v59  ;;  %2676 = vst.msk [vmem:[#allocation2 + $0x29] sm:$0x1] %vm287_vm1, %v2658_v24  ;;  %v2668_v63 = vld [vmem:[#allocation2 + $0x117] sm:$0x1] }
 0x400   : > { %2835 = vrot.lane.b32.xlu1 %v6216_v58, %s4851_s21  ;;  %2677 = vst.msk [vmem:[#allocation2 + $0x41] sm:$0x1] %vm287_vm1, %v2659_v60  ;;  %2678 = vst.msk [vmem:[#allocation2 + $0x59] sm:$0x1] %vm287_vm1, %v2660_v38  ;;  %v2669_v5 = vld [vmem:[#allocation2 + $0x12f] sm:$0x1] }
 0x401   : > { %2679 = vst.msk [vmem:[#allocation2 + $0x71] sm:$0x1] %vm287_vm1, %v2661_v28  ;;  %2680 = vst.msk [vmem:[#allocation2 + $0x89] sm:$0x1] %vm287_vm1, %v2662_v29  ;;  %v2767_v43 = vld [vmem:[#allocation2 + $0x79] sm:$0xff]  ;;  %v2769_v1 = vld [vmem:[#allocation2 + $0x91] sm:$0xff] }
 0x402   : > { %2833 = vrot.lane.b32.xlu0 %v6221_v22, %s4851_s21  ;;  %2681 = vst.msk [vmem:[#allocation2 + $0xa1] sm:$0x1] %vm287_vm1, %v2663_v41  ;;  %2682 = vst.msk [vmem:[#allocation2 + $0xb9] sm:$0x1] %vm287_vm1, %v2664_v16  ;;  %v2670_v19 = vld [vmem:[#allocation2 + $0x147] sm:$0x1] }
 0x403   : > { %2683 = vst.msk [vmem:[#allocation2 + $0xd1] sm:$0x1] %vm287_vm1, %v2665_v17  ;;  %2684 = vst.msk [vmem:[#allocation2 + $0xe9] sm:$0x1] %vm287_vm1, %v2666_v48  ;;  %v6243_v57 = vld [vmem:[#allocation2 + $0x20] sm:$0xff]  ;;  %v6250_v47 = vld [vmem:[#allocation2 + $0x38] sm:$0xff] }
 0x404   : > { %2839 = vrot.lane.b32.xlu1 %v2766_v46, %s4851_s21  ;;  %2685 = vst.msk [vmem:[#allocation2 + $0x101] sm:$0x1] %vm287_vm1, %v2667_v50  ;;  %2686 = vst.msk [vmem:[#allocation2 + $0x119] sm:$0x1] %vm287_vm1, %v2668_v63  ;;  %v2622_v42 = vld [vmem:[#allocation2 + $0x1a] sm:$0x1] }
 0x405   : > { %2687 = vst.msk [vmem:[#allocation2 + $0x131] sm:$0x1] %vm287_vm1, %v2669_v5  ;;  %2639 = vst.msk [vmem:[#allocation2] sm:$0x1] %vm287_vm1, %v2621_v53  ;;  %v2770_v26 = vld [vmem:[#allocation2 + $0x99] sm:$0xff]  ;;  %v2772_v52 = vld [vmem:[#allocation2 + $0xb1] sm:$0xff] }
 0x406   : > { %2837 = vrot.lane.b32.xlu0 %v2765_v33, %s4851_s21  ;;  %2688 = vst.msk [vmem:[#allocation2 + $0x149] sm:$0x1] %vm287_vm1, %v2670_v19  ;;  %2640 = vst.msk [vmem:[#allocation2 + $0x18] sm:$0x1] %vm287_vm1, %v2622_v42  ;;  %v2671_v49 = vld [vmem:[#allocation2 + $0x15f] sm:$0x1] }
 0x407   : > { %2728 = vst.msk [vmem:[#allocation3 + $0x18] sm:$0xff] %vm231_vm0, %v6243_v57  ;;  %2730 = vst.msk [vmem:[#allocation3 + $0x28] sm:$0xff] %vm231_vm0, %v6250_v47  ;;  %v2623_v14 = vld [vmem:[#allocation2 + $0x32] sm:$0x1]  ;;  %v2672_v31 = vld [vmem:[#allocation2 + $0x177] sm:$0x1] }
 0x408   : > { %2843 = vrot.lane.b32.xlu1 %v2768_v51, %s4851_s21  ;;  %2689 = vst.msk [vmem:[#allocation2 + $0x161] sm:$0x1] %vm287_vm1, %v2671_v49  ;;  %2641 = vst.msk [vmem:[#allocation2 + $0x30] sm:$0x1] %vm287_vm1, %v2623_v14  ;;  %v6257_v11 = vld [vmem:[#allocation2 + $0x50] sm:$0xff]  ;;  %v6261_v12 = vld [vmem:[#allocation2 + $0x68] sm:$0xff] }
 0x409   : > { %2690 = vst.msk [vmem:[#allocation2 + $0x179] sm:$0x1] %vm287_vm1, %v2672_v31  ;;  %v2624_v4 = vld [vmem:[#allocation2 + $0x4a] sm:$0x1]  ;;  %v2625_v36 = vld [vmem:[#allocation2 + $0x62] sm:$0x1] }
 0x40a   : > { %2841 = vrot.lane.b32.xlu0 %v2767_v43, %s4851_s21  ;;  %2732 = vst.msk [vmem:[#allocation3 + $0x38] sm:$0xff] %vm231_vm0, %v6257_v11  ;;  %v2771_v25 = vld [vmem:[#allocation2 + $0xa9] sm:$0xff]  ;;  %2734 = vst.msk [vmem:[#allocation3 + $0x48] sm:$0xff] %vm231_vm0, %v6261_v12  ;;  %v6268_v8 = vld [vmem:[#allocation2 + $0x80] sm:$0xff] }
 0x40b   : > { %2642 = vst.msk [vmem:[#allocation2 + $0x48] sm:$0x1] %vm287_vm1, %v2624_v4  ;;  %2643 = vst.msk [vmem:[#allocation2 + $0x60] sm:$0x1] %vm287_vm1, %v2625_v36  ;;  %v2774_v2 = vld [vmem:[#allocation2 + $0xc9] sm:$0xff]  ;;  %v6274_v30 = vld [vmem:[#allocation2 + $0x98] sm:$0xff] }
 0x40c   : > { %2847 = vrot.lane.b32.xlu1 %v2770_v26, %s4851_s21  ;;  %v2693_v55 = vld [vmem:[#allocation2] sm:$0xff]  ;;  %2736 = vst.msk [vmem:[#allocation3 + $0x58] sm:$0xff] %vm231_vm0, %v6268_v8  ;;  %v2626_v27 = vld [vmem:[#allocation2 + $0x7a] sm:$0x1]  ;;  %v2627_v3 = vld [vmem:[#allocation2 + $0x92] sm:$0x1] }
 0x40d   : > { %2725 = vst.msk [vmem:[#allocation3] sm:$0xff] %vm231_vm0, %v2693_v55  ;;  %v6276_v32 = vld [vmem:[#allocation2 + $0x18] sm:$0xff]  ;;  %2738 = vst.msk [vmem:[#allocation3 + $0x68] sm:$0xff] %vm231_vm0, %v6274_v30  ;;  %v6282_v7 = vld [vmem:[#allocation2 + $0xb0] sm:$0xff] }
 0x40e   : > { %2845 = vrot.lane.b32.xlu0 %v2769_v1, %s4851_s21  ;;  %2644 = vst.msk [vmem:[#allocation2 + $0x78] sm:$0x1] %vm287_vm1, %v2626_v27  ;;  %2645 = vst.msk [vmem:[#allocation2 + $0x90] sm:$0x1] %vm287_vm1, %v2627_v3  ;;  %v2628_v15 = vld [vmem:[#allocation2 + $0xaa] sm:$0x1] }
 0x40f   : > { %v2773_v39 = vld [vmem:[#allocation2 + $0xc1] sm:$0xff]  ;;  %2727 = vst.msk [vmem:[#allocation3 + $0x10] sm:$0xff] %vm231_vm0, %v6276_v32  ;;  %2740 = vst.msk [vmem:[#allocation3 + $0x78] sm:$0xff] %vm231_vm0, %v6282_v7  ;;  %v2630_v45 = vld [vmem:[#allocation2 + $0xda] sm:$0x1] }
 0x410   : > { %2851 = vrot.lane.b32.xlu1 %v2772_v52, %s4851_s21  ;;  %2646 = vst.msk [vmem:[#allocation2 + $0xa8] sm:$0x1] %vm287_vm1, %v2628_v15  ;;  %v6289_v13 = vld [vmem:[#allocation2 + $0xc8] sm:$0xff]  ;;  %v2629_v10 = vld [vmem:[#allocation2 + $0xc2] sm:$0x1]  ;;  %v6297_v44 = vld [vmem:[#allocation2 + $0xf8] sm:$0xff] }
 0x411   : > { %2742 = vst.msk [vmem:[#allocation3 + $0x88] sm:$0xff] %vm231_vm0, %v6289_v13  ;;  %v6295_v35 = vld [vmem:[#allocation2 + $0xe0] sm:$0xff]  ;;  %v6302_v54 = vld [vmem:[#allocation2 + $0x30] sm:$0xff]  ;;  %2746 = vst.msk [vmem:[#allocation3 + $0xa8] sm:$0xff] %vm231_vm0, %v6297_v44 }
 0x412   : > { %2849 = vrot.lane.b32.xlu0 %v2771_v25, %s4851_s21  ;;  %2647 = vst.msk [vmem:[#allocation2 + $0xc0] sm:$0x1] %vm287_vm1, %v2629_v10  ;;  %v6300_v6 = vld [vmem:[#allocation2 + $0xe1] sm:$0xff]  ;;  %2648 = vst.msk [vmem:[#allocation2 + $0xd8] sm:$0x1] %vm287_vm1, %v2630_v45  ;;  %v6309_v62 = vld [vmem:[#allocation2 + $0xd9] sm:$0xff] }
 0x413   : > { %2744 = vst.msk [vmem:[#allocation3 + $0x98] sm:$0xff] %vm231_vm0, %v6295_v35  ;;  %v2631_v61 = vld [vmem:[#allocation2 + $0xf2] sm:$0x1]  ;;  %2729 = vst.msk [vmem:[#allocation3 + $0x20] sm:$0xff] %vm231_vm0, %v6302_v54  ;;  %v2632_v37 = vld [vmem:[#allocation2 + $0x10a] sm:$0x1] }
 0x414   : > { %2855 = vrot.lane.b32.xlu1 %v2774_v2, %s4851_s21  ;;  %2649 = vst.msk [vmem:[#allocation2 + $0xf0] sm:$0x1] %vm287_vm1, %v2631_v61  ;;  %v6314_v21 = vld [vmem:[#allocation2 + $0x110] sm:$0xff]  ;;  %v6316_v20 = vld [vmem:[#allocation2 + $0x128] sm:$0xff]  ;;  %v6320_v56 = vld [vmem:[#allocation2 + $0x60] sm:$0xff] }
 0x415   : > { %v6318_v40 = vld [vmem:[#allocation2 + $0x48] sm:$0xff]  ;;  %2748 = vst.msk [vmem:[#allocation3 + $0xb8] sm:$0xff] %vm231_vm0, %v6314_v21  ;;  %2750 = vst.msk [vmem:[#allocation3 + $0xc8] sm:$0xff] %vm231_vm0, %v6316_v20  ;;  %v2633_v59 = vld [vmem:[#allocation2 + $0x122] sm:$0x1] }
 0x416   : > { %2853 = vrot.lane.b32.xlu0 %v2773_v39, %s4851_s21  ;;  %2650 = vst.msk [vmem:[#allocation2 + $0x108] sm:$0x1] %vm287_vm1, %v2632_v37  ;;  %2651 = vst.msk [vmem:[#allocation2 + $0x120] sm:$0x1] %vm287_vm1, %v2633_v59  ;;  %v6334_v24 = vld [vmem:[#allocation2 + $0x140] sm:$0xff]  ;;  %v6336_v38 = vld [vmem:[#allocation2 + $0x158] sm:$0xff] }
 0x417   : > { %2731 = vst.msk [vmem:[#allocation3 + $0x30] sm:$0xff] %vm231_vm0, %v6318_v40  ;;  %2733 = vst.msk [vmem:[#allocation3 + $0x40] sm:$0xff] %vm231_vm0, %v6320_v56  ;;  %v2634_v60 = vld [vmem:[#allocation2 + $0x13a] sm:$0x1]  ;;  %v6342_v29 = vld [vmem:[#allocation2 + $0x90] sm:$0xff] }
 0x418   : > { %2859 = vrot.lane.b32.xlu1 %v6300_v6, %s4851_s21  ;;  %v6340_v28 = vld [vmem:[#allocation2 + $0x78] sm:$0xff]  ;;  %2752 = vst.msk [vmem:[#allocation3 + $0xd8] sm:$0xff] %vm231_vm0, %v6334_v24  ;;  %2754 = vst.msk [vmem:[#allocation3 + $0xe8] sm:$0xff] %vm231_vm0, %v6336_v38  ;;  %v2635_v41 = vld [vmem:[#allocation2 + $0x152] sm:$0x1] }
 0x419   : > { %2652 = vst.msk [vmem:[#allocation2 + $0x138] sm:$0x1] %vm287_vm1, %v2634_v60  ;;  %v6353_v16 = vld [vmem:[#allocation2 + $0xa8] sm:$0xff]  ;;  %2653 = vst.msk [vmem:[#allocation2 + $0x150] sm:$0x1] %vm287_vm1, %v2635_v41  ;;  %v6356_v46 = vld [vmem:[#allocation2 + $0x170] sm:$0xff] }
 0x41a   : > { %2857 = vrot.lane.b32.xlu0 %v6309_v62, %s4851_s21  ;;  %2735 = vst.msk [vmem:[#allocation3 + $0x50] sm:$0xff] %vm231_vm0, %v6340_v28  ;;  %2737 = vst.msk [vmem:[#allocation3 + $0x60] sm:$0xff] %vm231_vm0, %v6342_v29  ;;  %v2636_v17 = vld [vmem:[#allocation2 + $0x16a] sm:$0x1]  ;;  %v6358_v48 = vld [vmem:[#allocation2 + $0xf9] sm:$0xff] }
 0x41b   : > { %7107 = vst [vmem:[#allocation4_spill] sm:$0xff] %v6356_v46  ;;  %2739 = vst.msk [vmem:[#allocation3 + $0x70] sm:$0xff] %vm231_vm0, %v6353_v16  ;;  %v6362_v33 = vld [vmem:[#allocation2 + $0xc0] sm:$0xff]  ;;  %v6369_v50 = vld [vmem:[#allocation2 + $0xf1] sm:$0xff] }
 0x41c   : > { %2756 = vst.msk [vmem:[#allocation3 + $0xf8] sm:$0xff] %vm231_vm0, %v6356_v46  ;;  %2863 = vrot.lane.b32.xlu1 %v6358_v48, %s4851_s21  ;;  %2741 = vst.msk [vmem:[#allocation3 + $0x80] sm:$0xff] %vm231_vm0, %v6362_v33  ;;  %v6373_v63 = vld [vmem:[#allocation2 + $0xd8] sm:$0xff]  ;;  %v6379_v5 = vld [vmem:[#allocation2 + $0xf0] sm:$0xff] }
 0x41d   : > { %2654 = vst.msk [vmem:[#allocation2 + $0x168] sm:$0x1] %vm287_vm1, %v2636_v17  ;;  %v6383_v51 = vld [vmem:[#allocation2 + $0x108] sm:$0xff]  ;;  %v6385_v18 = vld [vmem:[#allocation2 + $0x111] sm:$0xff]  ;;  %v6389_v43 = vld [vmem:[#allocation2 + $0x120] sm:$0xff] }
 0x41e   : > { %2861 = vrot.lane.b32.xlu0 %v6369_v50, %s4851_s21  ;;  %2743 = vst.msk [vmem:[#allocation3 + $0x90] sm:$0xff] %vm231_vm0, %v6373_v63  ;;  %2745 = vst.msk [vmem:[#allocation3 + $0xa0] sm:$0xff] %vm231_vm0, %v6379_v5  ;;  %v6393_v53 = vld [vmem:[#allocation2 + $0x109] sm:$0xff]  ;;  %v2781_v1 = vld [vmem:[#allocation2 + $0x121] sm:$0xff] }
 0x41f   : > { %2747 = vst.msk [vmem:[#allocation3 + $0xb0] sm:$0xff] %vm231_vm0, %v6383_v51  ;;  %2749 = vst.msk [vmem:[#allocation3 + $0xc0] sm:$0xff] %vm231_vm0, %v6389_v43  ;;  %v2782_v49 = vld [vmem:[#allocation2 + $0x129] sm:$0xff]  ;;  %v2784_v14 = vld [vmem:[#allocation2 + $0x141] sm:$0xff] }
 0x420   : > { %2867 = vrot.lane.b32.xlu1 %v6385_v18, %s4851_s21  ;;  %v6397_v19 = vld [vmem:[#allocation2 + $0x138] sm:$0xff]  ;;  %v6403_v42 = vld [vmem:[#allocation2 + $0x150] sm:$0xff]  ;;  %v2673_v36 = vld [vmem:[#allocation2 + $0x18f] sm:$0x1] }
 0x421   : > { %2751 = vst.msk [vmem:[#allocation3 + $0xd0] sm:$0xff] %vm231_vm0, %v6397_v19  ;;  %2753 = vst.msk [vmem:[#allocation3 + $0xe0] sm:$0xff] %vm231_vm0, %v6403_v42  ;;  %v2783_v31 = vld [vmem:[#allocation2 + $0x139] sm:$0xff]  ;;  %v2785_v4 = vld [vmem:[#allocation2 + $0x151] sm:$0xff] }
 0x422   : > { %2865 = vrot.lane.b32.xlu0 %v6393_v53, %s4851_s21  ;;  %v2786_v52 = vld [vmem:[#allocation2 + $0x159] sm:$0xff]  ;;  %2691 = vst.msk [vmem:[#allocation2 + $0x191] sm:$0x1] %vm287_vm1, %v2673_v36  ;;  %v2788_v55 = vld [vmem:[#allocation2 + $0x171] sm:$0xff]  ;;  %v2787_v2 = vld [vmem:[#allocation2 + $0x169] sm:$0xff] }
 0x423   : > { %v2638_v25 = vld [vmem:[#allocation2 + $0x19a] sm:$0x1]  ;;  %v2674_v27 = vld [vmem:[#allocation2 + $0x1a7] sm:$0x1]  ;;  %v2950_v3 = vld [vmem:[#allocation2 + $0xa] sm:$0xff] }
 0x424   : > { %v6407_v26 = vld [vmem:[#allocation2 + $0x168] sm:$0xff]  ;;  %2871 = vrot.lane.b32.xlu1 %v2782_v49, %s4851_s21  ;;  %2656 = vst.msk [vmem:[#allocation2 + $0x198] sm:$0x1] %vm287_vm1, %v2638_v25  ;;  %2692 = vst.msk [vmem:[#allocation2 + $0x1a9] sm:$0x1] %vm287_vm1, %v2674_v27  ;;  %v6428_v10 = vld [vmem:[#allocation2 + $0x1a] sm:$0xff] }
 0x425   : > { %7108 = vst [vmem:[#allocation5_spill] sm:$0xff] %v6407_v26  ;;  %2755 = vst.msk [vmem:[#allocation3 + $0xf0] sm:$0xff] %vm231_vm0, %v6407_v26  ;;  %v2949_v15 = vld [vmem:[#allocation2 + $0x2] sm:$0xff]  ;;  %v6432_v45 = vld [vmem:[#allocation2 + $0x3a] sm:$0xff] }
 0x426   : > { %2869 = vrot.lane.b32.xlu0 %v2781_v1, %s4851_s21  ;;  %v6424_v39 = vld [vmem:[#allocation2 + $0x22] sm:$0xff]  ;;  %v6436_v61 = vld [vmem:[#allocation2 + $0x32] sm:$0xff]  ;;  %v6444_v59 = vld [vmem:[#allocation2 + $0x4a] sm:$0xff] }
 0x427   : > { %v6440_v37 = vld [vmem:[#allocation2 + $0x52] sm:$0xff]  ;;  %v6448_v60 = vld [vmem:[#allocation2 + $0x6a] sm:$0xff]  ;;  %v6452_v41 = vld [vmem:[#allocation2 + $0x62] sm:$0xff] }
 0x428   : > { %2875 = vrot.lane.b32.xlu1 %v2784_v14, %s4851_s21  ;;  %v2960_v17 = vld [vmem:[#allocation2 + $0x82] sm:$0xff]  ;;  %v2959_v49 = vld [vmem:[#allocation2 + $0x7a] sm:$0xff]  ;;  %v2961_v14 = vld [vmem:[#allocation2 + $0x92] sm:$0xff] }
 0x429   : > { %v2962_v1 = vld [vmem:[#allocation2 + $0x9a] sm:$0xff]  ;;  %v2965_v36 = vld [vmem:[#allocation2 + $0xc2] sm:$0xff]  ;;  %v6476_v27 = vld [vmem:[#allocation2 + $0xf2] sm:$0xff] }
 0x42a   : > { %2873 = vrot.lane.b32.xlu0 %v2783_v31, %s4851_s21  ;;  %v2964_v31 = vld [vmem:[#allocation2 + $0xb2] sm:$0xff]  ;;  %v6464_v25 = vld [vmem:[#allocation2 + $0xe2] sm:$0xff]  ;;  %v2978_v26 = vld [vmem:[#allocation2 + $0x15a] sm:$0xff] }
 0x42b   : > { %v2977_v46 = vld [vmem:[#allocation2 + $0x152] sm:$0xff] }
 0x42c   : > { %2879 = vrot.lane.b32.xlu1 %v2786_v52, %s4851_s21  ;;  %v2963_v52 = vld [vmem:[#allocation2 + $0xaa] sm:$0xff] }
 0x42e   : > { %2877 = vrot.lane.b32.xlu0 %v2785_v4, %s4851_s21  ;;  %v2966_v4 = vld [vmem:[#allocation2 + $0xca] sm:$0xff] }
 0x430   : > { %2883 = vrot.lane.b32.xlu1 %v2788_v55, %s4851_s21  ;;  %v6468_v55 = vld [vmem:[#allocation2 + $0xda] sm:$0xff] }
 0x432   : > { %2881 = vrot.lane.b32.xlu0 %v2787_v2, %s4851_s21  ;;  %v6472_v2 = vld [vmem:[#allocation2 + $0xfa] sm:$0xff] }
 0x434   : > { %3015 = vrot.lane.b32.xlu1 %v2950_v3, %s4852_s22  ;;  %v6480_v3 = vld [vmem:[#allocation2 + $0x112] sm:$0xff] }
 0x436   : > { %3013 = vrot.lane.b32.xlu0 %v2949_v15, %s4852_s22  ;;  %v6484_v15 = vld [vmem:[#allocation2 + $0x10a] sm:$0xff] }
 0x438   : > { %3019 = vrot.lane.b32.xlu1 %v6424_v39, %s4852_s22 }
 0x43a   : > { %3017 = vrot.lane.b32.xlu0 %v6428_v10, %s4852_s22 }
 0x43c   : > { %3023 = vrot.lane.b32.xlu1 %v6432_v45, %s4852_s22 }
 0x43e   : > { %3021 = vrot.lane.b32.xlu0 %v6436_v61, %s4852_s22 }
 0x440   : > { %3027 = vrot.lane.b32.xlu1 %v6440_v37, %s4852_s22 }
 0x442   : > { %3025 = vrot.lane.b32.xlu0 %v6444_v59, %s4852_s22 }
 0x444   : > { %3031 = vrot.lane.b32.xlu1 %v6448_v60, %s4852_s22 }
 0x446   : > { %3029 = vrot.lane.b32.xlu0 %v6452_v41, %s4852_s22 }
 0x448   : > { %3035 = vrot.lane.b32.xlu1 %v2960_v17, %s4852_s22  ;;  %v6488_v17 = vld [vmem:[#allocation2 + $0x12a] sm:$0xff] }
 0x44a   : > { %3033 = vrot.lane.b32.xlu0 %v2959_v49, %s4852_s22  ;;  %v6492_v49 = vld [vmem:[#allocation2 + $0x122] sm:$0xff] }
 0x44c   : > { %3039 = vrot.lane.b32.xlu1 %v2962_v1, %s4852_s22 }
 0x44e   : > { %3037 = vrot.lane.b32.xlu0 %v2961_v14, %s4852_s22 }
 0x450   : > { %3043 = vrot.lane.b32.xlu1 %v2964_v31, %s4852_s22  ;;  %v2976_v31 = vld [vmem:[#allocation2 + $0x142] sm:$0xff] }
 0x452   : > { %3041 = vrot.lane.b32.xlu0 %v2963_v52, %s4852_s22  ;;  %v2975_v52 = vld [vmem:[#allocation2 + $0x13a] sm:$0xff] }
 0x454   : > { %3047 = vrot.lane.b32.xlu1 %v2966_v4, %s4852_s22 }
 0x456   : > { %3045 = vrot.lane.b32.xlu0 %v2965_v36, %s4852_s22 }
 0x458   : > { %3051 = vrot.lane.b32.xlu1 %v6464_v25, %s4852_s22 }
 0x45a   : > { %3049 = vrot.lane.b32.xlu0 %v6468_v55, %s4852_s22 }
 0x45c   : > { %3055 = vrot.lane.b32.xlu1 %v6472_v2, %s4852_s22 }
 0x45e   : > { %3053 = vrot.lane.b32.xlu0 %v6476_v27, %s4852_s22 }
 0x460   : > { %3059 = vrot.lane.b32.xlu1 %v6480_v3, %s4852_s22 }
 0x462   : > { %3057 = vrot.lane.b32.xlu0 %v6484_v15, %s4852_s22 }
 0x464   : > { %3063 = vrot.lane.b32.xlu1 %v6488_v17, %s4852_s22 }
 0x466   : > { %3061 = vrot.lane.b32.xlu0 %v6492_v49, %s4852_s22  ;;  %v2824_v1 = vpop.permute.xlu1 %2823 }
 0x467   : > { %2918 = vst.msk [vmem:[#allocation3 + $0x8] sm:$0xff] %vm566_vm2, %v2824_v1 }
 0x468   : > { %v2822_v14 = vpop.permute.xlu0 %2821  ;;  %3067 = vrot.lane.b32.xlu1 %v2976_v31, %s4852_s22  ;;  %v2980_v31 = vld [vmem:[#allocation2 + $0x172] sm:$0xff] }
 0x469   : > { %2917 = vst.msk [vmem:[#allocation3] sm:$0xff] %vm566_vm2, %v2822_v14 }
 0x46a   : > { %3065 = vrot.lane.b32.xlu0 %v2975_v52, %s4852_s22  ;;  %v2828_v4 = vpop.permute.xlu1 %2827  ;;  %v2979_v52 = vld [vmem:[#allocation2 + $0x16a] sm:$0xff] }
 0x46b   : > { %2920 = vst.msk [vmem:[#allocation3 + $0x18] sm:$0xff] %vm566_vm2, %v2828_v4 }
 0x46c   : > { %v2826_v36 = vpop.permute.xlu0 %2825  ;;  %3071 = vrot.lane.b32.xlu1 %v2978_v26, %s4852_s22 }
 0x46d   : > { %2919 = vst.msk [vmem:[#allocation3 + $0x10] sm:$0xff] %vm566_vm2, %v2826_v36 }
 0x46e   : > { %3069 = vrot.lane.b32.xlu0 %v2977_v46, %s4852_s22  ;;  %v2832_v1 = vpop.permute.xlu1 %2831 }
 0x46f   : > { %2922 = vst.msk [vmem:[#allocation3 + $0x28] sm:$0xff] %vm566_vm2, %v2832_v1 }
 0x470   : > { %v2830_v14 = vpop.permute.xlu0 %2829  ;;  %3075 = vrot.lane.b32.xlu1 %v2980_v31, %s4852_s22 }
 0x471   : > { %2921 = vst.msk [vmem:[#allocation3 + $0x20] sm:$0xff] %vm566_vm2, %v2830_v14 }
 0x472   : > { %3073 = vrot.lane.b32.xlu0 %v2979_v52, %s4852_s22  ;;  %v2836_v4 = vpop.permute.xlu1 %2835  ;;  %s197_s22 = scalar_lea.vmem %s7104_s4, %s4637_s19 }
 0x473   : > { %2924 = vst.msk [vmem:[#allocation3 + $0x38] sm:$0xff] %vm566_vm2, %v2836_v4 }
 0x474   : > { %v2834_v36 = vpop.permute.xlu0 %2833  ;;  %3207 = vrot.lane.b32.xlu1 %v6243_v57, %s4853_s23 }
 0x475   : > { %2923 = vst.msk [vmem:[#allocation3 + $0x30] sm:$0xff] %vm566_vm2, %v2834_v36 }
 0x476   : > { %3205 = vrot.lane.b32.xlu0 %v6276_v32, %s4853_s23  ;;  %v2840_v46 = vpop.permute.xlu1 %2839 }
 0x477   : > { %2926 = vst.msk [vmem:[#allocation3 + $0x48] sm:$0xff] %vm566_vm2, %v2840_v46 }
 0x478   : > { %v2838_v26 = vpop.permute.xlu0 %2837  ;;  %3211 = vrot.lane.b32.xlu1 %v6250_v47, %s4853_s23 }
 0x479   : > { %2925 = vst.msk [vmem:[#allocation3 + $0x40] sm:$0xff] %vm566_vm2, %v2838_v26 }
 0x47a   : > { %3209 = vrot.lane.b32.xlu0 %v6302_v54, %s4853_s23  ;;  %v2844_v1 = vpop.permute.xlu1 %2843 }
 0x47b   : > { %2928 = vst.msk [vmem:[#allocation3 + $0x58] sm:$0xff] %vm566_vm2, %v2844_v1 }
 0x47c   : > { %v2842_v14 = vpop.permute.xlu0 %2841  ;;  %3215 = vrot.lane.b32.xlu1 %v6257_v11, %s4853_s23 }
 0x47d   : > { %2927 = vst.msk [vmem:[#allocation3 + $0x50] sm:$0xff] %vm566_vm2, %v2842_v14 }
 0x47e   : > { %3213 = vrot.lane.b32.xlu0 %v6318_v40, %s4853_s23  ;;  %v2848_v57 = vpop.permute.xlu1 %2847 }
 0x47f   : > { %2930 = vst.msk [vmem:[#allocation3 + $0x68] sm:$0xff] %vm566_vm2, %v2848_v57 }
 0x480   : > { %v2846_v32 = vpop.permute.xlu0 %2845  ;;  %3219 = vrot.lane.b32.xlu1 %v6261_v12, %s4853_s23 }
 0x481   : > { %2929 = vst.msk [vmem:[#allocation3 + $0x60] sm:$0xff] %vm566_vm2, %v2846_v32 }
 0x482   : > { %3217 = vrot.lane.b32.xlu0 %v6320_v56, %s4853_s23  ;;  %v2852_v31 = vpop.permute.xlu1 %2851 }
 0x483   : > { %2932 = vst.msk [vmem:[#allocation3 + $0x78] sm:$0xff] %vm566_vm2, %v2852_v31 }
 0x484   : > { %v2850_v52 = vpop.permute.xlu0 %2849  ;;  %3223 = vrot.lane.b32.xlu1 %v6268_v8, %s4853_s23 }
 0x485   : > { %2931 = vst.msk [vmem:[#allocation3 + $0x70] sm:$0xff] %vm566_vm2, %v2850_v52 }
 0x486   : > { %3221 = vrot.lane.b32.xlu0 %v6340_v28, %s4853_s23  ;;  %v2856_v4 = vpop.permute.xlu1 %2855 }
 0x487   : > { %2934 = vst.msk [vmem:[#allocation3 + $0x88] sm:$0xff] %vm566_vm2, %v2856_v4 }
 0x488   : > { %v2854_v36 = vpop.permute.xlu0 %2853  ;;  %3227 = vrot.lane.b32.xlu1 %v6274_v30, %s4853_s23 }
 0x489   : > { %2933 = vst.msk [vmem:[#allocation3 + $0x80] sm:$0xff] %vm566_vm2, %v2854_v36 }
 0x48a   : > { %3225 = vrot.lane.b32.xlu0 %v6342_v29, %s4853_s23  ;;  %v2860_v46 = vpop.permute.xlu1 %2859 }
 0x48b   : > { %2936 = vst.msk [vmem:[#allocation3 + $0x98] sm:$0xff] %vm566_vm2, %v2860_v46 }
 0x48c   : > { %v2858_v26 = vpop.permute.xlu0 %2857  ;;  %3231 = vrot.lane.b32.xlu1 %v6282_v7, %s4853_s23 }
 0x48d   : > { %2935 = vst.msk [vmem:[#allocation3 + $0x90] sm:$0xff] %vm566_vm2, %v2858_v26 }
 0x48e   : > { %3229 = vrot.lane.b32.xlu0 %v6353_v16, %s4853_s23  ;;  %v2864_v1 = vpop.permute.xlu1 %2863 }
 0x48f   : > { %2938 = vst.msk [vmem:[#allocation3 + $0xa8] sm:$0xff] %vm566_vm2, %v2864_v1 }
 0x490   : > { %v2862_v14 = vpop.permute.xlu0 %2861  ;;  %3235 = vrot.lane.b32.xlu1 %v6289_v13, %s4853_s23 }
 0x491   : > { %2937 = vst.msk [vmem:[#allocation3 + $0xa0] sm:$0xff] %vm566_vm2, %v2862_v14 }
 0x492   : > { %3233 = vrot.lane.b32.xlu0 %v6362_v33, %s4853_s23  ;;  %v2868_v30 = vpop.permute.xlu1 %2867 }
 0x493   : > { %2940 = vst.msk [vmem:[#allocation3 + $0xb8] sm:$0xff] %vm566_vm2, %v2868_v30 }
 0x494   : > { %v2866_v57 = vpop.permute.xlu0 %2865  ;;  %3239 = vrot.lane.b32.xlu1 %v6295_v35, %s4853_s23 }
 0x495   : > { %2939 = vst.msk [vmem:[#allocation3 + $0xb0] sm:$0xff] %vm566_vm2, %v2866_v57 }
 0x496   : > { %3237 = vrot.lane.b32.xlu0 %v6373_v63, %s4853_s23  ;;  %v2872_v7 = vpop.permute.xlu1 %2871 }
 0x497   : > { %2942 = vst.msk [vmem:[#allocation3 + $0xc8] sm:$0xff] %vm566_vm2, %v2872_v7 }
 0x498   : > { %v2870_v16 = vpop.permute.xlu0 %2869  ;;  %3429 = vrot.lane.b32.xlu1 %v6309_v62, %s4854_s24 }
 0x499   : > { %2941 = vst.msk [vmem:[#allocation3 + $0xc0] sm:$0xff] %vm566_vm2, %v2870_v16 }
 0x49a   : > { %3241 = vrot.lane.b32.xlu0 %v6379_v5, %s4853_s23  ;;  %v2876_v13 = vpop.permute.xlu1 %2875 }
 0x49b   : > { %2944 = vst.msk [vmem:[#allocation3 + $0xd8] sm:$0xff] %vm566_vm2, %v2876_v13 }
 0x49c   : > { %v2874_v33 = vpop.permute.xlu0 %2873  ;;  %3397 = vrot.lane.b32.xlu1 %v6203_v34, %s4854_s24 }
 0x49d   : > { %2943 = vst.msk [vmem:[#allocation3 + $0xd0] sm:$0xff] %vm566_vm2, %v2874_v33 }
 0x49e   : > { %3431 = vrot.lane.b32.xlu0 %v6300_v6, %s4854_s24  ;;  %v2880_v35 = vpop.permute.xlu1 %2879 }
 0x49f   : > { %2946 = vst.msk [vmem:[#allocation3 + $0xe8] sm:$0xff] %vm566_vm2, %v2880_v35 }
 0x4a0   : > { %v2878_v63 = vpop.permute.xlu0 %2877  ;;  %3621 = vrot.lane.b32.xlu1 %v6468_v55, %s4855_s29 }
 0x4a1   : > { %2945 = vst.msk [vmem:[#allocation3 + $0xe0] sm:$0xff] %vm566_vm2, %v2878_v63 }
 0x4a2   : > { %3399 = vrot.lane.b32.xlu0 %v6199_v9, %s4854_s24  ;;  %v2884_v62 = vpop.permute.xlu1 %2883 }
 0x4a3   : > { %2948 = vst.msk [vmem:[#allocation3 + $0xf8] sm:$0xff] %vm566_vm2, %v2884_v62 }
 0x4a4   : > { %v2882_v32 = vpop.permute.xlu0 %2881  ;;  %3589 = vrot.lane.b32.xlu1 %v6428_v10, %s4855_s29 }
 0x4a5   : > { %2947 = vst.msk [vmem:[#allocation3 + $0xf0] sm:$0xff] %vm566_vm2, %v2882_v32 }
 0x4a6   : > { %3623 = vrot.lane.b32.xlu0 %v6464_v25, %s4855_s29  ;;  %v3016_v34 = vpop.permute.xlu1 %3015 }
 0x4a7   : > { %3110 = vst.msk [vmem:[#allocation3 + $0x8] sm:$0xff] %vm759_vm3, %v3016_v34 }
 0x4a8   : > { %v3014_v6 = vpop.permute.xlu0 %3013  ;;  %3813 = vrot.lane.b32.xlu1 %v6379_v5, %s4856_s8 }
 0x4a9   : > { %3109 = vst.msk [vmem:[#allocation3] sm:$0xff] %vm759_vm3, %v3014_v6 }
 0x4aa   : > { %3591 = vrot.lane.b32.xlu0 %v6424_v39, %s4855_s29  ;;  %v3020_v9 = vpop.permute.xlu1 %3019 }
 0x4ab   : > { %3112 = vst.msk [vmem:[#allocation3 + $0x18] sm:$0xff] %vm759_vm3, %v3020_v9 }
 0x4ac   : > { %v3018_v55 = vpop.permute.xlu0 %3017  ;;  %3781 = vrot.lane.b32.xlu1 %v6302_v54, %s4856_s8 }
 0x4ad   : > { %3111 = vst.msk [vmem:[#allocation3 + $0x10] sm:$0xff] %vm759_vm3, %v3018_v55  ;;  %v3930_v55 = vld [vmem:[#allocation2 + $0x129] sm:$0xff] }
 0x4ae   : > { %3815 = vrot.lane.b32.xlu0 %v6297_v44, %s4856_s8  ;;  %v3024_v10 = vpop.permute.xlu1 %3023 }
 0x4af   : > { %3114 = vst.msk [vmem:[#allocation3 + $0x28] sm:$0xff] %vm759_vm3, %v3024_v10  ;;  %v3929_v10 = vld [vmem:[#allocation2 + $0x121] sm:$0xff] }
 0x4b0   : > { %v3022_v25 = vpop.permute.xlu0 %3021  ;;  %4005 = vrot.lane.b32.xlu1 %v6369_v50, %s4857_s9 }
 0x4b1   : > { %3113 = vst.msk [vmem:[#allocation3 + $0x20] sm:$0xff] %vm759_vm3, %v3022_v25 }
 0x4b2   : > { %3783 = vrot.lane.b32.xlu0 %v6250_v47, %s4856_s8  ;;  %v3028_v5 = vpop.permute.xlu1 %3027 }
 0x4b3   : > { %3116 = vst.msk [vmem:[#allocation3 + $0x38] sm:$0xff] %vm759_vm3, %v3028_v5 }
 0x4b4   : > { %v3026_v39 = vpop.permute.xlu0 %3025  ;;  %3973 = vrot.lane.b32.xlu1 %v6211_v23, %s4857_s9 }
 0x4b5   : > { %3115 = vst.msk [vmem:[#allocation3 + $0x30] sm:$0xff] %vm759_vm3, %v3026_v39 }
 0x4b6   : > { %4007 = vrot.lane.b32.xlu0 %v6358_v48, %s4857_s9  ;;  %v3032_v54 = vpop.permute.xlu1 %3031 }
 0x4b7   : > { %3118 = vst.msk [vmem:[#allocation3 + $0x48] sm:$0xff] %vm759_vm3, %v3032_v54 }
 0x4b8   : > { %v3030_v31 = vpop.permute.xlu0 %3029  ;;  %4197 = vrot.lane.b32.xlu1 %v6476_v27, %s4858_s12 }
 0x4b9   : > { %3117 = vst.msk [vmem:[#allocation3 + $0x40] sm:$0xff] %vm759_vm3, %v3030_v31 }
 0x4ba   : > { %3975 = vrot.lane.b32.xlu0 %v6207_v0, %s4857_s9  ;;  %v3036_v47 = vpop.permute.xlu1 %3035 }
 0x4bb   : > { %3120 = vst.msk [vmem:[#allocation3 + $0x58] sm:$0xff] %vm759_vm3, %v3036_v47 }
 0x4bc   : > { %v3034_v52 = vpop.permute.xlu0 %3033  ;;  %4165 = vrot.lane.b32.xlu1 %v6436_v61, %s4858_s12 }
 0x4bd   : > { %3119 = vst.msk [vmem:[#allocation3 + $0x50] sm:$0xff] %vm759_vm3, %v3034_v52 }
 0x4be   : > { %4199 = vrot.lane.b32.xlu0 %v6472_v2, %s4858_s12  ;;  %v3040_v4 = vpop.permute.xlu1 %3039 }
 0x4bf   : > { %3122 = vst.msk [vmem:[#allocation3 + $0x68] sm:$0xff] %vm759_vm3, %v3040_v4 }
 0x4c0   : > { %v3038_v36 = vpop.permute.xlu0 %3037  ;;  %3243 = vrot.lane.b32.xlu1 %v6297_v44, %s4853_s23 }
 0x4c1   : > { %3121 = vst.msk [vmem:[#allocation3 + $0x60] sm:$0xff] %vm759_vm3, %v3038_v36 }
 0x4c2   : > { %4167 = vrot.lane.b32.xlu0 %v6432_v45, %s4858_s12  ;;  %v3044_v46 = vpop.permute.xlu1 %3043 }
 0x4c3   : > { %3124 = vst.msk [vmem:[#allocation3 + $0x78] sm:$0xff] %vm759_vm3, %v3044_v46 }
 0x4c4   : > { %v3042_v26 = vpop.permute.xlu0 %3041  ;;  %3435 = vrot.lane.b32.xlu1 %v6358_v48, %s4854_s24 }
 0x4c5   : > { %3123 = vst.msk [vmem:[#allocation3 + $0x70] sm:$0xff] %vm759_vm3, %v3042_v26 }
 0x4c6   : > { %3433 = vrot.lane.b32.xlu0 %v6369_v50, %s4854_s24  ;;  %v3048_v1 = vpop.permute.xlu1 %3047 }
 0x4c7   : > { %3126 = vst.msk [vmem:[#allocation3 + $0x88] sm:$0xff] %vm759_vm3, %v3048_v1 }
 0x4c8   : > { %v3046_v14 = vpop.permute.xlu0 %3045  ;;  %3403 = vrot.lane.b32.xlu1 %v6207_v0, %s4854_s24 }
 0x4c9   : > { %3125 = vst.msk [vmem:[#allocation3 + $0x80] sm:$0xff] %vm759_vm3, %v3046_v14  ;;  %v3532_v14 = vld [vmem:[#allocation2 + $0x6a] sm:$0xff] }
 0x4ca   : > { %3401 = vrot.lane.b32.xlu0 %v6211_v23, %s4854_s24  ;;  %v3052_v44 = vpop.permute.xlu1 %3051 }
 0x4cb   : > { %3128 = vst.msk [vmem:[#allocation3 + $0x98] sm:$0xff] %vm759_vm3, %v3052_v44  ;;  %v3531_v44 = vld [vmem:[#allocation2 + $0x62] sm:$0xff] }
 0x4cc   : > { %v3050_v30 = vpop.permute.xlu0 %3049  ;;  %3627 = vrot.lane.b32.xlu1 %v6472_v2, %s4855_s29 }
 0x4cd   : > { %3127 = vst.msk [vmem:[#allocation3 + $0x90] sm:$0xff] %vm759_vm3, %v3050_v30 }
 0x4ce   : > { %3625 = vrot.lane.b32.xlu0 %v6476_v27, %s4855_s29  ;;  %v3056_v48 = vpop.permute.xlu1 %3055 }
 0x4cf   : > { %3130 = vst.msk [vmem:[#allocation3 + $0xa8] sm:$0xff] %vm759_vm3, %v3056_v48 }
 0x4d0   : > { %v3054_v50 = vpop.permute.xlu0 %3053  ;;  %3595 = vrot.lane.b32.xlu1 %v6432_v45, %s4855_s29 }
 0x4d1   : > { %3129 = vst.msk [vmem:[#allocation3 + $0xa0] sm:$0xff] %vm759_vm3, %v3054_v50 }
 0x4d2   : > { %3593 = vrot.lane.b32.xlu0 %v6436_v61, %s4855_s29  ;;  %v3060_v0 = vpop.permute.xlu1 %3059 }
 0x4d3   : > { %3132 = vst.msk [vmem:[#allocation3 + $0xb8] sm:$0xff] %vm759_vm3, %v3060_v0 }
 0x4d4   : > { %v3058_v23 = vpop.permute.xlu0 %3057  ;;  %3819 = vrot.lane.b32.xlu1 %v6314_v21, %s4856_s8 }
 0x4d5   : > { %3131 = vst.msk [vmem:[#allocation3 + $0xb0] sm:$0xff] %vm759_vm3, %v3058_v23  ;;  %v3932_v23 = vld [vmem:[#allocation2 + $0x141] sm:$0xff] }
 0x4d6   : > { %3817 = vrot.lane.b32.xlu0 %v6383_v51, %s4856_s8  ;;  %v3064_v2 = vpop.permute.xlu1 %3063 }
 0x4d7   : > { %3134 = vst.msk [vmem:[#allocation3 + $0xc8] sm:$0xff] %vm759_vm3, %v3064_v2  ;;  %v3931_v2 = vld [vmem:[#allocation2 + $0x139] sm:$0xff] }
 0x4d8   : > { %v3062_v27 = vpop.permute.xlu0 %3061  ;;  %3787 = vrot.lane.b32.xlu1 %v6257_v11, %s4856_s8 }
 0x4d9   : > { %3133 = vst.msk [vmem:[#allocation3 + $0xc0] sm:$0xff] %vm759_vm3, %v3062_v27 }
 0x4da   : > { %3785 = vrot.lane.b32.xlu0 %v6318_v40, %s4856_s8  ;;  %v3068_v45 = vpop.permute.xlu1 %3067 }
 0x4db   : > { %3136 = vst.msk [vmem:[#allocation3 + $0xd8] sm:$0xff] %vm759_vm3, %v3068_v45  ;;  %v3916_v45 = vld [vmem:[#allocation2 + $0x81] sm:$0xff] }
 0x4dc   : > { %v3066_v61 = vpop.permute.xlu0 %3065  ;;  %4011 = vrot.lane.b32.xlu1 %v6385_v18, %s4857_s9 }
 0x4dd   : > { %3135 = vst.msk [vmem:[#allocation3 + $0xd0] sm:$0xff] %vm759_vm3, %v3066_v61 }
 0x4de   : > { %4009 = vrot.lane.b32.xlu0 %v6393_v53, %s4857_s9  ;;  %v3072_v57 = vpop.permute.xlu1 %3071 }
 0x4df   : > { %3138 = vst.msk [vmem:[#allocation3 + $0xe8] sm:$0xff] %vm759_vm3, %v3072_v57 }
 0x4e0   : > { %v3070_v7 = vpop.permute.xlu0 %3069  ;;  %3979 = vrot.lane.b32.xlu1 %v6216_v58, %s4857_s9 }
 0x4e1   : > { %3137 = vst.msk [vmem:[#allocation3 + $0xe0] sm:$0xff] %vm759_vm3, %v3070_v7  ;;  %v3915_v7 = vld [vmem:[#allocation2 + $0x79] sm:$0xff] }
 0x4e2   : > { %3977 = vrot.lane.b32.xlu0 %v6221_v22, %s4857_s9  ;;  %v3076_v11 = vpop.permute.xlu1 %3075 }
 0x4e3   : > { %3140 = vst.msk [vmem:[#allocation3 + $0xf8] sm:$0xff] %vm759_vm3, %v3076_v11 }
 0x4e4   : > { %v3074_v40 = vpop.permute.xlu0 %3073  ;;  %4203 = vrot.lane.b32.xlu1 %v6480_v3, %s4858_s12 }
 0x4e5   : > { %3139 = vst.msk [vmem:[#allocation3 + $0xf0] sm:$0xff] %vm759_vm3, %v3074_v40 }
 0x4e6   : > { %4201 = vrot.lane.b32.xlu0 %v6484_v15, %s4858_s12  ;;  %v3208_v16 = vpop.permute.xlu1 %3207 }
 0x4e7   : > { %3302 = vst.msk [vmem:[#allocation3 + $0x8] sm:$0xff] %vm952_vm5, %v3208_v16 }
 0x4e8   : > { %v3206_v13 = vpop.permute.xlu0 %3205  ;;  %4171 = vrot.lane.b32.xlu1 %v6440_v37, %s4858_s12 }
 0x4e9   : > { %3301 = vst.msk [vmem:[#allocation3] sm:$0xff] %vm952_vm5, %v3206_v13  ;;  %v4124_v13 = vld [vmem:[#allocation2 + $0x142] sm:$0xff] }
 0x4ea   : > { %4169 = vrot.lane.b32.xlu0 %v6444_v59, %s4858_s12  ;;  %v3212_v58 = vpop.permute.xlu1 %3211 }
 0x4eb   : > { %3304 = vst.msk [vmem:[#allocation3 + $0x18] sm:$0xff] %vm952_vm5, %v3212_v58 }
 0x4ec   : > { %v3210_v22 = vpop.permute.xlu0 %3209  ;;  %3247 = vrot.lane.b32.xlu1 %v6314_v21, %s4853_s23  ;;  %v3338_v21 = vld [vmem:[#allocation2 + $0x51] sm:$0xff] }
 0x4ed   : > { %3303 = vst.msk [vmem:[#allocation3 + $0x10] sm:$0xff] %vm952_vm5, %v3210_v22 }
 0x4ee   : > { %3245 = vrot.lane.b32.xlu0 %v6383_v51, %s4853_s23  ;;  %v3216_v33 = vpop.permute.xlu1 %3215  ;;  %v3337_v51 = vld [vmem:[#allocation2 + $0x49] sm:$0xff] }
 0x4ef   : > { %3306 = vst.msk [vmem:[#allocation3 + $0x28] sm:$0xff] %vm952_vm5, %v3216_v33  ;;  %v4123_v33 = vld [vmem:[#allocation2 + $0x13a] sm:$0xff] }
 0x4f0   : > { %v3214_v35 = vpop.permute.xlu0 %3213  ;;  %3439 = vrot.lane.b32.xlu1 %v6385_v18, %s4854_s24 }
 0x4f1   : > { %3305 = vst.msk [vmem:[#allocation3 + $0x20] sm:$0xff] %vm952_vm5, %v3214_v35 }
 0x4f2   : > { %3437 = vrot.lane.b32.xlu0 %v6393_v53, %s4854_s24  ;;  %v3220_v63 = vpop.permute.xlu1 %3219 }
 0x4f3   : > { %3308 = vst.msk [vmem:[#allocation3 + $0x38] sm:$0xff] %vm952_vm5, %v3220_v63 }
 0x4f4   : > { %v3218_v62 = vpop.permute.xlu0 %3217  ;;  %3407 = vrot.lane.b32.xlu1 %v3338_v21, %s4854_s24  ;;  %v4108_v21 = vld [vmem:[#allocation2 + $0x82] sm:$0xff] }
 0x4f5   : > { %3307 = vst.msk [vmem:[#allocation3 + $0x30] sm:$0xff] %vm952_vm5, %v3218_v62 }
 0x4f6   : > { %3405 = vrot.lane.b32.xlu0 %v3337_v51, %s4854_s24  ;;  %v3224_v32 = vpop.permute.xlu1 %3223  ;;  %v4107_v51 = vld [vmem:[#allocation2 + $0x7a] sm:$0xff] }
 0x4f7   : > { %3310 = vst.msk [vmem:[#allocation3 + $0x48] sm:$0xff] %vm952_vm5, %v3224_v32 }
 0x4f8   : > { %v3222_v34 = vpop.permute.xlu0 %3221  ;;  %3631 = vrot.lane.b32.xlu1 %v6480_v3, %s4855_s29 }
 0x4f9   : > { %3309 = vst.msk [vmem:[#allocation3 + $0x40] sm:$0xff] %vm952_vm5, %v3222_v34 }
 0x4fa   : > { %3629 = vrot.lane.b32.xlu0 %v6484_v15, %s4855_s29  ;;  %v3228_v18 = vpop.permute.xlu1 %3227 }
 0x4fb   : > { %3312 = vst.msk [vmem:[#allocation3 + $0x58] sm:$0xff] %vm952_vm5, %v3228_v18 }
 0x4fc   : > { %v3226_v53 = vpop.permute.xlu0 %3225  ;;  %3599 = vrot.lane.b32.xlu1 %v6440_v37, %s4855_s29 }
 0x4fd   : > { %3311 = vst.msk [vmem:[#allocation3 + $0x50] sm:$0xff] %vm952_vm5, %v3226_v53 }
 0x4fe   : > { %3597 = vrot.lane.b32.xlu0 %v6444_v59, %s4855_s29  ;;  %v3232_v6 = vpop.permute.xlu1 %3231 }
 0x4ff   : > { %3314 = vst.msk [vmem:[#allocation3 + $0x68] sm:$0xff] %vm952_vm5, %v3232_v6 }
 0x500   : > { %v3230_v9 = vpop.permute.xlu0 %3229  ;;  %3823 = vrot.lane.b32.xlu1 %v6316_v20, %s4856_s8 }
 0x501   : > { %3313 = vst.msk [vmem:[#allocation3 + $0x60] sm:$0xff] %vm952_vm5, %v3230_v9 }
 0x502   : > { %3821 = vrot.lane.b32.xlu0 %v6389_v43, %s4856_s8  ;;  %v3236_v3 = vpop.permute.xlu1 %3235 }
 0x503   : > { %3316 = vst.msk [vmem:[#allocation3 + $0x78] sm:$0xff] %vm952_vm5, %v3236_v3 }
 0x504   : > { %v3234_v15 = vpop.permute.xlu0 %3233  ;;  %3791 = vrot.lane.b32.xlu1 %v6261_v12, %s4856_s8  ;;  %v3914_v12 = vld [vmem:[#allocation2 + $0x69] sm:$0xff] }
 0x505   : > { %3315 = vst.msk [vmem:[#allocation3 + $0x70] sm:$0xff] %vm952_vm5, %v3234_v15 }
 0x506   : > { %3789 = vrot.lane.b32.xlu0 %v6320_v56, %s4856_s8  ;;  %v3240_v37 = vpop.permute.xlu1 %3239  ;;  %v3913_v56 = vld [vmem:[#allocation2 + $0x61] sm:$0xff] }
 0x507   : > { %3318 = vst.msk [vmem:[#allocation3 + $0x88] sm:$0xff] %vm952_vm5, %v3240_v37 }
 0x508   : > { %v3238_v59 = vpop.permute.xlu0 %3237  ;;  %4015 = vrot.lane.b32.xlu1 %v3930_v55, %s4857_s9 }
 0x509   : > { %3317 = vst.msk [vmem:[#allocation3 + $0x80] sm:$0xff] %vm952_vm5, %v3238_v59 }
 0x50a   : > { %4013 = vrot.lane.b32.xlu0 %v3929_v10, %s4857_s9  ;;  %v3430_v25 = vpop.permute.xlu1 %3429 }
 0x50b   : > { %3509 = vst.msk [vmem:[#allocation3 + $0x80] sm:$0xff] %vm1145_vm6, %v3430_v25  ;;  %v3726_v25 = vld [vmem:[#allocation2 + $0x98] sm:$0xff] }
 0x50c   : > { %v3242_v5 = vpop.permute.xlu0 %3241  ;;  %3983 = vrot.lane.b32.xlu1 %v3914_v12, %s4857_s9 }
 0x50d   : > { %3319 = vst.msk [vmem:[#allocation3 + $0x90] sm:$0xff] %vm952_vm5, %v3242_v5 }
 0x50e   : > { %3981 = vrot.lane.b32.xlu0 %v3913_v56, %s4857_s9  ;;  %v3398_v39 = vpop.permute.xlu1 %3397 }
 0x50f   : > { %3493 = vst.msk [vmem:[#allocation3] sm:$0xff] %vm1145_vm6, %v3398_v39  ;;  %v3934_v39 = vld [vmem:[#allocation2 + $0x159] sm:$0xff] }
 0x510   : > { %v3432_v54 = vpop.permute.xlu0 %3431  ;;  %4207 = vrot.lane.b32.xlu1 %v6488_v17, %s4858_s12 }
 0x511   : > { %3510 = vst.msk [vmem:[#allocation3 + $0x88] sm:$0xff] %vm1145_vm6, %v3432_v54 }
 0x512   : > { %4205 = vrot.lane.b32.xlu0 %v6492_v49, %s4858_s12  ;;  %v3622_v31 = vpop.permute.xlu1 %3621 }
 0x513   : > { %3701 = vst.msk [vmem:[#allocation3 + $0x80] sm:$0xff] %vm1338_vm7, %v3622_v31  ;;  %v3933_v31 = vld [vmem:[#allocation2 + $0x151] sm:$0xff] }
 0x514   : > { %v3400_v47 = vpop.permute.xlu0 %3399  ;;  %4175 = vrot.lane.b32.xlu1 %v6448_v60, %s4858_s12 }
 0x515   : > { %3494 = vst.msk [vmem:[#allocation3 + $0x8] sm:$0xff] %vm1145_vm6, %v3400_v47 }
 0x516   : > { %4173 = vrot.lane.b32.xlu0 %v6452_v41, %s4858_s12  ;;  %v3590_v52 = vpop.permute.xlu1 %3589 }
 0x517   : > { %3685 = vst.msk [vmem:[#allocation3] sm:$0xff] %vm1338_vm7, %v3590_v52 }
 0x518   : > { %v3624_v4 = vpop.permute.xlu0 %3623  ;;  %3251 = vrot.lane.b32.xlu1 %v6316_v20, %s4853_s23 }
 0x519   : > { %3702 = vst.msk [vmem:[#allocation3 + $0x88] sm:$0xff] %vm1338_vm7, %v3624_v4 }
 0x51a   : > { %3249 = vrot.lane.b32.xlu0 %v6389_v43, %s4853_s23  ;;  %v3814_v36 = vpop.permute.xlu1 %3813 }
 0x51b   : > { %3893 = vst.msk [vmem:[#allocation3 + $0x80] sm:$0xff] %vm1532_vm8, %v3814_v36  ;;  %v3918_v36 = vld [vmem:[#allocation2 + $0x99] sm:$0xff] }
 0x51c   : > { %v3592_v46 = vpop.permute.xlu0 %3591  ;;  %3443 = vrot.lane.b32.xlu1 %v3930_v55, %s4854_s24 }
 0x51d   : > { %3686 = vst.msk [vmem:[#allocation3 + $0x8] sm:$0xff] %vm1338_vm7, %v3592_v46 }
 0x51e   : > { %3441 = vrot.lane.b32.xlu0 %v3929_v10, %s4854_s24  ;;  %v3782_v60 = vpop.permute.xlu1 %3781 }
 0x51f   : > { %3877 = vst.msk [vmem:[#allocation3] sm:$0xff] %vm1532_vm8, %v3782_v60  ;;  %v3917_v60 = vld [vmem:[#allocation2 + $0x91] sm:$0xff] }
 0x520   : > { %v3816_v41 = vpop.permute.xlu0 %3815  ;;  %3411 = vrot.lane.b32.xlu1 %v3914_v12, %s4854_s24 }
 0x521   : > { %3894 = vst.msk [vmem:[#allocation3 + $0x88] sm:$0xff] %vm1532_vm8, %v3816_v41 }
 0x522   : > { %3409 = vrot.lane.b32.xlu0 %v3913_v56, %s4854_s24  ;;  %v4006_v20 = vpop.permute.xlu1 %4005 }
 0x523   : > { %4085 = vst.msk [vmem:[#allocation3 + $0x80] sm:$0xff] %vm1725_vm9, %v4006_v20 }
 0x524   : > { %v3784_v43 = vpop.permute.xlu0 %3783  ;;  %3635 = vrot.lane.b32.xlu1 %v6488_v17, %s4855_s29 }
 0x525   : > { %3878 = vst.msk [vmem:[#allocation3 + $0x8] sm:$0xff] %vm1532_vm8, %v3784_v43 }
 0x526   : > { %3633 = vrot.lane.b32.xlu0 %v6492_v49, %s4855_s29  ;;  %v3974_v26 = vpop.permute.xlu1 %3973 }
 0x527   : > { %4069 = vst.msk [vmem:[#allocation3] sm:$0xff] %vm1725_vm9, %v3974_v26  ;;  %v4126_v26 = vld [vmem:[#allocation2 + $0x15a] sm:$0xff] }
 0x528   : > { %v4008_v1 = vpop.permute.xlu0 %4007  ;;  %3603 = vrot.lane.b32.xlu1 %v3532_v14, %s4855_s29 }
 0x529   : > { %4086 = vst.msk [vmem:[#allocation3 + $0x88] sm:$0xff] %vm1725_vm9, %v4008_v1  ;;  %v4125_v1 = vld [vmem:[#allocation2 + $0x152] sm:$0xff] }
 0x52a   : > { %3601 = vrot.lane.b32.xlu0 %v3531_v44, %s4855_s29  ;;  %v4198_v30 = vpop.permute.xlu1 %4197 }
 0x52b   : > { %4277 = vst.msk [vmem:[#allocation3 + $0x80] sm:$0xff] %vm1918_vm10, %v4198_v30  ;;  %v4110_v30 = vld [vmem:[#allocation2 + $0x9a] sm:$0xff] }
 0x52c   : > { %v3976_v48 = vpop.permute.xlu0 %3975  ;;  %3827 = vrot.lane.b32.xlu1 %v6334_v24, %s4856_s8 }
 0x52d   : > { %4070 = vst.msk [vmem:[#allocation3 + $0x8] sm:$0xff] %vm1725_vm9, %v3976_v48  ;;  %v4109_v48 = vld [vmem:[#allocation2 + $0x92] sm:$0xff] }
 0x52e   : > { %3825 = vrot.lane.b32.xlu0 %v6397_v19, %s4856_s8  ;;  %v4166_v17 = vpop.permute.xlu1 %4165 }
 0x52f   : > { %4261 = vst.msk [vmem:[#allocation3] sm:$0xff] %vm1918_vm10, %v4166_v17 }
 0x530   : > { %v4200_v49 = vpop.permute.xlu0 %4199  ;;  %3795 = vrot.lane.b32.xlu1 %v6268_v8, %s4856_s8 }
 0x531   : > { %4278 = vst.msk [vmem:[#allocation3 + $0x88] sm:$0xff] %vm1918_vm10, %v4200_v49 }
 0x532   : > { %3793 = vrot.lane.b32.xlu0 %v6340_v28, %s4856_s8  ;;  %v3244_v50 = vpop.permute.xlu1 %3243  ;;  %v4309_v61 = vld [vmem:[#allocation3 + $0x80] sm:$0xff] }
 0x533   : > { %3320 = vst.msk [vmem:[#allocation3 + $0x98] sm:$0xff] %vm952_vm5, %v3244_v50 }
 0x534   : > { %v4168_v0 = vpop.permute.xlu0 %4167  ;;  %4019 = vrot.lane.b32.xlu1 %v3932_v23, %s4857_s9 }
 0x535   : > { %4262 = vst.msk [vmem:[#allocation3 + $0x8] sm:$0xff] %vm1918_vm10, %v4168_v0 }
 0x536   : > { %4017 = vrot.lane.b32.xlu0 %v3931_v2, %s4857_s9  ;;  %v3436_v27 = vpop.permute.xlu1 %3435  ;;  %v4293_v58 = vld [vmem:[#allocation3] sm:$0xff] }
 0x537   : > { %3512 = vst.msk [vmem:[#allocation3 + $0x98] sm:$0xff] %vm1145_vm6, %v3436_v27 }
 0x538   : > { %v3434_v8 = vpop.permute.xlu0 %3433  ;;  %v4310_v57 = vld [vmem:[#allocation3 + $0x88] sm:$0xff]  ;;  %3987 = vrot.lane.b32.xlu1 %v3916_v45, %s4857_s9 }
 0x539   : > { %3511 = vst.msk [vmem:[#allocation3 + $0x90] sm:$0xff] %vm1145_vm6, %v3434_v8  ;;  %v4775_v11 = vpack.c.bf16 %v4310_v57, %v4309_v61  ;;  %v7111_v57 = vld [vmem:[#allocation4_spill] sm:$0xff] }
 0x53a   : > { %3985 = vrot.lane.b32.xlu0 %v3915_v7, %s4857_s9  ;;  %v3404_v40 = vpop.permute.xlu1 %3403 }
 0x53b   : > { %4777 = vmatprep.subr.msk.bf16.mxu1 %vm6791_vm12, %v4775_v11  ;;  %3496 = vst.msk [vmem:[#allocation3 + $0x18] sm:$0xff] %vm1145_vm6, %v3404_v40 }
 0x53c   : > { %v3402_v16 = vpop.permute.xlu0 %3401  ;;  %v4294_v22 = vld [vmem:[#allocation3 + $0x8] sm:$0xff]  ;;  %4211 = vrot.lane.b32.xlu1 %v4124_v13, %s4858_s12 }
 0x53d   : > { %3495 = vst.msk [vmem:[#allocation3 + $0x10] sm:$0xff] %vm1145_vm6, %v3402_v16  ;;  %v4778_v35 = vpack.c.bf16 %v4294_v22, %v4293_v58  ;;  %v3728_v16 = vld [vmem:[#allocation2 + $0xb0] sm:$0xff] }
 0x53e   : > { %4209 = vrot.lane.b32.xlu0 %v4123_v33, %s4858_s12  ;;  %v3628_v63 = vpop.permute.xlu1 %3627 }
 0x53f   : > { %4780 = vmatpush3.bf16.xpose.msk.msra.mxu1 %vm6791_vm12, %v4778_v35  ;;  %3704 = vst.msk [vmem:[#allocation3 + $0x98] sm:$0xff] %vm1338_vm7, %v3628_v63  ;;  %v3936_v35 = vld [vmem:[#allocation2 + $0x171] sm:$0xff] }
 0x540   : > { %v3626_v62 = vpop.permute.xlu0 %3625  ;;  %4179 = vrot.lane.b32.xlu1 %v4108_v21, %s4858_s12 }
 0x541   : > { %3703 = vst.msk [vmem:[#allocation3 + $0x90] sm:$0xff] %vm1338_vm7, %v3626_v62  ;;  %v3935_v62 = vld [vmem:[#allocation2 + $0x169] sm:$0xff] }
 0x542   : > { %4177 = vrot.lane.b32.xlu0 %v4107_v51, %s4858_s12  ;;  %v3596_v32 = vpop.permute.xlu1 %3595 }
 0x543   : > { %3688 = vst.msk [vmem:[#allocation3 + $0x18] sm:$0xff] %vm1338_vm7, %v3596_v32 }
 0x544   : > { %v3594_v34 = vpop.permute.xlu0 %3593  ;;  %3255 = vrot.lane.b32.xlu1 %v6334_v24, %s4853_s23 }
 0x545   : > { %3687 = vst.msk [vmem:[#allocation3 + $0x10] sm:$0xff] %vm1338_vm7, %v3594_v34 }
 0x546   : > { %3253 = vrot.lane.b32.xlu0 %v6397_v19, %s4853_s23  ;;  %v3820_v18 = vpop.permute.xlu1 %3819 }
 0x547   : > { %3896 = vst.msk [vmem:[#allocation3 + $0x98] sm:$0xff] %vm1532_vm8, %v3820_v18  ;;  %v3920_v18 = vld [vmem:[#allocation2 + $0xb1] sm:$0xff] }
 0x548   : > { %v3818_v53 = vpop.permute.xlu0 %3817  ;;  %3447 = vrot.lane.b32.xlu1 %v3932_v23, %s4854_s24 }
 0x549   : > { %3895 = vst.msk [vmem:[#allocation3 + $0x90] sm:$0xff] %vm1532_vm8, %v3818_v53 }
 0x54a   : > { %3445 = vrot.lane.b32.xlu0 %v3931_v2, %s4854_s24  ;;  %v3788_v6 = vpop.permute.xlu1 %3787 }
 0x54b   : > { %3880 = vst.msk [vmem:[#allocation3 + $0x18] sm:$0xff] %vm1532_vm8, %v3788_v6  ;;  %v3919_v6 = vld [vmem:[#allocation2 + $0xa9] sm:$0xff] }
 0x54c   : > { %v3786_v9 = vpop.permute.xlu0 %3785  ;;  %3415 = vrot.lane.b32.xlu1 %v3916_v45, %s4854_s24 }
 0x54d   : > { %3879 = vst.msk [vmem:[#allocation3 + $0x10] sm:$0xff] %vm1532_vm8, %v3786_v9 }
 0x54e   : > { %3413 = vrot.lane.b32.xlu0 %v3915_v7, %s4854_s24  ;;  %v4012_v24 = vpop.permute.xlu1 %4011  ;;  %v7112_v7 = vld [vmem:[#allocation5_spill] sm:$0xff] }
 0x54f   : > { %4088 = vst.msk [vmem:[#allocation3 + $0x98] sm:$0xff] %vm1725_vm9, %v4012_v24 }
 0x550   : > { %v4010_v19 = vpop.permute.xlu0 %4009  ;;  %3639 = vrot.lane.b32.xlu1 %v4124_v13, %s4855_s29  ;;  %v3727_v13 = vld [vmem:[#allocation2 + $0xa8] sm:$0xff] }
 0x551   : > { %4087 = vst.msk [vmem:[#allocation3 + $0x90] sm:$0xff] %vm1725_vm9, %v4010_v19 }
 0x552   : > { %3637 = vrot.lane.b32.xlu0 %v4123_v33, %s4855_s29  ;;  %v3980_v3 = vpop.permute.xlu1 %3979 }
 0x553   : > { %4072 = vst.msk [vmem:[#allocation3 + $0x18] sm:$0xff] %vm1725_vm9, %v3980_v3  ;;  %v4128_v3 = vld [vmem:[#allocation2 + $0x172] sm:$0xff] }
 0x554   : > { %v3978_v15 = vpop.permute.xlu0 %3977  ;;  %3607 = vrot.lane.b32.xlu1 %v4108_v21, %s4855_s29 }
 0x555   : > { %4071 = vst.msk [vmem:[#allocation3 + $0x10] sm:$0xff] %vm1725_vm9, %v3978_v15  ;;  %v4127_v15 = vld [vmem:[#allocation2 + $0x16a] sm:$0xff] }
 0x556   : > { %3605 = vrot.lane.b32.xlu0 %v4107_v51, %s4855_s29  ;;  %v4204_v37 = vpop.permute.xlu1 %4203 }
 0x557   : > { %4280 = vst.msk [vmem:[#allocation3 + $0x98] sm:$0xff] %vm1918_vm10, %v4204_v37 }
 0x558   : > { %v4202_v59 = vpop.permute.xlu0 %4201  ;;  %3831 = vrot.lane.b32.xlu1 %v6336_v38, %s4856_s8 }
 0x559   : > { %4279 = vst.msk [vmem:[#allocation3 + $0x90] sm:$0xff] %vm1918_vm10, %v4202_v59 }
 0x55a   : > { %3829 = vrot.lane.b32.xlu0 %v6403_v42, %s4856_s8  ;;  %v4172_v55 = vpop.permute.xlu1 %4171 }
 0x55b   : > { %4264 = vst.msk [vmem:[#allocation3 + $0x18] sm:$0xff] %vm1918_vm10, %v4172_v55  ;;  %v4112_v55 = vld [vmem:[#allocation2 + $0xb2] sm:$0xff] }
 0x55c   : > { %v4170_v10 = vpop.permute.xlu0 %4169  ;;  %3799 = vrot.lane.b32.xlu1 %v3726_v25, %s4856_s8 }
 0x55d   : > { %4263 = vst.msk [vmem:[#allocation3 + $0x10] sm:$0xff] %vm1918_vm10, %v4170_v10  ;;  %v4111_v10 = vld [vmem:[#allocation2 + $0xaa] sm:$0xff] }
 0x55e   : > { %3797 = vrot.lane.b32.xlu0 %v6342_v29, %s4856_s8  ;;  %v3248_v5 = vpop.permute.xlu1 %3247  ;;  %v4312_v12 = vld [vmem:[#allocation3 + $0x98] sm:$0xff] }
 0x55f   : > { %3322 = vst.msk [vmem:[#allocation3 + $0xa8] sm:$0xff] %vm952_vm5, %v3248_v5 }
 0x560   : > { %v3246_v56 = vpop.permute.xlu0 %3245  ;;  %v4311_v54 = vld [vmem:[#allocation3 + $0x90] sm:$0xff]  ;;  %4023 = vrot.lane.b32.xlu1 %v3934_v39, %s4857_s9 }
 0x561   : > { %3321 = vst.msk [vmem:[#allocation3 + $0xa0] sm:$0xff] %vm952_vm5, %v3246_v56  ;;  %v4781_v47 = vpack.c.bf16 %v4312_v12, %v4311_v54  ;;  %v3170_v12 = vld [vmem:[#allocation2 + $0x170] sm:$0xff]  ;;  %v3169_v56 = vld [vmem:[#allocation2 + $0x168] sm:$0xff] }
 0x562   : > { %4021 = vrot.lane.b32.xlu0 %v3933_v31, %s4857_s9  ;;  %v3440_v52 = vpop.permute.xlu1 %3439  ;;  %v4296_v29 = vld [vmem:[#allocation3 + $0x18] sm:$0xff] }
 0x563   : > { %4783 = vmatprep.subr.msk.bf16.mxu1 %vm6791_vm12, %v4781_v47  ;;  %3514 = vst.msk [vmem:[#allocation3 + $0xa8] sm:$0xff] %vm1145_vm6, %v3440_v52 }
 0x564   : > { %v3438_v4 = vpop.permute.xlu0 %3437  ;;  %v4295_v46 = vld [vmem:[#allocation3 + $0x10] sm:$0xff]  ;;  %3991 = vrot.lane.b32.xlu1 %v3918_v36, %s4857_s9 }
 0x565   : > { %3513 = vst.msk [vmem:[#allocation3 + $0xa0] sm:$0xff] %vm1145_vm6, %v3438_v4  ;;  %v4784_v41 = vpack.c.bf16 %v4296_v29, %v4295_v46 }
 0x566   : > { %3989 = vrot.lane.b32.xlu0 %v3917_v60, %s4857_s9  ;;  %v3408_v20 = vpop.permute.xlu1 %3407 }
 0x567   : > { %4786 = vmatpush3.bf16.xpose.msk.msra.mxu1 %vm6791_vm12, %v4784_v41  ;;  %3498 = vst.msk [vmem:[#allocation3 + $0x28] sm:$0xff] %vm1145_vm6, %v3408_v20  ;;  %v3746_v41 = vld [vmem:[#allocation2 + $0x188] sm:$0xff]  ;;  %v3745_v20 = vld [vmem:[#allocation2 + $0x180] sm:$0xff] }
 0x568   : > { %v3406_v43 = vpop.permute.xlu0 %3405  ;;  %4215 = vrot.lane.b32.xlu1 %v4126_v26, %s4858_s12 }
 0x569   : > { %3497 = vst.msk [vmem:[#allocation3 + $0x20] sm:$0xff] %vm1145_vm6, %v3406_v43 }
 0x56a   : > { %4213 = vrot.lane.b32.xlu0 %v4125_v1, %s4858_s12  ;;  %v3632_v14 = vpop.permute.xlu1 %3631 }
 0x56b   : > { %3706 = vst.msk [vmem:[#allocation3 + $0xa8] sm:$0xff] %vm1338_vm7, %v3632_v14  ;;  %v3729_v14 = vld [vmem:[#allocation2 + $0xc0] sm:$0xff] }
 0x56c   : > { %v3630_v44 = vpop.permute.xlu0 %3629  ;;  %4183 = vrot.lane.b32.xlu1 %v4110_v30, %s4858_s12 }
 0x56d   : > { %3705 = vst.msk [vmem:[#allocation3 + $0xa0] sm:$0xff] %vm1338_vm7, %v3630_v44 }
 0x56e   : > { %4181 = vrot.lane.b32.xlu0 %v4109_v48, %s4858_s12  ;;  %v3600_v17 = vpop.permute.xlu1 %3599 }
 0x56f   : > { %3690 = vst.msk [vmem:[#allocation3 + $0x28] sm:$0xff] %vm1338_vm7, %v3600_v17  ;;  %v3938_v17 = vld [vmem:[#allocation2 + $0x189] sm:$0xff] }
 0x570   : > { %v3598_v49 = vpop.permute.xlu0 %3597  ;;  %3259 = vrot.lane.b32.xlu1 %v6336_v38, %s4853_s23 }
 0x571   : > { %3689 = vst.msk [vmem:[#allocation3 + $0x20] sm:$0xff] %vm1338_vm7, %v3598_v49 }
 0x572   : > { %3257 = vrot.lane.b32.xlu0 %v6403_v42, %s4853_s23  ;;  %v3824_v50 = vpop.permute.xlu1 %3823 }
 0x573   : > { %3898 = vst.msk [vmem:[#allocation3 + $0xa8] sm:$0xff] %vm1532_vm8, %v3824_v50  ;;  %v3937_v50 = vld [vmem:[#allocation2 + $0x181] sm:$0xff] }
 0x574   : > { %v3822_v0 = vpop.permute.xlu0 %3821  ;;  %3451 = vrot.lane.b32.xlu1 %v3934_v39, %s4854_s24 }
 0x575   : > { %3897 = vst.msk [vmem:[#allocation3 + $0xa0] sm:$0xff] %vm1532_vm8, %v3822_v0 }
 0x576   : > { %3449 = vrot.lane.b32.xlu0 %v3933_v31, %s4854_s24  ;;  %v3792_v23 = vpop.permute.xlu1 %3791 }
 0x577   : > { %3882 = vst.msk [vmem:[#allocation3 + $0x28] sm:$0xff] %vm1532_vm8, %v3792_v23 }
 0x578   : > { %v3790_v2 = vpop.permute.xlu0 %3789  ;;  %3419 = vrot.lane.b32.xlu1 %v3918_v36, %s4854_s24 }
 0x579   : > { %3881 = vst.msk [vmem:[#allocation3 + $0x20] sm:$0xff] %vm1532_vm8, %v3790_v2 }
 0x57a   : > { %3417 = vrot.lane.b32.xlu0 %v3917_v60, %s4854_s24  ;;  %v4016_v38 = vpop.permute.xlu1 %4015 }
 0x57b   : > { %4090 = vst.msk [vmem:[#allocation3 + $0xa8] sm:$0xff] %vm1725_vm9, %v4016_v38 }
 0x57c   : > { %v4014_v42 = vpop.permute.xlu0 %4013  ;;  %3643 = vrot.lane.b32.xlu1 %v4126_v26, %s4855_s29 }
 0x57d   : > { %4089 = vst.msk [vmem:[#allocation3 + $0xa0] sm:$0xff] %vm1725_vm9, %v4014_v42  ;;  %v3922_v42 = vld [vmem:[#allocation2 + $0xc9] sm:$0xff] }
 0x57e   : > { %3641 = vrot.lane.b32.xlu0 %v4125_v1, %s4855_s29  ;;  %v3984_v27 = vpop.permute.xlu1 %3983  ;;  %v3730_v1 = vld [vmem:[#allocation2 + $0xc8] sm:$0xff] }
 0x57f   : > { %4074 = vst.msk [vmem:[#allocation3 + $0x28] sm:$0xff] %vm1725_vm9, %v3984_v27 }
 0x580   : > { %v3982_v45 = vpop.permute.xlu0 %3981  ;;  %3611 = vrot.lane.b32.xlu1 %v4110_v30, %s4855_s29 }
 0x581   : > { %4073 = vst.msk [vmem:[#allocation3 + $0x20] sm:$0xff] %vm1725_vm9, %v3982_v45  ;;  %v3921_v45 = vld [vmem:[#allocation2 + $0xc1] sm:$0xff] }
 0x582   : > { %3609 = vrot.lane.b32.xlu0 %v4109_v48, %s4855_s29  ;;  %v4208_v8 = vpop.permute.xlu1 %4207 }
 0x583   : > { %4282 = vst.msk [vmem:[#allocation3 + $0xa8] sm:$0xff] %vm1918_vm10, %v4208_v8 }
 0x584   : > { %v4206_v61 = vpop.permute.xlu0 %4205  ;;  %3835 = vrot.lane.b32.xlu1 %v7111_v57, %s4856_s8 }
 0x585   : > { %4281 = vst.msk [vmem:[#allocation3 + $0xa0] sm:$0xff] %vm1918_vm10, %v4206_v61 }
 0x586   : > { %3833 = vrot.lane.b32.xlu0 %v7112_v7, %s4856_s8  ;;  %v4176_v11 = vpop.permute.xlu1 %4175  ;;  %v4130_v7 = vld [vmem:[#allocation2 + $0x18a] sm:$0xff] }
 0x587   : > { %4266 = vst.msk [vmem:[#allocation3 + $0x28] sm:$0xff] %vm1918_vm10, %v4176_v11  ;;  %v4129_v11 = vld [vmem:[#allocation2 + $0x182] sm:$0xff] }
 0x588   : > { %v4174_v40 = vpop.permute.xlu0 %4173  ;;  %3803 = vrot.lane.b32.xlu1 %v3728_v16, %s4856_s8 }
 0x589   : > { %4265 = vst.msk [vmem:[#allocation3 + $0x20] sm:$0xff] %vm1918_vm10, %v4174_v40 }
 0x58a   : > { %3801 = vrot.lane.b32.xlu0 %v3727_v13, %s4856_s8  ;;  %v3252_v58 = vpop.permute.xlu1 %3251  ;;  %v4314_v22 = vld [vmem:[#allocation3 + $0xa8] sm:$0xff]  ;;  %v4114_v13 = vld [vmem:[#allocation2 + $0xca] sm:$0xff] }
 0x58b   : > { %3324 = vst.msk [vmem:[#allocation3 + $0xb8] sm:$0xff] %vm952_vm5, %v3252_v58  ;;  %v4113_v58 = vld [vmem:[#allocation2 + $0xc2] sm:$0xff] }
 0x58c   : > { %v3250_v33 = vpop.permute.xlu0 %3249  ;;  %v4313_v63 = vld [vmem:[#allocation3 + $0xa0] sm:$0xff]  ;;  %4027 = vrot.lane.b32.xlu1 %v3936_v35, %s4857_s9 }
 0x58d   : > { %3323 = vst.msk [vmem:[#allocation3 + $0xb0] sm:$0xff] %vm952_vm5, %v3250_v33  ;;  %v4787_v21 = vpack.c.bf16 %v4314_v22, %v4313_v63 }
 0x58e   : > { %4025 = vrot.lane.b32.xlu0 %v3935_v62, %s4857_s9  ;;  %v3444_v51 = vpop.permute.xlu1 %3443  ;;  %v4298_v32 = vld [vmem:[#allocation3 + $0x28] sm:$0xff] }
 0x58f   : > { %4789 = vmatprep.subr.msk.bf16.mxu1 %vm6791_vm12, %v4787_v21  ;;  %3516 = vst.msk [vmem:[#allocation3 + $0xb8] sm:$0xff] %vm1145_vm6, %v3444_v51 }
 0x590   : > { %v3442_v34 = vpop.permute.xlu0 %3441  ;;  %v4297_v53 = vld [vmem:[#allocation3 + $0x20] sm:$0xff]  ;;  %3995 = vrot.lane.b32.xlu1 %v3920_v18, %s4857_s9 }
 0x591   : > { %3515 = vst.msk [vmem:[#allocation3 + $0xb0] sm:$0xff] %vm1145_vm6, %v3442_v34  ;;  %v4790_v9 = vpack.c.bf16 %v4298_v32, %v4297_v53 }
 0x592   : > { %3993 = vrot.lane.b32.xlu0 %v3919_v6, %s4857_s9  ;;  %v3412_v24 = vpop.permute.xlu1 %3411 }
 0x593   : > { %4792 = vmatpush3.bf16.xpose.msk.msra.mxu1 %vm6791_vm12, %v4790_v9  ;;  %3500 = vst.msk [vmem:[#allocation3 + $0x38] sm:$0xff] %vm1145_vm6, %v3412_v24  ;;  %v3748_v9 = vld [vmem:[#allocation2 + $0x1a0] sm:$0xff]  ;;  %v3747_v24 = vld [vmem:[#allocation2 + $0x198] sm:$0xff] }
 0x594   : > { %v3410_v19 = vpop.permute.xlu0 %3409  ;;  %4219 = vrot.lane.b32.xlu1 %v4128_v3, %s4858_s12 }
 0x595   : > { %3499 = vst.msk [vmem:[#allocation3 + $0x30] sm:$0xff] %vm1145_vm6, %v3410_v19 }
 0x596   : > { %4217 = vrot.lane.b32.xlu0 %v4127_v15, %s4858_s12  ;;  %v3636_v37 = vpop.permute.xlu1 %3635 }
 0x597   : > { %3708 = vst.msk [vmem:[#allocation3 + $0xb8] sm:$0xff] %vm1338_vm7, %v3636_v37  ;;  %v3731_v37 = vld [vmem:[#allocation2 + $0xd8] sm:$0xff] }
 0x598   : > { %v3634_v59 = vpop.permute.xlu0 %3633  ;;  %4187 = vrot.lane.b32.xlu1 %v4112_v55, %s4858_s12 }
 0x599   : > { %3707 = vst.msk [vmem:[#allocation3 + $0xb0] sm:$0xff] %vm1338_vm7, %v3634_v59 }
 0x59a   : > { %4185 = vrot.lane.b32.xlu0 %v4111_v10, %s4858_s12  ;;  %v3604_v25 = vpop.permute.xlu1 %3603 }
 0x59b   : > { %3692 = vst.msk [vmem:[#allocation3 + $0x38] sm:$0xff] %vm1338_vm7, %v3604_v25  ;;  %v3940_v25 = vld [vmem:[#allocation2 + $0x1a1] sm:$0xff] }
 0x59c   : > { %v3602_v5 = vpop.permute.xlu0 %3601  ;;  %3263 = vrot.lane.b32.xlu1 %v3170_v12, %s4853_s23  ;;  %v3939_v12 = vld [vmem:[#allocation2 + $0x199] sm:$0xff] }
 0x59d   : > { %3691 = vst.msk [vmem:[#allocation3 + $0x30] sm:$0xff] %vm1338_vm7, %v3602_v5 }
 0x59e   : > { %3261 = vrot.lane.b32.xlu0 %v3169_v56, %s4853_s23  ;;  %v3828_v39 = vpop.permute.xlu1 %3827 }
 0x59f   : > { %3900 = vst.msk [vmem:[#allocation3 + $0xb8] sm:$0xff] %vm1532_vm8, %v3828_v39 }
 0x5a0   : > { %v3826_v54 = vpop.permute.xlu0 %3825  ;;  %3455 = vrot.lane.b32.xlu1 %v3936_v35, %s4854_s24 }
 0x5a1   : > { %3899 = vst.msk [vmem:[#allocation3 + $0xb0] sm:$0xff] %vm1532_vm8, %v3826_v54 }
 0x5a2   : > { %3453 = vrot.lane.b32.xlu0 %v3935_v62, %s4854_s24  ;;  %v3796_v31 = vpop.permute.xlu1 %3795 }
 0x5a3   : > { %3884 = vst.msk [vmem:[#allocation3 + $0x38] sm:$0xff] %vm1532_vm8, %v3796_v31 }
 0x5a4   : > { %v3794_v47 = vpop.permute.xlu0 %3793  ;;  %3423 = vrot.lane.b32.xlu1 %v3920_v18, %s4854_s24 }
 0x5a5   : > { %3883 = vst.msk [vmem:[#allocation3 + $0x30] sm:$0xff] %vm1532_vm8, %v3794_v47  ;;  %v3924_v47 = vld [vmem:[#allocation2 + $0xe1] sm:$0xff] }
 0x5a6   : > { %3421 = vrot.lane.b32.xlu0 %v3919_v6, %s4854_s24  ;;  %v4020_v52 = vpop.permute.xlu1 %4019 }
 0x5a7   : > { %4092 = vst.msk [vmem:[#allocation3 + $0xb8] sm:$0xff] %vm1725_vm9, %v4020_v52 }
 0x5a8   : > { %v4018_v29 = vpop.permute.xlu0 %4017  ;;  %3647 = vrot.lane.b32.xlu1 %v4128_v3, %s4855_s29 }
 0x5a9   : > { %4091 = vst.msk [vmem:[#allocation3 + $0xb0] sm:$0xff] %vm1725_vm9, %v4018_v29  ;;  %v3923_v29 = vld [vmem:[#allocation2 + $0xd9] sm:$0xff] }
 0x5aa   : > { %3645 = vrot.lane.b32.xlu0 %v4127_v15, %s4855_s29  ;;  %v3988_v4 = vpop.permute.xlu1 %3987  ;;  %v3732_v15 = vld [vmem:[#allocation2 + $0xe0] sm:$0xff] }
 0x5ab   : > { %4076 = vst.msk [vmem:[#allocation3 + $0x38] sm:$0xff] %vm1725_vm9, %v3988_v4 }
 0x5ac   : > { %v3986_v36 = vpop.permute.xlu0 %3985  ;;  %3615 = vrot.lane.b32.xlu1 %v4112_v55, %s4855_s29 }
 0x5ad   : > { %4075 = vst.msk [vmem:[#allocation3 + $0x30] sm:$0xff] %vm1725_vm9, %v3986_v36 }
 0x5ae   : > { %3613 = vrot.lane.b32.xlu0 %v4111_v10, %s4855_s29  ;;  %v4212_v46 = vpop.permute.xlu1 %4211 }
 0x5af   : > { %4284 = vst.msk [vmem:[#allocation3 + $0xb8] sm:$0xff] %vm1918_vm10, %v4212_v46 }
 0x5b0   : > { %v4210_v60 = vpop.permute.xlu0 %4209  ;;  %3839 = vrot.lane.b32.xlu1 %v3746_v41, %s4856_s8 }
 0x5b1   : > { %4283 = vst.msk [vmem:[#allocation3 + $0xb0] sm:$0xff] %vm1918_vm10, %v4210_v60  ;;  %v4132_v60 = vld [vmem:[#allocation2 + $0x1a2] sm:$0xff] }
 0x5b2   : > { %3837 = vrot.lane.b32.xlu0 %v3745_v20, %s4856_s8  ;;  %v4180_v43 = vpop.permute.xlu1 %4179 }
 0x5b3   : > { %4268 = vst.msk [vmem:[#allocation3 + $0x38] sm:$0xff] %vm1918_vm10, %v4180_v43  ;;  %v7010_v43 = vld [vmem:[%s7102_s2] sm:$0xff] }
 0x5b4   : > { %v4178_v26 = vpop.permute.xlu0 %4177  ;;  %3807 = vrot.lane.b32.xlu1 %v3730_v1, %s4856_s8  ;;  %v4116_v1 = vld [vmem:[#allocation2 + $0xe2] sm:$0xff]  ;;  %4707 = vmatprep.mubr.msk.f32.mxu1 %vm1988_vm11, %v7010_v43 }
 0x5b5   : > { %4267 = vst.msk [vmem:[#allocation3 + $0x30] sm:$0xff] %vm1918_vm10, %v4178_v26 }
 0x5b6   : > { %3805 = vrot.lane.b32.xlu0 %v3729_v14, %s4856_s8  ;;  %v3256_v44 = vpop.permute.xlu1 %3255  ;;  %v4316_v30 = vld [vmem:[#allocation3 + $0xb8] sm:$0xff]  ;;  %v4115_v14 = vld [vmem:[#allocation2 + $0xda] sm:$0xff] }
 0x5b7   : > { %3326 = vst.msk [vmem:[#allocation3 + $0xc8] sm:$0xff] %vm952_vm5, %v3256_v44 }
 0x5b8   : > { %v3254_v48 = vpop.permute.xlu0 %3253  ;;  %v4315_v49 = vld [vmem:[#allocation3 + $0xb0] sm:$0xff]  ;;  %4031 = vrot.lane.b32.xlu1 %v3938_v17, %s4857_s9 }
 0x5b9   : > { %3325 = vst.msk [vmem:[#allocation3 + $0xc0] sm:$0xff] %vm952_vm5, %v3254_v48  ;;  %v4793_v0 = vpack.c.bf16 %v4316_v30, %v4315_v49  ;;  %v4326_v48 = vld [vmem:[%s7103_s3] sm:$0xff]  ;;  %v4859_v49 = vmov 0  }
 0x5ba   : > { %4029 = vrot.lane.b32.xlu0 %v3937_v50, %s4857_s9  ;;  %v3448_v23 = vpop.permute.xlu1 %3447  ;;  %v4300_v2 = vld [vmem:[#allocation3 + $0x38] sm:$0xff] }
 0x5bb   : > { %4795 = vmatprep.subr.msk.bf16.mxu1 %vm6791_vm12, %v4793_v0  ;;  %3518 = vst.msk [vmem:[#allocation3 + $0xc8] sm:$0xff] %vm1145_vm6, %v3448_v23  ;;  %4840 = vset.pattern.permute.xlu0 %v4859_v49 }
 0x5bc   : > { %v3446_v38 = vpop.permute.xlu0 %3445  ;;  %v4299_v27 = vld [vmem:[#allocation3 + $0x30] sm:$0xff]  ;;  %3999 = vrot.lane.b32.xlu1 %v3922_v42, %s4857_s9 }
 0x5bd   : > { %3517 = vst.msk [vmem:[#allocation3 + $0xc0] sm:$0xff] %vm1145_vm6, %v3446_v38  ;;  %v4796_v8 = vpack.c.bf16 %v4300_v2, %v4299_v27 }
 0x5be   : > { %3997 = vrot.lane.b32.xlu0 %v3921_v45, %s4857_s9  ;;  %v3416_v61 = vpop.permute.xlu1 %3415 }
 0x5bf   : > { %4798 = vmatpush3.bf16.xpose.msk.msra.mxu1 %vm6791_vm12, %v4796_v8  ;;  %3502 = vst.msk [vmem:[#allocation3 + $0x48] sm:$0xff] %vm1145_vm6, %v3416_v61 }
 0x5c0   : > { %v3414_v57 = vpop.permute.xlu0 %3413  ;;  %4223 = vrot.lane.b32.xlu1 %v4130_v7, %s4858_s12 }
 0x5c1   : > { %3501 = vst.msk [vmem:[#allocation3 + $0x40] sm:$0xff] %vm1145_vm6, %v3414_v57 }
 0x5c2   : > { %4221 = vrot.lane.b32.xlu0 %v4129_v11, %s4858_s12  ;;  %v3640_v40 = vpop.permute.xlu1 %3639 }
 0x5c3   : > { %3710 = vst.msk [vmem:[#allocation3 + $0xc8] sm:$0xff] %vm1338_vm7, %v3640_v40 }
 0x5c4   : > { %v3638_v16 = vpop.permute.xlu0 %3637  ;;  %4191 = vrot.lane.b32.xlu1 %v4114_v13, %s4858_s12 }
 0x5c5   : > { %3709 = vst.msk [vmem:[#allocation3 + $0xc0] sm:$0xff] %vm1338_vm7, %v3638_v16 }
 0x5c6   : > { %4189 = vrot.lane.b32.xlu0 %v4113_v58, %s4858_s12  ;;  %v3608_v22 = vpop.permute.xlu1 %3607 }
 0x5c7   : > { %3694 = vst.msk [vmem:[#allocation3 + $0x48] sm:$0xff] %vm1338_vm7, %v3608_v22 }
 0x5c8   : > { %v3606_v33 = vpop.permute.xlu0 %3605  ;;  %3267 = vrot.lane.b32.xlu1 %v3746_v41, %s4853_s23  ;;  %v4131_v41 = vld [vmem:[#allocation2 + $0x19a] sm:$0xff] }
 0x5c9   : > { %3693 = vst.msk [vmem:[#allocation3 + $0x40] sm:$0xff] %vm1338_vm7, %v3606_v33 }
 0x5ca   : > { %3265 = vrot.lane.b32.xlu0 %v3745_v20, %s4853_s23  ;;  %v3832_v35 = vpop.permute.xlu1 %3831 }
 0x5cb   : > { %3902 = vst.msk [vmem:[#allocation3 + $0xc8] sm:$0xff] %vm1532_vm8, %v3832_v35 }
 0x5cc   : > { %v3830_v63 = vpop.permute.xlu0 %3829  ;;  %3459 = vrot.lane.b32.xlu1 %v3938_v17, %s4854_s24 }
 0x5cd   : > { %3901 = vst.msk [vmem:[#allocation3 + $0xc0] sm:$0xff] %vm1532_vm8, %v3830_v63 }
 0x5ce   : > { %3457 = vrot.lane.b32.xlu0 %v3937_v50, %s4854_s24  ;;  %v3800_v62 = vpop.permute.xlu1 %3799 }
 0x5cf   : > { %3886 = vst.msk [vmem:[#allocation3 + $0x48] sm:$0xff] %vm1532_vm8, %v3800_v62 }
 0x5d0   : > { %v3798_v21 = vpop.permute.xlu0 %3797  ;;  %3427 = vrot.lane.b32.xlu1 %v3922_v42, %s4854_s24 }
 0x5d1   : > { %3885 = vst.msk [vmem:[#allocation3 + $0x40] sm:$0xff] %vm1532_vm8, %v3798_v21 }
 0x5d2   : > { %3425 = vrot.lane.b32.xlu0 %v3921_v45, %s4854_s24  ;;  %v4024_v51 = vpop.permute.xlu1 %4023 }
 0x5d3   : > { %4094 = vst.msk [vmem:[#allocation3 + $0xc8] sm:$0xff] %vm1725_vm9, %v4024_v51 }
 0x5d4   : > { %v4022_v32 = vpop.permute.xlu0 %4021  ;;  %3651 = vrot.lane.b32.xlu1 %v4130_v7, %s4855_s29 }
 0x5d5   : > { %4093 = vst.msk [vmem:[#allocation3 + $0xc0] sm:$0xff] %vm1725_vm9, %v4022_v32 }
 0x5d6   : > { %3649 = vrot.lane.b32.xlu0 %v4129_v11, %s4855_s29  ;;  %v3992_v34 = vpop.permute.xlu1 %3991 }
 0x5d7   : > { %4078 = vst.msk [vmem:[#allocation3 + $0x48] sm:$0xff] %vm1725_vm9, %v3992_v34 }
 0x5d8   : > { %v3990_v18 = vpop.permute.xlu0 %3989  ;;  %3619 = vrot.lane.b32.xlu1 %v4114_v13, %s4855_s29 }
 0x5d9   : > { %4077 = vst.msk [vmem:[#allocation3 + $0x40] sm:$0xff] %vm1725_vm9, %v3990_v18 }
 0x5da   : > { %3617 = vrot.lane.b32.xlu0 %v4113_v58, %s4855_s29  ;;  %v4216_v53 = vpop.permute.xlu1 %4215 }
 0x5db   : > { %4286 = vst.msk [vmem:[#allocation3 + $0xc8] sm:$0xff] %vm1918_vm10, %v4216_v53 }
 0x5dc   : > { %v4214_v6 = vpop.permute.xlu0 %4213  ;;  %3843 = vrot.lane.b32.xlu1 %v3748_v9, %s4856_s8 }
 0x5dd   : > { %4285 = vst.msk [vmem:[#allocation3 + $0xc0] sm:$0xff] %vm1918_vm10, %v4214_v6 }
 0x5de   : > { %3841 = vrot.lane.b32.xlu0 %v3747_v24, %s4856_s8  ;;  %v4184_v19 = vpop.permute.xlu1 %4183 }
 0x5df   : > { %4270 = vst.msk [vmem:[#allocation3 + $0x48] sm:$0xff] %vm1918_vm10, %v4184_v19 }
 0x5e0   : > { %v4182_v3 = vpop.permute.xlu0 %4181  ;;  %3811 = vrot.lane.b32.xlu1 %v3732_v15, %s4856_s8 }
 0x5e1   : > { %4269 = vst.msk [vmem:[#allocation3 + $0x40] sm:$0xff] %vm1918_vm10, %v4182_v3 }
 0x5e2   : > { %3809 = vrot.lane.b32.xlu0 %v3731_v37, %s4856_s8  ;;  %v3260_v59 = vpop.permute.xlu1 %3259  ;;  %v4318_v55 = vld [vmem:[#allocation3 + $0xc8] sm:$0xff] }
 0x5e3   : > { %3328 = vst.msk [vmem:[#allocation3 + $0xd8] sm:$0xff] %vm952_vm5, %v3260_v59 }
 0x5e4   : > { %v3258_v10 = vpop.permute.xlu0 %3257  ;;  %v4317_v5 = vld [vmem:[#allocation3 + $0xc0] sm:$0xff]  ;;  %4035 = vrot.lane.b32.xlu1 %v3940_v25, %s4857_s9 }
 0x5e5   : > { %3327 = vst.msk [vmem:[#allocation3 + $0xd0] sm:$0xff] %vm952_vm5, %v3258_v10  ;;  %v4799_v56 = vpack.c.bf16 %v4318_v55, %v4317_v5 }
 0x5e6   : > { %4033 = vrot.lane.b32.xlu0 %v3939_v12, %s4857_s9  ;;  %v3452_v39 = vpop.permute.xlu1 %3451  ;;  %v4302_v54 = vld [vmem:[#allocation3 + $0x48] sm:$0xff] }
 0x5e7   : > { %4801 = vmatprep.subr.msk.bf16.mxu1 %vm6791_vm12, %v4799_v56  ;;  %3520 = vst.msk [vmem:[#allocation3 + $0xd8] sm:$0xff] %vm1145_vm6, %v3452_v39 }
 0x5e8   : > { %v3450_v31 = vpop.permute.xlu0 %3449  ;;  %v4301_v52 = vld [vmem:[#allocation3 + $0x40] sm:$0xff]  ;;  %4003 = vrot.lane.b32.xlu1 %v3924_v47, %s4857_s9 }
 0x5e9   : > { %3519 = vst.msk [vmem:[#allocation3 + $0xd0] sm:$0xff] %vm1145_vm6, %v3450_v31  ;;  %v4802_v4 = vpack.c.bf16 %v4302_v54, %v4301_v52 }
 0x5ea   : > { %4001 = vrot.lane.b32.xlu0 %v3923_v29, %s4857_s9  ;;  %v3420_v36 = vpop.permute.xlu1 %3419 }
 0x5eb   : > { %4804 = vmatpush3.bf16.xpose.msk.msra.mxu1 %vm6791_vm12, %v4802_v4  ;;  %3504 = vst.msk [vmem:[#allocation3 + $0x58] sm:$0xff] %vm1145_vm6, %v3420_v36 }
 0x5ec   : > { %v3418_v46 = vpop.permute.xlu0 %3417  ;;  %4227 = vrot.lane.b32.xlu1 %v4132_v60, %s4858_s12 }
 0x5ed   : > { %3503 = vst.msk [vmem:[#allocation3 + $0x50] sm:$0xff] %vm1145_vm6, %v3418_v46 }
 0x5ee   : > { %4225 = vrot.lane.b32.xlu0 %v4131_v41, %s4858_s12  ;;  %v3644_v20 = vpop.permute.xlu1 %3643 }
 0x5ef   : > { %3712 = vst.msk [vmem:[#allocation3 + $0xd8] sm:$0xff] %vm1338_vm7, %v3644_v20 }
 0x5f0   : > { %v3642_v26 = vpop.permute.xlu0 %3641  ;;  %4195 = vrot.lane.b32.xlu1 %v4116_v1, %s4858_s12 }
 0x5f1   : > { %3711 = vst.msk [vmem:[#allocation3 + $0xd0] sm:$0xff] %vm1338_vm7, %v3642_v26 }
 0x5f2   : > { %4193 = vrot.lane.b32.xlu0 %v4115_v14, %s4858_s12  ;;  %v3612_v44 = vpop.permute.xlu1 %3611 }
 0x5f3   : > { %3696 = vst.msk [vmem:[#allocation3 + $0x58] sm:$0xff] %vm1338_vm7, %v3612_v44 }
 0x5f4   : > { %v3610_v30 = vpop.permute.xlu0 %3609 }
 0x5f5   : > { %3695 = vst.msk [vmem:[#allocation3 + $0x50] sm:$0xff] %vm1338_vm7, %v3610_v30 }
 0x5f6   : > { %v3836_v17 = vpop.permute.xlu1 %3835  ;;  %4329 = vperm.xlu0 %4840, %v4326_v48  }
 0x5f7   : > { %3904 = vst.msk [vmem:[#allocation3 + $0xd8] sm:$0xff] %vm1532_vm8, %v3836_v17 }
 0x5f8   : > { %v3834_v50 = vpop.permute.xlu0 %3833 }
 0x5f9   : > { %3903 = vst.msk [vmem:[#allocation3 + $0xd0] sm:$0xff] %vm1532_vm8, %v3834_v50 }
 0x5fa   : > { %v3804_v0 = vpop.permute.xlu1 %3803 }
 0x5fb   : > { %3888 = vst.msk [vmem:[#allocation3 + $0x58] sm:$0xff] %vm1532_vm8, %v3804_v0 }
 0x5fc   : > { %v3802_v23 = vpop.permute.xlu0 %3801 }
 0x5fd   : > { %3887 = vst.msk [vmem:[#allocation3 + $0x50] sm:$0xff] %vm1532_vm8, %v3802_v23 }
 0x5fe   : > { %v4028_v2 = vpop.permute.xlu1 %4027 }
 0x5ff   : > { %4096 = vst.msk [vmem:[#allocation3 + $0xd8] sm:$0xff] %vm1725_vm9, %v4028_v2 }
 0x600   : > { %v4026_v38 = vpop.permute.xlu0 %4025 }
 0x601   : > { %4095 = vst.msk [vmem:[#allocation3 + $0xd0] sm:$0xff] %vm1725_vm9, %v4026_v38 }
 0x602   : > { %v3996_v42 = vpop.permute.xlu1 %3995 }
 0x603   : > { %4080 = vst.msk [vmem:[#allocation3 + $0x58] sm:$0xff] %vm1725_vm9, %v3996_v42 }
 0x604   : > { %v3994_v27 = vpop.permute.xlu0 %3993 }
 0x605   : > { %4079 = vst.msk [vmem:[#allocation3 + $0x50] sm:$0xff] %vm1725_vm9, %v3994_v27 }
 0x606   : > { %v4220_v45 = vpop.permute.xlu1 %4219 }
 0x607   : > { %4288 = vst.msk [vmem:[#allocation3 + $0xd8] sm:$0xff] %vm1918_vm10, %v4220_v45 }
 0x608   : > { %v4218_v8 = vpop.permute.xlu0 %4217 }
 0x609   : > { %4287 = vst.msk [vmem:[#allocation3 + $0xd0] sm:$0xff] %vm1918_vm10, %v4218_v8 }
 0x60a   : > { %v4188_v61 = vpop.permute.xlu1 %4187 }
 0x60b   : > { %4272 = vst.msk [vmem:[#allocation3 + $0x58] sm:$0xff] %vm1918_vm10, %v4188_v61 }
 0x60c   : > { %v4186_v57 = vpop.permute.xlu0 %4185 }
 0x60d   : > { %4271 = vst.msk [vmem:[#allocation3 + $0x50] sm:$0xff] %vm1918_vm10, %v4186_v57 }
 0x60e   : > { %v3264_v7 = vpop.permute.xlu1 %3263  ;;  %v4320_v11 = vld [vmem:[#allocation3 + $0xd8] sm:$0xff] }
 0x60f   : > { %3330 = vst.msk [vmem:[#allocation3 + $0xe8] sm:$0xff] %vm952_vm5, %v3264_v7 }
 0x610   : > { %v3262_v40 = vpop.permute.xlu0 %3261  ;;  %v4319_v16 = vld [vmem:[#allocation3 + $0xd0] sm:$0xff] }
 0x611   : > { %3329 = vst.msk [vmem:[#allocation3 + $0xe0] sm:$0xff] %vm952_vm5, %v3262_v40  ;;  %v4805_v13 = vpack.c.bf16 %v4320_v11, %v4319_v16 }
 0x612   : > { %v3456_v58 = vpop.permute.xlu1 %3455  ;;  %v4304_v22 = vld [vmem:[#allocation3 + $0x58] sm:$0xff] }
 0x613   : > { %4807 = vmatprep.subr.msk.bf16.mxu1 %vm6791_vm12, %v4805_v13  ;;  %3522 = vst.msk [vmem:[#allocation3 + $0xe8] sm:$0xff] %vm1145_vm6, %v3456_v58 }
 0x614   : > { %v3454_v33 = vpop.permute.xlu0 %3453  ;;  %v4303_v35 = vld [vmem:[#allocation3 + $0x50] sm:$0xff] }
 0x615   : > { %3521 = vst.msk [vmem:[#allocation3 + $0xe0] sm:$0xff] %vm1145_vm6, %v3454_v33  ;;  %v4808_v63 = vpack.c.bf16 %v4304_v22, %v4303_v35 }
 0x616   : > { %v3424_v62 = vpop.permute.xlu1 %3423 }
 0x617   : > { %4810 = vmatpush3.bf16.xpose.msk.msra.mxu1 %vm6791_vm12, %v4808_v63  ;;  %3506 = vst.msk [vmem:[#allocation3 + $0x68] sm:$0xff] %vm1145_vm6, %v3424_v62 }
 0x618   : > { %v3422_v21 = vpop.permute.xlu0 %3421 }
 0x619   : > { %3505 = vst.msk [vmem:[#allocation3 + $0x60] sm:$0xff] %vm1145_vm6, %v3422_v21 }
 0x61a   : > { %v3648_v51 = vpop.permute.xlu1 %3647 }
 0x61b   : > { %3714 = vst.msk [vmem:[#allocation3 + $0xe8] sm:$0xff] %vm1338_vm7, %v3648_v51 }
 0x61c   : > { %v3646_v32 = vpop.permute.xlu0 %3645 }
 0x61d   : > { %3713 = vst.msk [vmem:[#allocation3 + $0xe0] sm:$0xff] %vm1338_vm7, %v3646_v32 }
 0x61e   : > { %v3616_v34 = vpop.permute.xlu1 %3615 }
 0x61f   : > { %3698 = vst.msk [vmem:[#allocation3 + $0x68] sm:$0xff] %vm1338_vm7, %v3616_v34 }
 0x620   : > { %v3614_v18 = vpop.permute.xlu0 %3613 }
 0x621   : > { %3697 = vst.msk [vmem:[#allocation3 + $0x60] sm:$0xff] %vm1338_vm7, %v3614_v18 }
 0x622   : > { %v3840_v53 = vpop.permute.xlu1 %3839 }
 0x623   : > { %3906 = vst.msk [vmem:[#allocation3 + $0xe8] sm:$0xff] %vm1532_vm8, %v3840_v53 }
 0x624   : > { %v3838_v6 = vpop.permute.xlu0 %3837 }
 0x625   : > { %3905 = vst.msk [vmem:[#allocation3 + $0xe0] sm:$0xff] %vm1532_vm8, %v3838_v6 }
 0x626   : > { %v3808_v9 = vpop.permute.xlu1 %3807 }
 0x627   : > { %3890 = vst.msk [vmem:[#allocation3 + $0x68] sm:$0xff] %vm1532_vm8, %v3808_v9 }
 0x628   : > { %v3806_v24 = vpop.permute.xlu0 %3805 }
 0x629   : > { %3889 = vst.msk [vmem:[#allocation3 + $0x60] sm:$0xff] %vm1532_vm8, %v3806_v24 }
 0x62a   : > { %v4032_v19 = vpop.permute.xlu1 %4031 }
 0x62b   : > { %4098 = vst.msk [vmem:[#allocation3 + $0xe8] sm:$0xff] %vm1725_vm9, %v4032_v19 }
 0x62c   : > { %v4030_v3 = vpop.permute.xlu0 %4029 }
 0x62d   : > { %4097 = vst.msk [vmem:[#allocation3 + $0xe0] sm:$0xff] %vm1725_vm9, %v4030_v3 }
 0x62e   : > { %v4000_v15 = vpop.permute.xlu1 %3999 }
 0x62f   : > { %4082 = vst.msk [vmem:[#allocation3 + $0x68] sm:$0xff] %vm1725_vm9, %v4000_v15 }
 0x630   : > { %v3998_v37 = vpop.permute.xlu0 %3997 }
 0x631   : > { %4081 = vst.msk [vmem:[#allocation3 + $0x60] sm:$0xff] %vm1725_vm9, %v3998_v37 }
 0x632   : > { %v4224_v59 = vpop.permute.xlu1 %4223 }
 0x633   : > { %4290 = vst.msk [vmem:[#allocation3 + $0xe8] sm:$0xff] %vm1918_vm10, %v4224_v59 }
 0x634   : > { %v4222_v55 = vpop.permute.xlu0 %4221 }
 0x635   : > { %4289 = vst.msk [vmem:[#allocation3 + $0xe0] sm:$0xff] %vm1918_vm10, %v4222_v55 }
 0x636   : > { %v4192_v10 = vpop.permute.xlu1 %4191 }
 0x637   : > { %4274 = vst.msk [vmem:[#allocation3 + $0x68] sm:$0xff] %vm1918_vm10, %v4192_v10 }
 0x638   : > { %v4190_v25 = vpop.permute.xlu0 %4189 }
 0x639   : > { %4273 = vst.msk [vmem:[#allocation3 + $0x60] sm:$0xff] %vm1918_vm10, %v4190_v25 }
 0x63a   : > { %v3268_v5 = vpop.permute.xlu1 %3267  ;;  %v4322_v12 = vld [vmem:[#allocation3 + $0xe8] sm:$0xff] }
 0x63b   : > { %3332 = vst.msk [vmem:[#allocation3 + $0xf8] sm:$0xff] %vm952_vm5, %v3268_v5 }
 0x63c   : > { %v3266_v56 = vpop.permute.xlu0 %3265  ;;  %v4321_v39 = vld [vmem:[#allocation3 + $0xe0] sm:$0xff] }
 0x63d   : > { %3331 = vst.msk [vmem:[#allocation3 + $0xf0] sm:$0xff] %vm952_vm5, %v3266_v56  ;;  %v4811_v54 = vpack.c.bf16 %v4322_v12, %v4321_v39 }
 0x63e   : > { %v3460_v31 = vpop.permute.xlu1 %3459  ;;  %v4306_v47 = vld [vmem:[#allocation3 + $0x68] sm:$0xff] }
 0x63f   : > { %4813 = vmatprep.subr.msk.bf16.mxu1 %vm6791_vm12, %v4811_v54  ;;  %3524 = vst.msk [vmem:[#allocation3 + $0xf8] sm:$0xff] %vm1145_vm6, %v3460_v31 }
 0x640   : > { %v3458_v52 = vpop.permute.xlu0 %3457  ;;  %v4305_v29 = vld [vmem:[#allocation3 + $0x60] sm:$0xff] }
 0x641   : > { %3523 = vst.msk [vmem:[#allocation3 + $0xf0] sm:$0xff] %vm1145_vm6, %v3458_v52  ;;  %v4814_v4 = vpack.c.bf16 %v4306_v47, %v4305_v29 }
 0x642   : > { %v3428_v36 = vpop.permute.xlu1 %3427 }
 0x643   : > { %4816 = vmatpush3.bf16.xpose.msk.msra.mxu1 %vm6791_vm12, %v4814_v4  ;;  %3508 = vst.msk [vmem:[#allocation3 + $0x78] sm:$0xff] %vm1145_vm6, %v3428_v36 }
 0x644   : > { %v3426_v46 = vpop.permute.xlu0 %3425 }
 0x645   : > { %3507 = vst.msk [vmem:[#allocation3 + $0x70] sm:$0xff] %vm1145_vm6, %v3426_v46 }
 0x646   : > { %v3652_v60 = vpop.permute.xlu1 %3651 }
 0x647   : > { %3716 = vst.msk [vmem:[#allocation3 + $0xf8] sm:$0xff] %vm1338_vm7, %v3652_v60 }
 0x648   : > { %v3650_v41 = vpop.permute.xlu0 %3649 }
 0x649   : > { %3715 = vst.msk [vmem:[#allocation3 + $0xf0] sm:$0xff] %vm1338_vm7, %v3650_v41 }
 0x64a   : > { %v3620_v20 = vpop.permute.xlu1 %3619 }
 0x64b   : > { %3700 = vst.msk [vmem:[#allocation3 + $0x78] sm:$0xff] %vm1338_vm7, %v3620_v20 }
 0x64c   : > { %v3618_v26 = vpop.permute.xlu0 %3617 }
 0x64d   : > { %3699 = vst.msk [vmem:[#allocation3 + $0x70] sm:$0xff] %vm1338_vm7, %v3618_v26 }
 0x64e   : > { %v3844_v1 = vpop.permute.xlu1 %3843 }
 0x64f   : > { %3908 = vst.msk [vmem:[#allocation3 + $0xf8] sm:$0xff] %vm1532_vm8, %v3844_v1 }
 0x650   : > { %v3842_v14 = vpop.permute.xlu0 %3841 }
 0x651   : > { %3907 = vst.msk [vmem:[#allocation3 + $0xf0] sm:$0xff] %vm1532_vm8, %v3842_v14 }
 0x652   : > { %v3812_v44 = vpop.permute.xlu1 %3811 }
 0x653   : > { %3892 = vst.msk [vmem:[#allocation3 + $0x78] sm:$0xff] %vm1532_vm8, %v3812_v44 }
 0x654   : > { %v3810_v30 = vpop.permute.xlu0 %3809 }
 0x655   : > { %3891 = vst.msk [vmem:[#allocation3 + $0x70] sm:$0xff] %vm1532_vm8, %v3810_v30 }
 0x656   : > { %v4036_v48 = vpop.permute.xlu1 %4035 }
 0x657   : > { %4100 = vst.msk [vmem:[#allocation3 + $0xf8] sm:$0xff] %vm1725_vm9, %v4036_v48 }
 0x658   : > { %v4034_v17 = vpop.permute.xlu0 %4033 }
 0x659   : > { %4099 = vst.msk [vmem:[#allocation3 + $0xf0] sm:$0xff] %vm1725_vm9, %v4034_v17 }
 0x65a   : > { %v4004_v49 = vpop.permute.xlu1 %4003 }
 0x65b   : > { %4084 = vst.msk [vmem:[#allocation3 + $0x78] sm:$0xff] %vm1725_vm9, %v4004_v49 }
 0x65c   : > { %v4002_v50 = vpop.permute.xlu0 %4001 }
 0x65d   : > { %4083 = vst.msk [vmem:[#allocation3 + $0x70] sm:$0xff] %vm1725_vm9, %v4002_v50 }
 0x65e   : > { %v4228_v0 = vpop.permute.xlu1 %4227 }
 0x65f   : > { %4292 = vst.msk [vmem:[#allocation3 + $0xf8] sm:$0xff] %vm1918_vm10, %v4228_v0 }
 0x660   : > { %v4226_v23 = vpop.permute.xlu0 %4225 }
 0x661   : > { %4291 = vst.msk [vmem:[#allocation3 + $0xf0] sm:$0xff] %vm1918_vm10, %v4226_v23 }
 0x662   : > { %v4196_v2 = vpop.permute.xlu1 %4195 }
 0x663   : > { %4276 = vst.msk [vmem:[#allocation3 + $0x78] sm:$0xff] %vm1918_vm10, %v4196_v2 }
 0x664   : > { %v4194_v38 = vpop.permute.xlu0 %4193 }
 0x665   : > { %4275 = vst.msk [vmem:[#allocation3 + $0x70] sm:$0xff] %vm1918_vm10, %v4194_v38 }
 0x666   : > { %v4324_v42 = vld [vmem:[#allocation3 + $0xf8] sm:$0xff] }
 0x668   : > { %v4323_v27 = vld [vmem:[#allocation3 + $0xf0] sm:$0xff] }
 0x669   : > { %v4817_v45 = vpack.c.bf16 %v4324_v42, %v4323_v27 }
 0x66a   : > { %v4308_v8 = vld [vmem:[#allocation3 + $0x78] sm:$0xff] }
 0x66b   : > { %4819 = vmatprep.subr.msk.bf16.mxu1 %vm6791_vm12, %v4817_v45 }
 0x66c   : > { %v4307_v61 = vld [vmem:[#allocation3 + $0x70] sm:$0xff] }
 0x66d   : > { %v4820_v57 = vpack.c.bf16 %v4308_v8, %v4307_v61 }
 0x66f   : > { %4822 = vmatpush3.bf16.xpose.msk.msra.mxu1 %vm6791_vm12, %v4820_v57 }
 0x675   : > { %v4330_v7 = vpop.permute.xlu0 %4329 }
 0x676   : > { %4708 = vmatmul.mubr.msk.f32.vlgmr.msra.gmra.mrb[0].mxu1 %vm1988_vm11, %v7010_v43 }
 0x749   : > { %v4497_v11 = vpop.f32.mrb[0].mxu1 }
 0x74a   : > { %v4498_v40 = vadd.f32 %v4497_v11, %v4330_v7  ;;  %v4499_v16 = vpop.f32.mrb[1].mxu1 }
 0x74b   : > { %v4500_v13 = vadd.f32 %v4499_v16, %v4330_v7 }
 0x74c   : > { %4502 = vst [vmem:[%s197_s22] sm:$0xff] %v4498_v40 }
 0x74d   : > { %4503 = vst [vmem:[%s197_s22 + $0x8] sm:$0xff] %v4500_v13 }
 0x74e PF: > { %s14_s15 = sadd.s32 1, %s4849_s15  }
 0x74f   : > { %p11_p4 = scmp.ge.s32.totalorder %s14_s15, 4  }
 0x751   :  { %13 = sbr.rel (!%p11_p4) target bundleno = 1 (0x1), region = 69 }

</bundles_post_ra>
